<compile_context>
chip_gen: v5e
topology: v5e:2x2
jax: 0.10.0
libtpu: 0.0.40
codegen_flags: <defaults>
</compile_context>

<pallas_src>
import functools

import jax
import jax.numpy as jnp
import numpy as np
from jax import lax
from jax.experimental import pallas as pl
from jax.experimental.pallas import tpu as pltpu

LEAKY_SLOPE = 0.2
BN_EPS = 1e-5
KSZ = 4  # every conv in the Unet is 4x4

_MIB = 1024 * 1024


def _detect_vmem_capacity_bytes():
    """Physical VMEM per TensorCore (v5e/v6e: 128 MiB, v7x: 64 MiB)."""
    try:
        info = pltpu.get_tpu_info()
        cap = int(getattr(info, "vmem_capacity_bytes", 0) or 0)
        if cap > 0:
            return cap
    except Exception:
        pass
    return 64 * _MIB  # conservative fallback == smallest (v7x) per-core VMEM


_VMEM_CAP = _detect_vmem_capacity_bytes()
_B_BUDGET = 8 * _MIB                          # bf16 weight kept whole-K VMEM-resident
_VMEM_FOOTPRINT_BUDGET = max(16 * _MIB, min(_VMEM_CAP // 2 - 6 * _MIB, 64 * _MIB))
_VMEM_LIMIT = max(32 * _MIB, min(3 * _VMEM_CAP // 4, 96 * _MIB))


def _round_up(x, m):
    return (x + m - 1) // m * m


def _apply_act(x, act):
    if act == "leaky_relu":
        return jnp.where(x >= 0, x, LEAKY_SLOPE * x)
    if act == "relu":
        return jnp.maximum(x, 0)
    if act == "tanh":
        return jnp.tanh(x)
    return x


# ----------------------------------------------------------------------------
# Pallas kernels: fused  out = post_act(A @ B + shift)
#   A/B are bf16, accumulation + epilogue in f32, output cast to out dtype.
#   _mm_kernel_direct : single K step (whole weight resident) -> no scratch.
#   _mm_kernel_acc    : K split over a reduction grid axis -> f32 accumulator.
# ----------------------------------------------------------------------------
def _mm_kernel_direct(a_ref, b_ref, shift_ref, o_ref, *, post_act):
    y = jnp.dot(a_ref[0], b_ref[0], preferred_element_type=jnp.float32)
    y = y + shift_ref[...]
    y = _apply_act(y, post_act)
    o_ref[0] = y.astype(o_ref.dtype)


def _mm_kernel_acc(a_ref, b_ref, shift_ref, o_ref, acc_ref, *, post_act):
    k = pl.program_id(3)

    @pl.when(k == 0)
    def _():
        acc_ref[...] = jnp.zeros_like(acc_ref)

    acc_ref[...] += jnp.dot(a_ref[0], b_ref[0],
                            preferred_element_type=jnp.float32)

    @pl.when(k == pl.num_programs(3) - 1)
    def _():
        y = acc_ref[...] + shift_ref[...]
        y = _apply_act(y, post_act)
        o_ref[0] = y.astype(o_ref.dtype)


def fused_matmul(a, b, shift_p, nc, tk, post_act="none", out_dtype=jnp.bfloat16):
    """a: (P, M, K) bf16;  b: (P, Kp, Np) bf16 (scale folded, pre-padded);
    shift_p: (1, Np) f32.  Returns (P, M, nc) in out_dtype."""
    P, M, K = a.shape
    _, Kp, Np = b.shape
    kt = Kp // tk
    out_isz = jnp.dtype(out_dtype).itemsize

    # M tile: as large as the VMEM footprint budget allows (16-row granularity
    # for bf16 sublane packing), capped at 2048.
    tm = min(2048, _round_up(max(M, 1), 16))
    tn = Np

    def footprint(tm_, tn_):
        return (2 * tm_ * tk * 2            # A, double-buffered bf16
                + 2 * tk * tn_ * 2          # B, double-buffered bf16
                + 2 * tm_ * tn_ * out_isz   # out, double-buffered
                + (tm_ * tn_ * 4 if kt > 1 else 0))  # f32 acc scratch

    while footprint(tm, tn) > _VMEM_FOOTPRINT_BUDGET and tm > 16:
        tm = max(16, _round_up(tm // 2, 16))

    Mp = _round_up(M, tm)
    mt = Mp // tm

    # Weight-heavy, single-M-tile layers: split N so both v7x TensorCores get
    # work and per-core resident B is halved.  Harmless on single-TC parts.
    if (P == 1 and mt == 1 and kt == 1 and Np >= 256 and Np % 256 == 0
            and Kp * Np * 2 >= 2 * _MIB):
        tn = Np // 2
    nt = Np // tn

    if (Mp != M) or (Kp != K):              # only pad when actually required
        a = jnp.pad(a, ((0, 0), (0, Mp - M), (0, Kp - K)))

    if kt == 1:
        grid = (P, mt, nt)
        in_specs = [
            pl.BlockSpec((1, tm, tk), lambda p, i, j: (p, i, 0)),
            pl.BlockSpec((1, tk, tn), lambda p, i, j: (p, 0, j)),
            pl.BlockSpec((1, tn), lambda p, i, j: (0, j)),
        ]
        out_spec = pl.BlockSpec((1, tm, tn), lambda p, i, j: (p, i, j))
        scratch = []
        kernel = functools.partial(_mm_kernel_direct, post_act=post_act)
        dims = ("parallel", "parallel", "parallel")
    else:
        grid = (P, mt, nt, kt)
        in_specs = [
            pl.BlockSpec((1, tm, tk), lambda p, i, j, k: (p, i, k)),
            pl.BlockSpec((1, tk, tn), lambda p, i, j, k: (p, k, j)),
            pl.BlockSpec((1, tn), lambda p, i, j, k: (0, j)),
        ]
        out_spec = pl.BlockSpec((1, tm, tn), lambda p, i, j, k: (p, i, j))
        scratch = [pltpu.VMEM((tm, tn), jnp.float32)]
        kernel = functools.partial(_mm_kernel_acc, post_act=post_act)
        dims = ("parallel", "parallel", "parallel", "arbitrary")

    out = pl.pallas_call(
        kernel,
        out_shape=jax.ShapeDtypeStruct((P, Mp, Np), out_dtype),
        grid_spec=pltpu.PrefetchScalarGridSpec(
            num_scalar_prefetch=0,
            grid=grid,
            in_specs=in_specs,
            out_specs=out_spec,
            scratch_shapes=scratch),
        compiler_params=pltpu.CompilerParams(
            dimension_semantics=dims,
            vmem_limit_bytes=_VMEM_LIMIT),
    )(a, b, shift_p)
    return out[:, :M, :nc]


# ----------------------------------------------------------------------------
# One-time weight preprocessing (GEMM-ready, scale folded, padded, bf16)
# ----------------------------------------------------------------------------
def _gemm_geometry(K, nc):
    """Padded K/N and the K-tile for a (K, nc) weight matrix (single source)."""
    Np = _round_up(nc, 128)
    Kp = _round_up(K, 128)
    if Kp * Np * 2 <= _B_BUDGET:        # whole weight stays VMEM-resident (bf16)
        tk = Kp
    else:
        Kp = _round_up(K, 512)
        tk = 512
    return Kp, Np, tk


def prep_down_gemm(w_oihw, scale, shift):
    out_c, in_c = w_oihw.shape[0], w_oihw.shape[1]
    K = KSZ * KSZ * in_c
    Kp, Np, tk = _gemm_geometry(K, out_c)
    b = jnp.transpose(w_oihw, (2, 3, 1, 0)).reshape(K, out_c)       # rows: (dy, dx, cin)
    b = b.astype(jnp.float32) * scale[None, :].astype(jnp.float32)  # fold BN scale
    b = jnp.pad(b, ((0, Kp - K), (0, Np - out_c))).astype(jnp.bfloat16)[None]
    t = jnp.pad(shift.astype(jnp.float32), (0, Np - out_c)).reshape(1, Np)
    return {"b": b, "shift": t, "nc": out_c, "tk": tk}


def _transpose_weight_to_conv(w_iohw):
    # ConvTranspose2d weight (C_in, C_out, kh, kw) -> equivalent direct-conv OIHW
    return jnp.transpose(jnp.flip(w_iohw, axis=(2, 3)), (1, 0, 2, 3))


def prep_up_gemm(w_iohw, scale, shift):
    in_c, out_c = w_iohw.shape[0], w_iohw.shape[1]
    w_eff = _transpose_weight_to_conv(w_iohw)                       # (out, in, 4, 4)
    K = 4 * in_c                                                    # 2x2 per phase
    Kp, Np, tk = _gemm_geometry(K, out_c)
    bs = []
    for py in range(2):
        for px in range(2):
            # phase (py,px) sub-kernel: taps dy = 2*ty + py, dx = 2*tx + px
            sub = w_eff[:, :, py::2, px::2]                         # (out, in, 2, 2)
            bmat = jnp.transpose(sub, (2, 3, 1, 0)).reshape(K, out_c)  # rows: (ty, tx, cin)
            bmat = bmat.astype(jnp.float32) * scale[None, :].astype(jnp.float32)
            bs.append(jnp.pad(bmat, ((0, Kp - K), (0, Np - out_c))))
    b = jnp.stack(bs, axis=0).astype(jnp.bfloat16)                  # (4, Kp, Np)
    t = jnp.pad(shift.astype(jnp.float32), (0, Np - out_c)).reshape(1, Np)
    return {"b": b, "shift": t, "nc": out_c, "tk": tk}


def preprocess_block(blk):
    return {
        "innermost": blk["innermost"],
        "outermost": blk["outermost"],
        "down": prep_down_gemm(blk["down_w"], blk["down_scale"], blk["down_shift"]),
        "up": prep_up_gemm(blk["up_w"], blk["up_scale"], blk["up_shift"]),
        "submodule": (preprocess_block(blk["submodule"])
                      if blk["submodule"] is not None else None),
    }


# ----------------------------------------------------------------------------
# Conv2d / ConvTranspose2d (k=4, s=2, p=1) via im2col + fused Pallas GEMM
# ----------------------------------------------------------------------------
def conv_down(x, p_down, pre_act):
    """Conv2d(C_in, C_out, 4, stride=2, pad=1, bias=False) + affine.  x: NHWC."""
    n, h, w, c = x.shape
    oh, ow = h // 2, w // 2
    xa = _apply_act(x, pre_act).astype(jnp.bfloat16)
    xp = jnp.pad(xa, ((0, 0), (1, 1), (1, 1), (0, 0)))
    # TODO(synk): gather the 16 taps inside the kernel instead of materialising
    # the im2col matrix in HBM (strided VMEM windows / manual DMA).
    cols = [xp[:, dy:dy + 2 * oh:2, dx:dx + 2 * ow:2, :]
            for dy in range(KSZ) for dx in range(KSZ)]
    a = jnp.stack(cols, axis=3).reshape(1, n * oh * ow, KSZ * KSZ * c)
    y = fused_matmul(a, p_down["b"], p_down["shift"], nc=p_down["nc"],
                     tk=p_down["tk"], post_act="none", out_dtype=jnp.bfloat16)
    return y[0].reshape(n, oh, ow, p_down["nc"])


def conv_up(x, p_up, post_act):
    """ReLU -> ConvTranspose2d(4, stride=2, pad=1) + affine (+ optional tanh).
    Decomposed into 4 output phases, each a 2x2 stride-1 conv (no dilation zeros)."""
    n, h, w, c = x.shape
    xa = _apply_act(x, "relu").astype(jnp.bfloat16)    # uprelu precedes every up-conv
    xp = jnp.pad(xa, ((0, 0), (1, 1), (1, 1), (0, 0)))
    phases = []
    for py in range(2):
        for px in range(2):
            taps = [xp[:, py + ty:py + ty + h, px + tx:px + tx + w, :]
                    for ty in range(2) for tx in range(2)]
            phases.append(jnp.stack(taps, axis=3).reshape(n * h * w, 4 * c))
    a = jnp.stack(phases, axis=0)                      # (4, N*h*w, 4*c) bf16
    nc = p_up["nc"]
    y = fused_matmul(a, p_up["b"], p_up["shift"], nc=nc, tk=p_up["tk"],
                     post_act=post_act, out_dtype=jnp.bfloat16)     # (4, N*h*w, nc)
    # Phase de-interleave in bf16 (half the HBM traffic of the old f32 pass).
    y = y.reshape(2, 2, n, h, w, nc)
    y = jnp.transpose(y, (2, 3, 0, 4, 1, 5)).reshape(n, 2 * h, 2 * w, nc)
    return y


# ----------------------------------------------------------------------------
# Unet parameters (mirror UnetBlock / Unet __init__) - deterministic synthetic init
# ----------------------------------------------------------------------------
def _conv_w(key, out_c, in_c):
    return 0.02 * jax.random.normal(key, (out_c, in_c, KSZ, KSZ), jnp.float32)


def _convT_w(key, in_c, out_c):
    return 0.02 * jax.random.normal(key, (in_c, out_c, KSZ, KSZ), jnp.float32)


def _bn_fold(key, c):
    kg, kb = jax.random.split(key)
    gamma = 1.0 + 0.1 * jax.random.normal(kg, (c,), jnp.float32)
    beta = 0.1 * jax.random.normal(kb, (c,), jnp.float32)
    # eval-mode BatchNorm with fresh running stats: mean=0, var=1
    scale = gamma / jnp.sqrt(1.0 + BN_EPS)
    shift = beta
    return scale, shift


def make_unet_block(key, nf, ni, submodule=None, input_c=None, dropout=False,
                    innermost=False, outermost=False):
    if input_c is None:
        input_c = nf
    ks = jax.random.split(key, 4)
    blk = {"innermost": innermost, "outermost": outermost, "dropout": dropout,
           "submodule": submodule}
    blk["down_w"] = _conv_w(ks[0], ni, input_c)  # Conv2d(input_c, ni, 4, 2, 1, bias=False)
    if outermost:
        blk["up_w"] = _convT_w(ks[1], ni * 2, nf)  # ConvTranspose2d(ni*2, nf, ..., bias=True)
        blk["up_scale"] = jnp.ones((nf,), jnp.float32)
        blk["up_shift"] = 0.02 * jax.random.normal(ks[2], (nf,), jnp.float32)  # conv-T bias
        blk["down_scale"] = jnp.ones((ni,), jnp.float32)
        blk["down_shift"] = jnp.zeros((ni,), jnp.float32)
    elif innermost:
        blk["up_w"] = _convT_w(ks[1], ni, nf)
        blk["up_scale"], blk["up_shift"] = _bn_fold(ks[2], nf)
        blk["down_scale"] = jnp.ones((ni,), jnp.float32)
        blk["down_shift"] = jnp.zeros((ni,), jnp.float32)
    else:
        blk["down_scale"], blk["down_shift"] = _bn_fold(ks[3], ni)
        blk["up_w"] = _convT_w(ks[1], ni * 2, nf)
        blk["up_scale"], blk["up_shift"] = _bn_fold(ks[2], nf)
    return blk


def make_unet_params(key, input_c=1, output_c=2, n_down=8, num_filters=64):
    keys = iter(jax.random.split(key, n_down + 2))
    block = make_unet_block(next(keys), num_filters * 8, num_filters * 8, innermost=True)
    for _ in range(n_down - 5):
        block = make_unet_block(next(keys), num_filters * 8, num_filters * 8,
                                submodule=block, dropout=True)
    out_filters = num_filters * 8
    for _ in range(3):
        block = make_unet_block(next(keys), out_filters // 2, out_filters, submodule=block)
        out_filters //= 2
    return make_unet_block(next(keys), output_c, out_filters, input_c=input_c,
                           submodule=block, outermost=True)


# ----------------------------------------------------------------------------
# Unet forward (Pallas path).  x: NHWC, preprocessed params
# ----------------------------------------------------------------------------
def unet_block_forward(p, x):
    if p["outermost"]:
        d = conv_down(x, p["down"], pre_act="none")
        s = unet_block_forward(p["submodule"], d)
        return conv_up(s, p["up"], post_act="tanh")
    if p["innermost"]:
        d = conv_down(x, p["down"], pre_act="leaky_relu")
        u = conv_up(d, p["up"], post_act="none")
        return jnp.concatenate([x, u], axis=-1)
    d = conv_down(x, p["down"], pre_act="leaky_relu")
    s = unet_block_forward(p["submodule"], d)
    u = conv_up(s, p["up"], post_act="none")
    # Dropout(0.5): identity (eval-mode forward, as exercised by MainModel.validate()).
    return jnp.concatenate([x, u], axis=-1)


# ----------------------------------------------------------------------------
# MainModel (only the forward path matters here)
# ----------------------------------------------------------------------------
class MainModelPallas:
    """Pallas TPU port of MainModel's forward(): self.fake_color = net_G(self.L)."""

    def __init__(self, key, net_G_params=None, lambda_L1=100.0):
        self.lambda_L1 = lambda_L1
        if net_G_params is None:
            net_G_params = make_unet_params(key, input_c=1, output_c=2,
                                            n_down=8, num_filters=64)
        self.net_G = net_G_params
        # One-time weight preprocessing: GEMM-ready bf16 matrices, BN scale folded,
        # padded to tile geometry.
        self._prep = preprocess_block(net_G_params)

        def _fwd(L):
            x = jnp.transpose(L, (0, 2, 3, 1))             # NCHW -> NHWC
            y = unet_block_forward(self._prep, x)          # (N, H, W, 2) bf16
            y = y.astype(jnp.float32)                      # upcast the small final tensor
            return jnp.transpose(y, (0, 3, 1, 2))          # NHWC -> NCHW
        self._fwd = jax.jit(_fwd)
        # net_D / GANLoss / L1Loss / Adam optimizers are training-only members and
        # are not part of forward(); they are intentionally not instantiated.

    def setup_input(self, data):
        self.L = data["L"]      # (N, 1, H, W)  NCHW
        self.ab = data["ab"]    # (N, 2, H, W)  NCHW

    def forward(self):
        self.fake_color = self._fwd(self.L)
        return self.fake_color


# ----------------------------------------------------------------------------
# Pure-JAX (XLA conv) reference for numeric cross-check.  It uses the same
# precision policy as the Pallas path (bf16 scale-folded weights, f32
# accumulation, bf16 intermediate activations) so the comparison isolates the
# kernel math itself.
# ----------------------------------------------------------------------------
def _ref_conv_down(x, w, scale, shift, pre_act):
    xa = _apply_act(x, pre_act).astype(jnp.bfloat16)
    wf = (w * scale[:, None, None, None]).astype(jnp.bfloat16)
    y = lax.conv_general_dilated(
        xa, wf, (2, 2), [(1, 1), (1, 1)],
        dimension_numbers=("NHWC", "OIHW", "NHWC"),
        preferred_element_type=jnp.float32)
    return (y + shift).astype(jnp.bfloat16)


def _ref_conv_up(x, w_iohw, scale, shift, post_act="none", out_dtype=jnp.bfloat16):
    xa = _apply_act(x, "relu").astype(jnp.bfloat16)
    w_eff = _transpose_weight_to_conv(w_iohw)
    wf = (w_eff * scale[:, None, None, None]).astype(jnp.bfloat16)
    y = lax.conv_general_dilated(
        xa, wf, (1, 1), [(2, 2), (2, 2)], lhs_dilation=(2, 2),
        dimension_numbers=("NHWC", "OIHW", "NHWC"),
        preferred_element_type=jnp.float32)
    return _apply_act(y + shift, post_act).astype(out_dtype)


def ref_unet_forward(blk, x):
    if blk["outermost"]:
        d = _ref_conv_down(x, blk["down_w"], blk["down_scale"], blk["down_shift"], "none")
        s = ref_unet_forward(blk["submodule"], d)
        return _ref_conv_up(s, blk["up_w"], blk["up_scale"], blk["up_shift"],
                            post_act="tanh", out_dtype=jnp.float32)
    if blk["innermost"]:
        d = _ref_conv_down(x, blk["down_w"], blk["down_scale"], blk["down_shift"], "leaky_relu")
        u = _ref_conv_up(d, blk["up_w"], blk["up_scale"], blk["up_shift"])
        return jnp.concatenate([x, u], axis=-1)
    d = _ref_conv_down(x, blk["down_w"], blk["down_scale"], blk["down_shift"], "leaky_relu")
    s = ref_unet_forward(blk["submodule"], d)
    u = _ref_conv_up(s, blk["up_w"], blk["up_scale"], blk["up_shift"])
    return jnp.concatenate([x, u], axis=-1)


if __name__ == "__main__":
    key = jax.random.PRNGKey(0)
    k_params, k_L, k_ab = jax.random.split(key, 3)

    # Small generator consistent with the module: MainModel(net_G=Unet(...)).
    # (The default Unet(n_down=8, num_filters=64) requires 256x256 inputs; here we
    #  pass a reduced Unet through the net_G argument, exactly as MainModel allows.
    #  Structure/semantics per block are identical.)
    net_G_params = make_unet_params(k_params, input_c=1, output_c=2,
                                    n_down=5, num_filters=8)
    model = MainModelPallas(k_params, net_G_params=net_G_params)

    N, H, W = 2, 32, 32
    data = {
        "L":  jax.random.normal(k_L,  (N, 1, H, W), jnp.float32),
        "ab": jax.random.normal(k_ab, (N, 2, H, W), jnp.float32),
    }

    model.setup_input(data)
    out = model.forward()
    out = jax.block_until_ready(out)
    assert out.shape == (N, 2, H, W), out.shape

    # Cross-check Pallas path against a pure-JAX (XLA conv) reference using the
    # same precision policy (bf16 folded weights / activations, f32 accumulation).
    ref_nhwc = ref_unet_forward(net_G_params, jnp.transpose(data["L"], (0, 2, 3, 1)))
    ref = jnp.transpose(ref_nhwc, (0, 3, 1, 2))
    np.testing.assert_allclose(np.asarray(out), np.asarray(ref), atol=5e-3, rtol=5e-3)

    print("KERNEL_OK")
</pallas_src>

<mosaic_0001>
module attributes {stable_mosaic.version = 11 : i64} {
  func.func @_mm_kernel_direct(%arg0: i32, %arg1: i32, %arg2: i32, %arg3: memref<1x512x128xbf16, #tpu.memory_space<vmem>>, %arg4: memref<1x128x128xbf16, #tpu.memory_space<vmem>>, %arg5: memref<1x128xf32, #tpu.memory_space<vmem>>, %arg6: memref<1x512x128xbf16, #tpu.memory_space<vmem>>) attributes {dimension_semantics = [#tpu.dimension_semantics<parallel>, #tpu.dimension_semantics<parallel>, #tpu.dimension_semantics<parallel>], iteration_bounds = array<i64: 1, 1, 1>, scalar_prefetch = 0 : i64, scratch_operands = 0 : i64, tpu.core_type = #tpu.core_type<tc>, window_params = [{transform_indices = @transform_0, window_bounds = array<i64: 1, 512, 128>}, {transform_indices = @transform_1, window_bounds = array<i64: 1, 128, 128>}, {transform_indices = @transform_2, window_bounds = array<i64: 1, 128>}, {transform_indices = @transform_3, window_bounds = array<i64: 1, 512, 128>}]} {
    %c0 = arith.constant 0 : index
    %c0_0 = arith.constant 0 : index
    %c0_1 = arith.constant 0 : index
    %0 = vector.load %arg3[%c0, %c0_0, %c0_1] : memref<1x512x128xbf16, #tpu.memory_space<vmem>>, vector<1x512x128xbf16>
    %1 = vector.shape_cast %0 : vector<1x512x128xbf16> to vector<512x128xbf16>
    %c0_2 = arith.constant 0 : index
    %c0_3 = arith.constant 0 : index
    %c0_4 = arith.constant 0 : index
    %2 = vector.load %arg4[%c0_2, %c0_3, %c0_4] : memref<1x128x128xbf16, #tpu.memory_space<vmem>>, vector<1x128x128xbf16>
    %3 = vector.shape_cast %2 : vector<1x128x128xbf16> to vector<128x128xbf16>
    %cst = arith.constant dense<0.000000e+00> : vector<512x128xf32>
    %4 = tpu.matmul %1, %3, %cst {dimension_numbers = #tpu.dot_dimension_numbers<[1], [0], [0], [1], [0, 0, 1, 1], [], []>} : vector<512x128xbf16>, vector<128x128xbf16>, vector<512x128xf32> -> vector<512x128xf32>
    %c0_5 = arith.constant 0 : index
    %c0_6 = arith.constant 0 : index
    %5 = vector.load %arg5[%c0_5, %c0_6] : memref<1x128xf32, #tpu.memory_space<vmem>>, vector<1x128xf32>
    %6 = vector.broadcast %5 : vector<1x128xf32> to vector<512x128xf32>
    %7 = arith.addf %4, %6 : vector<512x128xf32>
    %8 = arith.truncf %7 : vector<512x128xf32> to vector<512x128xbf16>
    %c0_7 = arith.constant 0 : index
    %c0_8 = arith.constant 0 : index
    %c0_9 = arith.constant 0 : index
    %9 = vector.load %arg6[%c0_7, %c0_8, %c0_9] : memref<1x512x128xbf16, #tpu.memory_space<vmem>>, vector<1x512x128xbf16>
    %10 = vector.shape_cast %9 : vector<1x512x128xbf16> to vector<512x128xbf16>
    %11 = vector.shape_cast %8 : vector<512x128xbf16> to vector<1x512x128xbf16>
    tpu.vector_store %arg6[%c0_7, %c0_8, %c0_9], %11 {strides = array<i32>} : memref<1x512x128xbf16, #tpu.memory_space<vmem>>, vector<1x512x128xbf16>,
    return
  }
  func.func @transform_0(%arg0: i32, %arg1: i32, %arg2: i32) -> (i32, i32, i32) {
    %c0_i32 = arith.constant 0 : i32
    %c0_i32_0 = arith.constant 0 : i32
    return %arg0, %arg1, %c0_i32 : i32, i32, i32
  }
  func.func @transform_1(%arg0: i32, %arg1: i32, %arg2: i32) -> (i32, i32, i32) {
    %c0_i32 = arith.constant 0 : i32
    %c0_i32_0 = arith.constant 0 : i32
    return %arg0, %c0_i32, %arg2 : i32, i32, i32
  }
  func.func @transform_2(%arg0: i32, %arg1: i32, %arg2: i32) -> (i32, i32) {
    %c0_i32 = arith.constant 0 : i32
    %c0_i32_0 = arith.constant 0 : i32
    return %c0_i32, %arg2 : i32, i32
  }
  func.func @transform_3(%arg0: i32, %arg1: i32, %arg2: i32) -> (i32, i32, i32) {
    %c0_i32 = arith.constant 0 : i32
    return %arg0, %arg1, %arg2 : i32, i32, i32
  }
}

module attributes {stable_mosaic.version = 11 : i64} {
  func.func @_mm_kernel_direct(%arg0: i32, %arg1: i32, %arg2: i32, %arg3: memref<1x128x128xbf16, #tpu.memory_space<vmem>>, %arg4: memref<1x128x128xbf16, #tpu.memory_space<vmem>>, %arg5: memref<1x128xf32, #tpu.memory_space<vmem>>, %arg6: memref<1x128x128xbf16, #tpu.memory_space<vmem>>) attributes {dimension_semantics = [#tpu.dimension_semantics<parallel>, #tpu.dimension_semantics<parallel>, #tpu.dimension_semantics<parallel>], iteration_bounds = array<i64: 1, 1, 1>, scalar_prefetch = 0 : i64, scratch_operands = 0 : i64, tpu.core_type = #tpu.core_type<tc>, window_params = [{transform_indices = @transform_0, window_bounds = array<i64: 1, 128, 128>}, {transform_indices = @transform_1, window_bounds = array<i64: 1, 128, 128>}, {transform_indices = @transform_2, window_bounds = array<i64: 1, 128>}, {transform_indices = @transform_3, window_bounds = array<i64: 1, 128, 128>}]} {
    %c0 = arith.constant 0 : index
    %c0_0 = arith.constant 0 : index
    %c0_1 = arith.constant 0 : index
    %0 = vector.load %arg3[%c0, %c0_0, %c0_1] : memref<1x128x128xbf16, #tpu.memory_space<vmem>>, vector<1x128x128xbf16>
    %1 = vector.shape_cast %0 : vector<1x128x128xbf16> to vector<128x128xbf16>
    %c0_2 = arith.constant 0 : index
    %c0_3 = arith.constant 0 : index
    %c0_4 = arith.constant 0 : index
    %2 = vector.load %arg4[%c0_2, %c0_3, %c0_4] : memref<1x128x128xbf16, #tpu.memory_space<vmem>>, vector<1x128x128xbf16>
    %3 = vector.shape_cast %2 : vector<1x128x128xbf16> to vector<128x128xbf16>
    %cst = arith.constant dense<0.000000e+00> : vector<128x128xf32>
    %4 = tpu.matmul %1, %3, %cst {dimension_numbers = #tpu.dot_dimension_numbers<[1], [0], [0], [1], [0, 0, 1, 1], [], []>} : vector<128x128xbf16>, vector<128x128xbf16>, vector<128x128xf32> -> vector<128x128xf32>
    %c0_5 = arith.constant 0 : index
    %c0_6 = arith.constant 0 : index
    %5 = vector.load %arg5[%c0_5, %c0_6] : memref<1x128xf32, #tpu.memory_space<vmem>>, vector<1x128xf32>
    %6 = vector.broadcast %5 : vector<1x128xf32> to vector<128x128xf32>
    %7 = arith.addf %4, %6 : vector<128x128xf32>
    %8 = arith.truncf %7 : vector<128x128xf32> to vector<128x128xbf16>
    %c0_7 = arith.constant 0 : index
    %c0_8 = arith.constant 0 : index
    %c0_9 = arith.constant 0 : index
    %9 = vector.load %arg6[%c0_7, %c0_8, %c0_9] : memref<1x128x128xbf16, #tpu.memory_space<vmem>>, vector<1x128x128xbf16>
    %10 = vector.shape_cast %9 : vector<1x128x128xbf16> to vector<128x128xbf16>
    %11 = vector.shape_cast %8 : vector<128x128xbf16> to vector<1x128x128xbf16>
    tpu.vector_store %arg6[%c0_7, %c0_8, %c0_9], %11 {strides = array<i32>} : memref<1x128x128xbf16, #tpu.memory_space<vmem>>, vector<1x128x128xbf16>,
    return
  }
  func.func @transform_0(%arg0: i32, %arg1: i32, %arg2: i32) -> (i32, i32, i32) {
    %c0_i32 = arith.constant 0 : i32
    %c0_i32_0 = arith.constant 0 : i32
    return %arg0, %arg1, %c0_i32 : i32, i32, i32
  }
  func.func @transform_1(%arg0: i32, %arg1: i32, %arg2: i32) -> (i32, i32, i32) {
    %c0_i32 = arith.constant 0 : i32
    %c0_i32_0 = arith.constant 0 : i32
    return %arg0, %c0_i32, %arg2 : i32, i32, i32
  }
  func.func @transform_2(%arg0: i32, %arg1: i32, %arg2: i32) -> (i32, i32) {
    %c0_i32 = arith.constant 0 : i32
    %c0_i32_0 = arith.constant 0 : i32
    return %c0_i32, %arg2 : i32, i32
  }
  func.func @transform_3(%arg0: i32, %arg1: i32, %arg2: i32) -> (i32, i32, i32) {
    %c0_i32 = arith.constant 0 : i32
    return %arg0, %arg1, %arg2 : i32, i32, i32
  }
}

module attributes {stable_mosaic.version = 11 : i64} {
  func.func @_mm_kernel_direct(%arg0: i32, %arg1: i32, %arg2: i32, %arg3: memref<1x32x256xbf16, #tpu.memory_space<vmem>>, %arg4: memref<1x256x128xbf16, #tpu.memory_space<vmem>>, %arg5: memref<1x128xf32, #tpu.memory_space<vmem>>, %arg6: memref<1x32x128xbf16, #tpu.memory_space<vmem>>) attributes {dimension_semantics = [#tpu.dimension_semantics<parallel>, #tpu.dimension_semantics<parallel>, #tpu.dimension_semantics<parallel>], iteration_bounds = array<i64: 1, 1, 1>, scalar_prefetch = 0 : i64, scratch_operands = 0 : i64, tpu.core_type = #tpu.core_type<tc>, window_params = [{transform_indices = @transform_0, window_bounds = array<i64: 1, 32, 256>}, {transform_indices = @transform_1, window_bounds = array<i64: 1, 256, 128>}, {transform_indices = @transform_2, window_bounds = array<i64: 1, 128>}, {transform_indices = @transform_3, window_bounds = array<i64: 1, 32, 128>}]} {
    %c0 = arith.constant 0 : index
    %c0_0 = arith.constant 0 : index
    %c0_1 = arith.constant 0 : index
    %0 = vector.load %arg3[%c0, %c0_0, %c0_1] : memref<1x32x256xbf16, #tpu.memory_space<vmem>>, vector<1x32x256xbf16>
    %1 = vector.shape_cast %0 : vector<1x32x256xbf16> to vector<32x256xbf16>
    %c0_2 = arith.constant 0 : index
    %c0_3 = arith.constant 0 : index
    %c0_4 = arith.constant 0 : index
    %2 = vector.load %arg4[%c0_2, %c0_3, %c0_4] : memref<1x256x128xbf16, #tpu.memory_space<vmem>>, vector<1x256x128xbf16>
    %3 = vector.shape_cast %2 : vector<1x256x128xbf16> to vector<256x128xbf16>
    %cst = arith.constant dense<0.000000e+00> : vector<32x128xf32>
    %4 = tpu.matmul %1, %3, %cst {dimension_numbers = #tpu.dot_dimension_numbers<[1], [0], [0], [1], [0, 0, 1, 1], [], []>} : vector<32x256xbf16>, vector<256x128xbf16>, vector<32x128xf32> -> vector<32x128xf32>
    %c0_5 = arith.constant 0 : index
    %c0_6 = arith.constant 0 : index
    %5 = vector.load %arg5[%c0_5, %c0_6] : memref<1x128xf32, #tpu.memory_space<vmem>>, vector<1x128xf32>
    %6 = vector.broadcast %5 : vector<1x128xf32> to vector<32x128xf32>
    %7 = arith.addf %4, %6 : vector<32x128xf32>
    %8 = arith.truncf %7 : vector<32x128xf32> to vector<32x128xbf16>
    %c0_7 = arith.constant 0 : index
    %c0_8 = arith.constant 0 : index
    %c0_9 = arith.constant 0 : index
    %9 = vector.load %arg6[%c0_7, %c0_8, %c0_9] : memref<1x32x128xbf16, #tpu.memory_space<vmem>>, vector<1x32x128xbf16>
    %10 = vector.shape_cast %9 : vector<1x32x128xbf16> to vector<32x128xbf16>
    %11 = vector.shape_cast %8 : vector<32x128xbf16> to vector<1x32x128xbf16>
    tpu.vector_store %arg6[%c0_7, %c0_8, %c0_9], %11 {strides = array<i32>} : memref<1x32x128xbf16, #tpu.memory_space<vmem>>, vector<1x32x128xbf16>,
    return
  }
  func.func @transform_0(%arg0: i32, %arg1: i32, %arg2: i32) -> (i32, i32, i32) {
    %c0_i32 = arith.constant 0 : i32
    %c0_i32_0 = arith.constant 0 : i32
    return %arg0, %arg1, %c0_i32 : i32, i32, i32
  }
  func.func @transform_1(%arg0: i32, %arg1: i32, %arg2: i32) -> (i32, i32, i32) {
    %c0_i32 = arith.constant 0 : i32
    %c0_i32_0 = arith.constant 0 : i32
    return %arg0, %c0_i32, %arg2 : i32, i32, i32
  }
  func.func @transform_2(%arg0: i32, %arg1: i32, %arg2: i32) -> (i32, i32) {
    %c0_i32 = arith.constant 0 : i32
    %c0_i32_0 = arith.constant 0 : i32
    return %c0_i32, %arg2 : i32, i32
  }
  func.func @transform_3(%arg0: i32, %arg1: i32, %arg2: i32) -> (i32, i32, i32) {
    %c0_i32 = arith.constant 0 : i32
    return %arg0, %arg1, %arg2 : i32, i32, i32
  }
}

module attributes {stable_mosaic.version = 11 : i64} {
  func.func @_mm_kernel_direct(%arg0: i32, %arg1: i32, %arg2: i32, %arg3: memref<1x16x512xbf16, #tpu.memory_space<vmem>>, %arg4: memref<1x512x128xbf16, #tpu.memory_space<vmem>>, %arg5: memref<1x128xf32, #tpu.memory_space<vmem>>, %arg6: memref<1x16x128xbf16, #tpu.memory_space<vmem>>) attributes {dimension_semantics = [#tpu.dimension_semantics<parallel>, #tpu.dimension_semantics<parallel>, #tpu.dimension_semantics<parallel>], iteration_bounds = array<i64: 1, 1, 1>, scalar_prefetch = 0 : i64, scratch_operands = 0 : i64, tpu.core_type = #tpu.core_type<tc>, window_params = [{transform_indices = @transform_0, window_bounds = array<i64: 1, 16, 512>}, {transform_indices = @transform_1, window_bounds = array<i64: 1, 512, 128>}, {transform_indices = @transform_2, window_bounds = array<i64: 1, 128>}, {transform_indices = @transform_3, window_bounds = array<i64: 1, 16, 128>}]} {
    %c0 = arith.constant 0 : index
    %c0_0 = arith.constant 0 : index
    %c0_1 = arith.constant 0 : index
    %0 = vector.load %arg3[%c0, %c0_0, %c0_1] : memref<1x16x512xbf16, #tpu.memory_space<vmem>>, vector<1x16x512xbf16>
    %1 = vector.shape_cast %0 : vector<1x16x512xbf16> to vector<16x512xbf16>
    %c0_2 = arith.constant 0 : index
    %c0_3 = arith.constant 0 : index
    %c0_4 = arith.constant 0 : index
    %2 = vector.load %arg4[%c0_2, %c0_3, %c0_4] : memref<1x512x128xbf16, #tpu.memory_space<vmem>>, vector<1x512x128xbf16>
    %3 = vector.shape_cast %2 : vector<1x512x128xbf16> to vector<512x128xbf16>
    %cst = arith.constant dense<0.000000e+00> : vector<16x128xf32>
    %4 = tpu.matmul %1, %3, %cst {dimension_numbers = #tpu.dot_dimension_numbers<[1], [0], [0], [1], [0, 0, 1, 1], [], []>} : vector<16x512xbf16>, vector<512x128xbf16>, vector<16x128xf32> -> vector<16x128xf32>
    %c0_5 = arith.constant 0 : index
    %c0_6 = arith.constant 0 : index
    %5 = vector.load %arg5[%c0_5, %c0_6] : memref<1x128xf32, #tpu.memory_space<vmem>>, vector<1x128xf32>
    %6 = vector.broadcast %5 : vector<1x128xf32> to vector<16x128xf32>
    %7 = arith.addf %4, %6 : vector<16x128xf32>
    %8 = arith.truncf %7 : vector<16x128xf32> to vector<16x128xbf16>
    %c0_7 = arith.constant 0 : index
    %c0_8 = arith.constant 0 : index
    %c0_9 = arith.constant 0 : index
    %9 = vector.load %arg6[%c0_7, %c0_8, %c0_9] : memref<1x16x128xbf16, #tpu.memory_space<vmem>>, vector<1x16x128xbf16>
    %10 = vector.shape_cast %9 : vector<1x16x128xbf16> to vector<16x128xbf16>
    %11 = vector.shape_cast %8 : vector<16x128xbf16> to vector<1x16x128xbf16>
    tpu.vector_store %arg6[%c0_7, %c0_8, %c0_9], %11 {strides = array<i32>} : memref<1x16x128xbf16, #tpu.memory_space<vmem>>, vector<1x16x128xbf16>,
    return
  }
  func.func @transform_0(%arg0: i32, %arg1: i32, %arg2: i32) -> (i32, i32, i32) {
    %c0_i32 = arith.constant 0 : i32
    %c0_i32_0 = arith.constant 0 : i32
    return %arg0, %arg1, %c0_i32 : i32, i32, i32
  }
  func.func @transform_1(%arg0: i32, %arg1: i32, %arg2: i32) -> (i32, i32, i32) {
    %c0_i32 = arith.constant 0 : i32
    %c0_i32_0 = arith.constant 0 : i32
    return %arg0, %c0_i32, %arg2 : i32, i32, i32
  }
  func.func @transform_2(%arg0: i32, %arg1: i32, %arg2: i32) -> (i32, i32) {
    %c0_i32 = arith.constant 0 : i32
    %c0_i32_0 = arith.constant 0 : i32
    return %c0_i32, %arg2 : i32, i32
  }
  func.func @transform_3(%arg0: i32, %arg1: i32, %arg2: i32) -> (i32, i32, i32) {
    %c0_i32 = arith.constant 0 : i32
    return %arg0, %arg1, %arg2 : i32, i32, i32
  }
}

module attributes {stable_mosaic.version = 11 : i64} {
  func.func @_mm_kernel_direct(%arg0: i32, %arg1: i32, %arg2: i32, %arg3: memref<1x16x1024xbf16, #tpu.memory_space<vmem>>, %arg4: memref<1x1024x128xbf16, #tpu.memory_space<vmem>>, %arg5: memref<1x128xf32, #tpu.memory_space<vmem>>, %arg6: memref<1x16x128xbf16, #tpu.memory_space<vmem>>) attributes {dimension_semantics = [#tpu.dimension_semantics<parallel>, #tpu.dimension_semantics<parallel>, #tpu.dimension_semantics<parallel>], iteration_bounds = array<i64: 1, 1, 1>, scalar_prefetch = 0 : i64, scratch_operands = 0 : i64, tpu.core_type = #tpu.core_type<tc>, window_params = [{transform_indices = @transform_0, window_bounds = array<i64: 1, 16, 1024>}, {transform_indices = @transform_1, window_bounds = array<i64: 1, 1024, 128>}, {transform_indices = @transform_2, window_bounds = array<i64: 1, 128>}, {transform_indices = @transform_3, window_bounds = array<i64: 1, 16, 128>}]} {
    %c0 = arith.constant 0 : index
    %c0_0 = arith.constant 0 : index
    %c0_1 = arith.constant 0 : index
    %0 = vector.load %arg3[%c0, %c0_0, %c0_1] : memref<1x16x1024xbf16, #tpu.memory_space<vmem>>, vector<1x16x1024xbf16>
    %1 = vector.shape_cast %0 : vector<1x16x1024xbf16> to vector<16x1024xbf16>
    %c0_2 = arith.constant 0 : index
    %c0_3 = arith.constant 0 : index
    %c0_4 = arith.constant 0 : index
    %2 = vector.load %arg4[%c0_2, %c0_3, %c0_4] : memref<1x1024x128xbf16, #tpu.memory_space<vmem>>, vector<1x1024x128xbf16>
    %3 = vector.shape_cast %2 : vector<1x1024x128xbf16> to vector<1024x128xbf16>
    %cst = arith.constant dense<0.000000e+00> : vector<16x128xf32>
    %4 = tpu.matmul %1, %3, %cst {dimension_numbers = #tpu.dot_dimension_numbers<[1], [0], [0], [1], [0, 0, 1, 1], [], []>} : vector<16x1024xbf16>, vector<1024x128xbf16>, vector<16x128xf32> -> vector<16x128xf32>
    %c0_5 = arith.constant 0 : index
    %c0_6 = arith.constant 0 : index
    %5 = vector.load %arg5[%c0_5, %c0_6] : memref<1x128xf32, #tpu.memory_space<vmem>>, vector<1x128xf32>
    %6 = vector.broadcast %5 : vector<1x128xf32> to vector<16x128xf32>
    %7 = arith.addf %4, %6 : vector<16x128xf32>
    %8 = arith.truncf %7 : vector<16x128xf32> to vector<16x128xbf16>
    %c0_7 = arith.constant 0 : index
    %c0_8 = arith.constant 0 : index
    %c0_9 = arith.constant 0 : index
    %9 = vector.load %arg6[%c0_7, %c0_8, %c0_9] : memref<1x16x128xbf16, #tpu.memory_space<vmem>>, vector<1x16x128xbf16>
    %10 = vector.shape_cast %9 : vector<1x16x128xbf16> to vector<16x128xbf16>
    %11 = vector.shape_cast %8 : vector<16x128xbf16> to vector<1x16x128xbf16>
    tpu.vector_store %arg6[%c0_7, %c0_8, %c0_9], %11 {strides = array<i32>} : memref<1x16x128xbf16, #tpu.memory_space<vmem>>, vector<1x16x128xbf16>,
    return
  }
  func.func @transform_0(%arg0: i32, %arg1: i32, %arg2: i32) -> (i32, i32, i32) {
    %c0_i32 = arith.constant 0 : i32
    %c0_i32_0 = arith.constant 0 : i32
    return %arg0, %arg1, %c0_i32 : i32, i32, i32
  }
  func.func @transform_1(%arg0: i32, %arg1: i32, %arg2: i32) -> (i32, i32, i32) {
    %c0_i32 = arith.constant 0 : i32
    %c0_i32_0 = arith.constant 0 : i32
    return %arg0, %c0_i32, %arg2 : i32, i32, i32
  }
  func.func @transform_2(%arg0: i32, %arg1: i32, %arg2: i32) -> (i32, i32) {
    %c0_i32 = arith.constant 0 : i32
    %c0_i32_0 = arith.constant 0 : i32
    return %c0_i32, %arg2 : i32, i32
  }
  func.func @transform_3(%arg0: i32, %arg1: i32, %arg2: i32) -> (i32, i32, i32) {
    %c0_i32 = arith.constant 0 : i32
    return %arg0, %arg1, %arg2 : i32, i32, i32
  }
}

module attributes {stable_mosaic.version = 11 : i64} {
  func.func @_mm_kernel_direct(%arg0: i32, %arg1: i32, %arg2: i32, %arg3: memref<1x16x256xbf16, #tpu.memory_space<vmem>>, %arg4: memref<1x256x128xbf16, #tpu.memory_space<vmem>>, %arg5: memref<1x128xf32, #tpu.memory_space<vmem>>, %arg6: memref<1x16x128xbf16, #tpu.memory_space<vmem>>) attributes {dimension_semantics = [#tpu.dimension_semantics<parallel>, #tpu.dimension_semantics<parallel>, #tpu.dimension_semantics<parallel>], iteration_bounds = array<i64: 4, 1, 1>, scalar_prefetch = 0 : i64, scratch_operands = 0 : i64, tpu.core_type = #tpu.core_type<tc>, window_params = [{transform_indices = @transform_0, window_bounds = array<i64: 1, 16, 256>}, {transform_indices = @transform_1, window_bounds = array<i64: 1, 256, 128>}, {transform_indices = @transform_2, window_bounds = array<i64: 1, 128>}, {transform_indices = @transform_3, window_bounds = array<i64: 1, 16, 128>}]} {
    %c0 = arith.constant 0 : index
    %c0_0 = arith.constant 0 : index
    %c0_1 = arith.constant 0 : index
    %0 = vector.load %arg3[%c0, %c0_0, %c0_1] : memref<1x16x256xbf16, #tpu.memory_space<vmem>>, vector<1x16x256xbf16>
    %1 = vector.shape_cast %0 : vector<1x16x256xbf16> to vector<16x256xbf16>
    %c0_2 = arith.constant 0 : index
    %c0_3 = arith.constant 0 : index
    %c0_4 = arith.constant 0 : index
    %2 = vector.load %arg4[%c0_2, %c0_3, %c0_4] : memref<1x256x128xbf16, #tpu.memory_space<vmem>>, vector<1x256x128xbf16>
    %3 = vector.shape_cast %2 : vector<1x256x128xbf16> to vector<256x128xbf16>
    %cst = arith.constant dense<0.000000e+00> : vector<16x128xf32>
    %4 = tpu.matmul %1, %3, %cst {dimension_numbers = #tpu.dot_dimension_numbers<[1], [0], [0], [1], [0, 0, 1, 1], [], []>} : vector<16x256xbf16>, vector<256x128xbf16>, vector<16x128xf32> -> vector<16x128xf32>
    %c0_5 = arith.constant 0 : index
    %c0_6 = arith.constant 0 : index
    %5 = vector.load %arg5[%c0_5, %c0_6] : memref<1x128xf32, #tpu.memory_space<vmem>>, vector<1x128xf32>
    %6 = vector.broadcast %5 : vector<1x128xf32> to vector<16x128xf32>
    %7 = arith.addf %4, %6 : vector<16x128xf32>
    %8 = arith.truncf %7 : vector<16x128xf32> to vector<16x128xbf16>
    %c0_7 = arith.constant 0 : index
    %c0_8 = arith.constant 0 : index
    %c0_9 = arith.constant 0 : index
    %9 = vector.load %arg6[%c0_7, %c0_8, %c0_9] : memref<1x16x128xbf16, #tpu.memory_space<vmem>>, vector<1x16x128xbf16>
    %10 = vector.shape_cast %9 : vector<1x16x128xbf16> to vector<16x128xbf16>
    %11 = vector.shape_cast %8 : vector<16x128xbf16> to vector<1x16x128xbf16>
    tpu.vector_store %arg6[%c0_7, %c0_8, %c0_9], %11 {strides = array<i32>} : memref<1x16x128xbf16, #tpu.memory_space<vmem>>, vector<1x16x128xbf16>,
    return
  }
  func.func @transform_0(%arg0: i32, %arg1: i32, %arg2: i32) -> (i32, i32, i32) {
    %c0_i32 = arith.constant 0 : i32
    %c0_i32_0 = arith.constant 0 : i32
    return %arg0, %arg1, %c0_i32 : i32, i32, i32
  }
  func.func @transform_1(%arg0: i32, %arg1: i32, %arg2: i32) -> (i32, i32, i32) {
    %c0_i32 = arith.constant 0 : i32
    %c0_i32_0 = arith.constant 0 : i32
    return %arg0, %c0_i32, %arg2 : i32, i32, i32
  }
  func.func @transform_2(%arg0: i32, %arg1: i32, %arg2: i32) -> (i32, i32) {
    %c0_i32 = arith.constant 0 : i32
    %c0_i32_0 = arith.constant 0 : i32
    return %c0_i32, %arg2 : i32, i32
  }
  func.func @transform_3(%arg0: i32, %arg1: i32, %arg2: i32) -> (i32, i32, i32) {
    %c0_i32 = arith.constant 0 : i32
    return %arg0, %arg1, %arg2 : i32, i32, i32
  }
}

module attributes {stable_mosaic.version = 11 : i64} {
  func.func @_mm_kernel_direct(%arg0: i32, %arg1: i32, %arg2: i32, %arg3: memref<1x16x512xbf16, #tpu.memory_space<vmem>>, %arg4: memref<1x512x128xbf16, #tpu.memory_space<vmem>>, %arg5: memref<1x128xf32, #tpu.memory_space<vmem>>, %arg6: memref<1x16x128xbf16, #tpu.memory_space<vmem>>) attributes {dimension_semantics = [#tpu.dimension_semantics<parallel>, #tpu.dimension_semantics<parallel>, #tpu.dimension_semantics<parallel>], iteration_bounds = array<i64: 4, 1, 1>, scalar_prefetch = 0 : i64, scratch_operands = 0 : i64, tpu.core_type = #tpu.core_type<tc>, window_params = [{transform_indices = @transform_0, window_bounds = array<i64: 1, 16, 512>}, {transform_indices = @transform_1, window_bounds = array<i64: 1, 512, 128>}, {transform_indices = @transform_2, window_bounds = array<i64: 1, 128>}, {transform_indices = @transform_3, window_bounds = array<i64: 1, 16, 128>}]} {
    %c0 = arith.constant 0 : index
    %c0_0 = arith.constant 0 : index
    %c0_1 = arith.constant 0 : index
    %0 = vector.load %arg3[%c0, %c0_0, %c0_1] : memref<1x16x512xbf16, #tpu.memory_space<vmem>>, vector<1x16x512xbf16>
    %1 = vector.shape_cast %0 : vector<1x16x512xbf16> to vector<16x512xbf16>
    %c0_2 = arith.constant 0 : index
    %c0_3 = arith.constant 0 : index
    %c0_4 = arith.constant 0 : index
    %2 = vector.load %arg4[%c0_2, %c0_3, %c0_4] : memref<1x512x128xbf16, #tpu.memory_space<vmem>>, vector<1x512x128xbf16>
    %3 = vector.shape_cast %2 : vector<1x512x128xbf16> to vector<512x128xbf16>
    %cst = arith.constant dense<0.000000e+00> : vector<16x128xf32>
    %4 = tpu.matmul %1, %3, %cst {dimension_numbers = #tpu.dot_dimension_numbers<[1], [0], [0], [1], [0, 0, 1, 1], [], []>} : vector<16x512xbf16>, vector<512x128xbf16>, vector<16x128xf32> -> vector<16x128xf32>
    %c0_5 = arith.constant 0 : index
    %c0_6 = arith.constant 0 : index
    %5 = vector.load %arg5[%c0_5, %c0_6] : memref<1x128xf32, #tpu.memory_space<vmem>>, vector<1x128xf32>
    %6 = vector.broadcast %5 : vector<1x128xf32> to vector<16x128xf32>
    %7 = arith.addf %4, %6 : vector<16x128xf32>
    %8 = arith.truncf %7 : vector<16x128xf32> to vector<16x128xbf16>
    %c0_7 = arith.constant 0 : index
    %c0_8 = arith.constant 0 : index
    %c0_9 = arith.constant 0 : index
    %9 = vector.load %arg6[%c0_7, %c0_8, %c0_9] : memref<1x16x128xbf16, #tpu.memory_space<vmem>>, vector<1x16x128xbf16>
    %10 = vector.shape_cast %9 : vector<1x16x128xbf16> to vector<16x128xbf16>
    %11 = vector.shape_cast %8 : vector<16x128xbf16> to vector<1x16x128xbf16>
    tpu.vector_store %arg6[%c0_7, %c0_8, %c0_9], %11 {strides = array<i32>} : memref<1x16x128xbf16, #tpu.memory_space<vmem>>, vector<1x16x128xbf16>,
    return
  }
  func.func @transform_0(%arg0: i32, %arg1: i32, %arg2: i32) -> (i32, i32, i32) {
    %c0_i32 = arith.constant 0 : i32
    %c0_i32_0 = arith.constant 0 : i32
    return %arg0, %arg1, %c0_i32 : i32, i32, i32
  }
  func.func @transform_1(%arg0: i32, %arg1: i32, %arg2: i32) -> (i32, i32, i32) {
    %c0_i32 = arith.constant 0 : i32
    %c0_i32_0 = arith.constant 0 : i32
    return %arg0, %c0_i32, %arg2 : i32, i32, i32
  }
  func.func @transform_2(%arg0: i32, %arg1: i32, %arg2: i32) -> (i32, i32) {
    %c0_i32 = arith.constant 0 : i32
    %c0_i32_0 = arith.constant 0 : i32
    return %c0_i32, %arg2 : i32, i32
  }
  func.func @transform_3(%arg0: i32, %arg1: i32, %arg2: i32) -> (i32, i32, i32) {
    %c0_i32 = arith.constant 0 : i32
    return %arg0, %arg1, %arg2 : i32, i32, i32
  }
}

module attributes {stable_mosaic.version = 11 : i64} {
  func.func @_mm_kernel_direct(%arg0: i32, %arg1: i32, %arg2: i32, %arg3: memref<1x32x256xbf16, #tpu.memory_space<vmem>>, %arg4: memref<1x256x128xbf16, #tpu.memory_space<vmem>>, %arg5: memref<1x128xf32, #tpu.memory_space<vmem>>, %arg6: memref<1x32x128xbf16, #tpu.memory_space<vmem>>) attributes {dimension_semantics = [#tpu.dimension_semantics<parallel>, #tpu.dimension_semantics<parallel>, #tpu.dimension_semantics<parallel>], iteration_bounds = array<i64: 4, 1, 1>, scalar_prefetch = 0 : i64, scratch_operands = 0 : i64, tpu.core_type = #tpu.core_type<tc>, window_params = [{transform_indices = @transform_0, window_bounds = array<i64: 1, 32, 256>}, {transform_indices = @transform_1, window_bounds = array<i64: 1, 256, 128>}, {transform_indices = @transform_2, window_bounds = array<i64: 1, 128>}, {transform_indices = @transform_3, window_bounds = array<i64: 1, 32, 128>}]} {
    %c0 = arith.constant 0 : index
    %c0_0 = arith.constant 0 : index
    %c0_1 = arith.constant 0 : index
    %0 = vector.load %arg3[%c0, %c0_0, %c0_1] : memref<1x32x256xbf16, #tpu.memory_space<vmem>>, vector<1x32x256xbf16>
    %1 = vector.shape_cast %0 : vector<1x32x256xbf16> to vector<32x256xbf16>
    %c0_2 = arith.constant 0 : index
    %c0_3 = arith.constant 0 : index
    %c0_4 = arith.constant 0 : index
    %2 = vector.load %arg4[%c0_2, %c0_3, %c0_4] : memref<1x256x128xbf16, #tpu.memory_space<vmem>>, vector<1x256x128xbf16>
    %3 = vector.shape_cast %2 : vector<1x256x128xbf16> to vector<256x128xbf16>
    %cst = arith.constant dense<0.000000e+00> : vector<32x128xf32>
    %4 = tpu.matmul %1, %3, %cst {dimension_numbers = #tpu.dot_dimension_numbers<[1], [0], [0], [1], [0, 0, 1, 1], [], []>} : vector<32x256xbf16>, vector<256x128xbf16>, vector<32x128xf32> -> vector<32x128xf32>
    %c0_5 = arith.constant 0 : index
    %c0_6 = arith.constant 0 : index
    %5 = vector.load %arg5[%c0_5, %c0_6] : memref<1x128xf32, #tpu.memory_space<vmem>>, vector<1x128xf32>
    %6 = vector.broadcast %5 : vector<1x128xf32> to vector<32x128xf32>
    %7 = arith.addf %4, %6 : vector<32x128xf32>
    %8 = arith.truncf %7 : vector<32x128xf32> to vector<32x128xbf16>
    %c0_7 = arith.constant 0 : index
    %c0_8 = arith.constant 0 : index
    %c0_9 = arith.constant 0 : index
    %9 = vector.load %arg6[%c0_7, %c0_8, %c0_9] : memref<1x32x128xbf16, #tpu.memory_space<vmem>>, vector<1x32x128xbf16>
    %10 = vector.shape_cast %9 : vector<1x32x128xbf16> to vector<32x128xbf16>
    %11 = vector.shape_cast %8 : vector<32x128xbf16> to vector<1x32x128xbf16>
    tpu.vector_store %arg6[%c0_7, %c0_8, %c0_9], %11 {strides = array<i32>} : memref<1x32x128xbf16, #tpu.memory_space<vmem>>, vector<1x32x128xbf16>,
    return
  }
  func.func @transform_0(%arg0: i32, %arg1: i32, %arg2: i32) -> (i32, i32, i32) {
    %c0_i32 = arith.constant 0 : i32
    %c0_i32_0 = arith.constant 0 : i32
    return %arg0, %arg1, %c0_i32 : i32, i32, i32
  }
  func.func @transform_1(%arg0: i32, %arg1: i32, %arg2: i32) -> (i32, i32, i32) {
    %c0_i32 = arith.constant 0 : i32
    %c0_i32_0 = arith.constant 0 : i32
    return %arg0, %c0_i32, %arg2 : i32, i32, i32
  }
  func.func @transform_2(%arg0: i32, %arg1: i32, %arg2: i32) -> (i32, i32) {
    %c0_i32 = arith.constant 0 : i32
    %c0_i32_0 = arith.constant 0 : i32
    return %c0_i32, %arg2 : i32, i32
  }
  func.func @transform_3(%arg0: i32, %arg1: i32, %arg2: i32) -> (i32, i32, i32) {
    %c0_i32 = arith.constant 0 : i32
    return %arg0, %arg1, %arg2 : i32, i32, i32
  }
}

module attributes {stable_mosaic.version = 11 : i64} {
  func.func @_mm_kernel_direct(%arg0: i32, %arg1: i32, %arg2: i32, %arg3: memref<1x128x128xbf16, #tpu.memory_space<vmem>>, %arg4: memref<1x128x128xbf16, #tpu.memory_space<vmem>>, %arg5: memref<1x128xf32, #tpu.memory_space<vmem>>, %arg6: memref<1x128x128xbf16, #tpu.memory_space<vmem>>) attributes {dimension_semantics = [#tpu.dimension_semantics<parallel>, #tpu.dimension_semantics<parallel>, #tpu.dimension_semantics<parallel>], iteration_bounds = array<i64: 4, 1, 1>, scalar_prefetch = 0 : i64, scratch_operands = 0 : i64, tpu.core_type = #tpu.core_type<tc>, window_params = [{transform_indices = @transform_0, window_bounds = array<i64: 1, 128, 128>}, {transform_indices = @transform_1, window_bounds = array<i64: 1, 128, 128>}, {transform_indices = @transform_2, window_bounds = array<i64: 1, 128>}, {transform_indices = @transform_3, window_bounds = array<i64: 1, 128, 128>}]} {
    %c0 = arith.constant 0 : index
    %c0_0 = arith.constant 0 : index
    %c0_1 = arith.constant 0 : index
    %0 = vector.load %arg3[%c0, %c0_0, %c0_1] : memref<1x128x128xbf16, #tpu.memory_space<vmem>>, vector<1x128x128xbf16>
    %1 = vector.shape_cast %0 : vector<1x128x128xbf16> to vector<128x128xbf16>
    %c0_2 = arith.constant 0 : index
    %c0_3 = arith.constant 0 : index
    %c0_4 = arith.constant 0 : index
    %2 = vector.load %arg4[%c0_2, %c0_3, %c0_4] : memref<1x128x128xbf16, #tpu.memory_space<vmem>>, vector<1x128x128xbf16>
    %3 = vector.shape_cast %2 : vector<1x128x128xbf16> to vector<128x128xbf16>
    %cst = arith.constant dense<0.000000e+00> : vector<128x128xf32>
    %4 = tpu.matmul %1, %3, %cst {dimension_numbers = #tpu.dot_dimension_numbers<[1], [0], [0], [1], [0, 0, 1, 1], [], []>} : vector<128x128xbf16>, vector<128x128xbf16>, vector<128x128xf32> -> vector<128x128xf32>
    %c0_5 = arith.constant 0 : index
    %c0_6 = arith.constant 0 : index
    %5 = vector.load %arg5[%c0_5, %c0_6] : memref<1x128xf32, #tpu.memory_space<vmem>>, vector<1x128xf32>
    %6 = vector.broadcast %5 : vector<1x128xf32> to vector<128x128xf32>
    %7 = arith.addf %4, %6 : vector<128x128xf32>
    %8 = arith.truncf %7 : vector<128x128xf32> to vector<128x128xbf16>
    %c0_7 = arith.constant 0 : index
    %c0_8 = arith.constant 0 : index
    %c0_9 = arith.constant 0 : index
    %9 = vector.load %arg6[%c0_7, %c0_8, %c0_9] : memref<1x128x128xbf16, #tpu.memory_space<vmem>>, vector<1x128x128xbf16>
    %10 = vector.shape_cast %9 : vector<1x128x128xbf16> to vector<128x128xbf16>
    %11 = vector.shape_cast %8 : vector<128x128xbf16> to vector<1x128x128xbf16>
    tpu.vector_store %arg6[%c0_7, %c0_8, %c0_9], %11 {strides = array<i32>} : memref<1x128x128xbf16, #tpu.memory_space<vmem>>, vector<1x128x128xbf16>,
    return
  }
  func.func @transform_0(%arg0: i32, %arg1: i32, %arg2: i32) -> (i32, i32, i32) {
    %c0_i32 = arith.constant 0 : i32
    %c0_i32_0 = arith.constant 0 : i32
    return %arg0, %arg1, %c0_i32 : i32, i32, i32
  }
  func.func @transform_1(%arg0: i32, %arg1: i32, %arg2: i32) -> (i32, i32, i32) {
    %c0_i32 = arith.constant 0 : i32
    %c0_i32_0 = arith.constant 0 : i32
    return %arg0, %c0_i32, %arg2 : i32, i32, i32
  }
  func.func @transform_2(%arg0: i32, %arg1: i32, %arg2: i32) -> (i32, i32) {
    %c0_i32 = arith.constant 0 : i32
    %c0_i32_0 = arith.constant 0 : i32
    return %c0_i32, %arg2 : i32, i32
  }
  func.func @transform_3(%arg0: i32, %arg1: i32, %arg2: i32) -> (i32, i32, i32) {
    %c0_i32 = arith.constant 0 : i32
    return %arg0, %arg1, %arg2 : i32, i32, i32
  }
}

module attributes {stable_mosaic.version = 11 : i64} {
  func.func @_mm_kernel_direct(%arg0: i32, %arg1: i32, %arg2: i32, %arg3: memref<1x512x128xbf16, #tpu.memory_space<vmem>>, %arg4: memref<1x128x128xbf16, #tpu.memory_space<vmem>>, %arg5: memref<1x128xf32, #tpu.memory_space<vmem>>, %arg6: memref<1x512x128xbf16, #tpu.memory_space<vmem>>) attributes {dimension_semantics = [#tpu.dimension_semantics<parallel>, #tpu.dimension_semantics<parallel>, #tpu.dimension_semantics<parallel>], iteration_bounds = array<i64: 4, 1, 1>, scalar_prefetch = 0 : i64, scratch_operands = 0 : i64, tpu.core_type = #tpu.core_type<tc>, window_params = [{transform_indices = @transform_0, window_bounds = array<i64: 1, 512, 128>}, {transform_indices = @transform_1, window_bounds = array<i64: 1, 128, 128>}, {transform_indices = @transform_2, window_bounds = array<i64: 1, 128>}, {transform_indices = @transform_3, window_bounds = array<i64: 1, 512, 128>}]} {
    %c0 = arith.constant 0 : index
    %c0_0 = arith.constant 0 : index
    %c0_1 = arith.constant 0 : index
    %0 = vector.load %arg3[%c0, %c0_0, %c0_1] : memref<1x512x128xbf16, #tpu.memory_space<vmem>>, vector<1x512x128xbf16>
    %1 = vector.shape_cast %0 : vector<1x512x128xbf16> to vector<512x128xbf16>
    %c0_2 = arith.constant 0 : index
    %c0_3 = arith.constant 0 : index
    %c0_4 = arith.constant 0 : index
    %2 = vector.load %arg4[%c0_2, %c0_3, %c0_4] : memref<1x128x128xbf16, #tpu.memory_space<vmem>>, vector<1x128x128xbf16>
    %3 = vector.shape_cast %2 : vector<1x128x128xbf16> to vector<128x128xbf16>
    %cst = arith.constant dense<0.000000e+00> : vector<512x128xf32>
    %4 = tpu.matmul %1, %3, %cst {dimension_numbers = #tpu.dot_dimension_numbers<[1], [0], [0], [1], [0, 0, 1, 1], [], []>} : vector<512x128xbf16>, vector<128x128xbf16>, vector<512x128xf32> -> vector<512x128xf32>
    %c0_5 = arith.constant 0 : index
    %c0_6 = arith.constant 0 : index
    %5 = vector.load %arg5[%c0_5, %c0_6] : memref<1x128xf32, #tpu.memory_space<vmem>>, vector<1x128xf32>
    %6 = vector.broadcast %5 : vector<1x128xf32> to vector<512x128xf32>
    %7 = arith.addf %4, %6 : vector<512x128xf32>
    %8 = math.tanh %7 : vector<512x128xf32>
    %9 = arith.truncf %8 : vector<512x128xf32> to vector<512x128xbf16>
    %c0_7 = arith.constant 0 : index
    %c0_8 = arith.constant 0 : index
    %c0_9 = arith.constant 0 : index
    %10 = vector.load %arg6[%c0_7, %c0_8, %c0_9] : memref<1x512x128xbf16, #tpu.memory_space<vmem>>, vector<1x512x128xbf16>
    %11 = vector.shape_cast %10 : vector<1x512x128xbf16> to vector<512x128xbf16>
    %12 = vector.shape_cast %9 : vector<512x128xbf16> to vector<1x512x128xbf16>
    tpu.vector_store %arg6[%c0_7, %c0_8, %c0_9], %12 {strides = array<i32>} : memref<1x512x128xbf16, #tpu.memory_space<vmem>>, vector<1x512x128xbf16>,
    return
  }
  func.func @transform_0(%arg0: i32, %arg1: i32, %arg2: i32) -> (i32, i32, i32) {
    %c0_i32 = arith.constant 0 : i32
    %c0_i32_0 = arith.constant 0 : i32
    return %arg0, %arg1, %c0_i32 : i32, i32, i32
  }
  func.func @transform_1(%arg0: i32, %arg1: i32, %arg2: i32) -> (i32, i32, i32) {
    %c0_i32 = arith.constant 0 : i32
    %c0_i32_0 = arith.constant 0 : i32
    return %arg0, %c0_i32, %arg2 : i32, i32, i32
  }
  func.func @transform_2(%arg0: i32, %arg1: i32, %arg2: i32) -> (i32, i32) {
    %c0_i32 = arith.constant 0 : i32
    %c0_i32_0 = arith.constant 0 : i32
    return %c0_i32, %arg2 : i32, i32
  }
  func.func @transform_3(%arg0: i32, %arg1: i32, %arg2: i32) -> (i32, i32, i32) {
    %c0_i32 = arith.constant 0 : i32
    return %arg0, %arg1, %arg2 : i32, i32, i32
  }
}

</mosaic_0001>

<bundles_post_ra>
// kernel: _fwd.10
= control target key start
LH: loop header
LB: loop body
LE: loop exit
PB: predicated region body
PF: predicated region fallthrough
CT: control target
= control target key end

     0   :  { %s1360_s1 = inlined_call_operand.vmem [shape: bf16[1,128,128], index: 1, kind: input, shape index: {}]   ;;  %s1361_s2 = inlined_call_operand.vmem [shape: f32[1,128], index: 2, kind: input, shape index: {}]   ;;  %s1362_s0 = inlined_call_operand.vmem [shape: bf16[1,512,128], index: 0, kind: input, shape index: {}]   ;;  %s1363_s3 = inlined_call_operand.vmem [shape: bf16[1,512,128], index: 3, kind: output, shape index: {}]  }
   0x1   :  { %v838_v0 = vld [vmem:[%s1360_s1 + $0x38] sm:$0xff]  ;;  %v837_v1 = vld [vmem:[%s1360_s1 + $0x30] sm:$0xff]  ;;  %v836_v2 = vld [vmem:[%s1360_s1 + $0x28] sm:$0xff] }
   0x2   :  { %338 = vmatpush.bf16.msra.mxu0 %v838_v0  ;;  %1030 = vmatpush.bf16.msra.mxu1 %v838_v0  ;;  %v835_v3 = vld [vmem:[%s1360_s1 + $0x20] sm:$0xff]  ;;  %v834_v4 = vld [vmem:[%s1360_s1 + $0x18] sm:$0xff]  ;;  %v833_v5 = vld [vmem:[%s1360_s1 + $0x10] sm:$0xff] }
   0x3   :  { %1031 = vmatpush.bf16.msra.mxu2 %v838_v0  ;;  %1032 = vmatpush.bf16.msra.mxu3 %v838_v0  ;;  %v832_v6 = vld [vmem:[%s1360_s1 + $0x8] sm:$0xff]  ;;  %v831_v7 = vld [vmem:[%s1360_s1] sm:$0xff]  ;;  %v801_v16 = vld [vmem:[%s1362_s0 + $0x10] sm:$0xff] }
   0x4   :  { %v799_v8 = vld [vmem:[%s1362_s0] sm:$0xff]  ;;  %v800_v12 = vld [vmem:[%s1362_s0 + $0x8] sm:$0xff]  ;;  %v809_v17 = vld [vmem:[%s1362_s0 + $0x50] sm:$0xff] }
   0x5   :  { %v807_v9 = vld [vmem:[%s1362_s0 + $0x40] sm:$0xff]  ;;  %v808_v13 = vld [vmem:[%s1362_s0 + $0x48] sm:$0xff]  ;;  %v817_v18 = vld [vmem:[%s1362_s0 + $0x90] sm:$0xff] }
   0x6   :  { %339 = vmatpush.bf16.msra.mxu0 %v837_v1  ;;  %1033 = vmatpush.bf16.msra.mxu1 %v837_v1  ;;  %v815_v10 = vld [vmem:[%s1362_s0 + $0x80] sm:$0xff]  ;;  %v816_v14 = vld [vmem:[%s1362_s0 + $0x88] sm:$0xff]  ;;  %v825_v19 = vld [vmem:[%s1362_s0 + $0xd0] sm:$0xff] }
   0x7   :  { %1034 = vmatpush.bf16.msra.mxu2 %v837_v1  ;;  %1035 = vmatpush.bf16.msra.mxu3 %v837_v1  ;;  %v823_v11 = vld [vmem:[%s1362_s0 + $0xc0] sm:$0xff]  ;;  %v824_v15 = vld [vmem:[%s1362_s0 + $0xc8] sm:$0xff]  ;;  %v802_v20 = vld [vmem:[%s1362_s0 + $0x18] sm:$0xff] }
   0x8   :  { %v810_v21 = vld [vmem:[%s1362_s0 + $0x58] sm:$0xff]  ;;  %v803_v24 = vld [vmem:[%s1362_s0 + $0x20] sm:$0xff]  ;;  %v804_v28 = vld [vmem:[%s1362_s0 + $0x28] sm:$0xff] }
   0x9   :  { %v818_v22 = vld [vmem:[%s1362_s0 + $0x98] sm:$0xff]  ;;  %v811_v25 = vld [vmem:[%s1362_s0 + $0x60] sm:$0xff]  ;;  %v812_v29 = vld [vmem:[%s1362_s0 + $0x68] sm:$0xff] }
   0xa   :  { %340 = vmatpush.bf16.msra.mxu0 %v836_v2  ;;  %1036 = vmatpush.bf16.msra.mxu1 %v836_v2  ;;  %v826_v23 = vld [vmem:[%s1362_s0 + $0xd8] sm:$0xff]  ;;  %v819_v26 = vld [vmem:[%s1362_s0 + $0xa0] sm:$0xff]  ;;  %v820_v30 = vld [vmem:[%s1362_s0 + $0xa8] sm:$0xff] }
   0xb   :  { %1037 = vmatpush.bf16.msra.mxu2 %v836_v2  ;;  %1038 = vmatpush.bf16.msra.mxu3 %v836_v2  ;;  %v827_v27 = vld [vmem:[%s1362_s0 + $0xe0] sm:$0xff]  ;;  %v828_v31 = vld [vmem:[%s1362_s0 + $0xe8] sm:$0xff]  ;;  %v805_v32 = vld [vmem:[%s1362_s0 + $0x30] sm:$0xff] }
   0xc   :  { %v813_v33 = vld [vmem:[%s1362_s0 + $0x70] sm:$0xff]  ;;  %v806_v36 = vld [vmem:[%s1362_s0 + $0x38] sm:$0xff]  ;;  %v1198_v42 = vld [vmem:[%s1361_s2] ss:$0 sm:$0xff] }
   0xd   :  { %v821_v34 = vld [vmem:[%s1362_s0 + $0xb0] sm:$0xff]  ;;  %v814_v37 = vld [vmem:[%s1362_s0 + $0x78] sm:$0xff] }
   0xe   :  { %341 = vmatpush.bf16.msra.mxu0 %v835_v3  ;;  %1039 = vmatpush.bf16.msra.mxu1 %v835_v3  ;;  %v829_v35 = vld [vmem:[%s1362_s0 + $0xf0] sm:$0xff]  ;;  %v822_v38 = vld [vmem:[%s1362_s0 + $0xb8] sm:$0xff] }
   0xf   :  { %1040 = vmatpush.bf16.msra.mxu2 %v835_v3  ;;  %1041 = vmatpush.bf16.msra.mxu3 %v835_v3  ;;  %v830_v39 = vld [vmem:[%s1362_s0 + $0xf8] sm:$0xff] }
  0x12   :  { %342 = vmatpush.bf16.msra.mxu0 %v834_v4  ;;  %1042 = vmatpush.bf16.msra.mxu1 %v834_v4 }
  0x13   :  { %1043 = vmatpush.bf16.msra.mxu2 %v834_v4  ;;  %1044 = vmatpush.bf16.msra.mxu3 %v834_v4 }
  0x16   :  { %343 = vmatpush.bf16.msra.mxu0 %v833_v5  ;;  %1045 = vmatpush.bf16.msra.mxu1 %v833_v5 }
  0x17   :  { %1046 = vmatpush.bf16.msra.mxu2 %v833_v5  ;;  %1047 = vmatpush.bf16.msra.mxu3 %v833_v5 }
  0x1a   :  { %344 = vmatpush.bf16.msra.mxu0 %v832_v6  ;;  %1048 = vmatpush.bf16.msra.mxu1 %v832_v6 }
  0x1b   :  { %1049 = vmatpush.bf16.msra.mxu2 %v832_v6  ;;  %1050 = vmatpush.bf16.msra.mxu3 %v832_v6 }
  0x1e   :  { %345 = vmatpush.bf16.msra.mxu0 %v831_v7  ;;  %1051 = vmatpush.bf16.msra.mxu1 %v831_v7 }
  0x1f   :  { %1052 = vmatpush.bf16.msra.mxu2 %v831_v7  ;;  %1053 = vmatpush.bf16.msra.mxu3 %v831_v7 }
  0x21   :  { %346 = vmatmul.bf16.vlgmr.msra.gmra.mxu0 %v799_v8  ;;  %386 = vmatmul.bf16.vlgmr.msra.gmra.mxu1 %v807_v9 }
  0x22   :  { %426 = vmatmul.bf16.vlgmr.msra.gmra.mxu2 %v815_v10  ;;  %466 = vmatmul.bf16.vlgmr.msra.gmra.mxu3 %v823_v11 }
  0x31   :  { %351 = vmatmul.bf16.gmra.mxu0 %v800_v12  ;;  %391 = vmatmul.bf16.gmra.mxu1 %v808_v13 }
  0x32   :  { %431 = vmatmul.bf16.gmra.mxu2 %v816_v14  ;;  %471 = vmatmul.bf16.gmra.mxu3 %v824_v15 }
  0x41   :  { %356 = vmatmul.bf16.gmra.mxu0 %v801_v16  ;;  %396 = vmatmul.bf16.gmra.mxu1 %v809_v17 }
  0x42   :  { %436 = vmatmul.bf16.gmra.mxu2 %v817_v18  ;;  %476 = vmatmul.bf16.gmra.mxu3 %v825_v19 }
  0x51   :  { %361 = vmatmul.bf16.gmra.mxu0 %v802_v20  ;;  %401 = vmatmul.bf16.gmra.mxu1 %v810_v21 }
  0x52   :  { %441 = vmatmul.bf16.gmra.mxu2 %v818_v22  ;;  %481 = vmatmul.bf16.gmra.mxu3 %v826_v23 }
  0x61   :  { %366 = vmatmul.bf16.gmra.mxu0 %v803_v24  ;;  %406 = vmatmul.bf16.gmra.mxu1 %v811_v25 }
  0x62   :  { %446 = vmatmul.bf16.gmra.mxu2 %v819_v26  ;;  %486 = vmatmul.bf16.gmra.mxu3 %v827_v27 }
  0x71   :  { %371 = vmatmul.bf16.gmra.mxu0 %v804_v28  ;;  %411 = vmatmul.bf16.gmra.mxu1 %v812_v29 }
  0x72   :  { %451 = vmatmul.bf16.gmra.mxu2 %v820_v30  ;;  %491 = vmatmul.bf16.gmra.mxu3 %v828_v31 }
  0x81   :  { %376 = vmatmul.bf16.gmra.mxu0 %v805_v32  ;;  %416 = vmatmul.bf16.gmra.mxu1 %v813_v33 }
  0x82   :  { %456 = vmatmul.bf16.gmra.mxu2 %v821_v34  ;;  %496 = vmatmul.bf16.gmra.mxu3 %v829_v35 }
  0x91   :  { %381 = vmatmul.bf16.gmra.mxu0 %v806_v36  ;;  %421 = vmatmul.bf16.gmra.mxu1 %v814_v37 }
  0x92   :  { %461 = vmatmul.bf16.gmra.mxu2 %v822_v38  ;;  %501 = vmatmul.bf16.gmra.mxu3 %v830_v39 }
  0x9e   :  { %v347_v40 = vpop.f32.mrf.mxu0  ;;  %v387_v41 = vpop.f32.mrf.mxu1 }
  0x9f   :  { %v348_v47 = vadd.f32 %v1198_v42, %v347_v40  ;;  %v388_v48 = vadd.f32 %v1198_v42, %v387_v41 }
  0xa5   :  { %v427_v43 = vpop.f32.mrf.mxu2  ;;  %v467_v44 = vpop.f32.mrf.mxu3 }
  0xa6   :  { %v349_v45 = vpop.f32.mrf.mxu0  ;;  %v389_v46 = vpop.f32.mrf.mxu1  ;;  %v428_v55 = vadd.f32 %v1198_v42, %v427_v43  ;;  %v468_v56 = vadd.f32 %v1198_v42, %v467_v44 }
  0xa7   :  { %v350_v49 = vadd.f32 %v1198_v42, %v349_v45  ;;  %v390_v50 = vadd.f32 %v1198_v42, %v389_v46 }
  0xa9   :  { %v842_v51 = vpack.c.bf16 %v350_v49, %v348_v47  ;;  %v882_v52 = vpack.c.bf16 %v390_v50, %v388_v48 }
  0xab   :  { %843 = vst [vmem:[%s1363_s3] sm:$0xff] %v842_v51  }
  0xac   :  { %1006 = vst [vmem:[%s1363_s3 + $0x40] sm:$0xff] %v882_v52  }
  0xad   :  { %v429_v53 = vpop.f32.mrf.mxu2  ;;  %v469_v54 = vpop.f32.mrf.mxu3 }
  0xae   :  { %v430_v57 = vadd.f32 %v1198_v42, %v429_v53  ;;  %v470_v58 = vadd.f32 %v1198_v42, %v469_v54  ;;  %v352_v59 = vpop.f32.mrf.mxu0  ;;  %v392_v60 = vpop.f32.mrf.mxu1 }
  0xaf   :  { %v353_v3 = vadd.f32 %v1198_v42, %v352_v59  ;;  %v393_v4 = vadd.f32 %v1198_v42, %v392_v60 }
  0xb0   :  { %v922_v61 = vpack.c.bf16 %v430_v57, %v428_v55  ;;  %v962_v62 = vpack.c.bf16 %v470_v58, %v468_v56 }
  0xb2   :  { %1014 = vst [vmem:[%s1363_s3 + $0x80] sm:$0xff] %v922_v61  }
  0xb3   :  { %1022 = vst [vmem:[%s1363_s3 + $0xc0] sm:$0xff] %v962_v62  }
  0xb5   :  { %v432_v63 = vpop.f32.mrf.mxu2  ;;  %v472_v0 = vpop.f32.mrf.mxu3 }
  0xb6   :  { %v354_v1 = vpop.f32.mrf.mxu0  ;;  %v394_v2 = vpop.f32.mrf.mxu1  ;;  %v433_v11 = vadd.f32 %v1198_v42, %v432_v63  ;;  %v473_v12 = vadd.f32 %v1198_v42, %v472_v0 }
  0xb7   :  { %v355_v5 = vadd.f32 %v1198_v42, %v354_v1  ;;  %v395_v6 = vadd.f32 %v1198_v42, %v394_v2 }
  0xb9   :  { %v847_v7 = vpack.c.bf16 %v355_v5, %v353_v3  ;;  %v887_v8 = vpack.c.bf16 %v395_v6, %v393_v4 }
  0xbb   :  { %999 = vst [vmem:[%s1363_s3 + $0x8] sm:$0xff] %v847_v7  }
  0xbc   :  { %1007 = vst [vmem:[%s1363_s3 + $0x48] sm:$0xff] %v887_v8  }
  0xbd   :  { %v434_v9 = vpop.f32.mrf.mxu2  ;;  %v474_v10 = vpop.f32.mrf.mxu3 }
  0xbe   :  { %v435_v13 = vadd.f32 %v1198_v42, %v434_v9  ;;  %v475_v14 = vadd.f32 %v1198_v42, %v474_v10  ;;  %v357_v15 = vpop.f32.mrf.mxu0  ;;  %v397_v16 = vpop.f32.mrf.mxu1 }
  0xbf   :  { %v358_v23 = vadd.f32 %v1198_v42, %v357_v15  ;;  %v398_v24 = vadd.f32 %v1198_v42, %v397_v16 }
  0xc0   :  { %v927_v17 = vpack.c.bf16 %v435_v13, %v433_v11  ;;  %v967_v18 = vpack.c.bf16 %v475_v14, %v473_v12 }
  0xc2   :  { %1015 = vst [vmem:[%s1363_s3 + $0x88] sm:$0xff] %v927_v17  }
  0xc3   :  { %1023 = vst [vmem:[%s1363_s3 + $0xc8] sm:$0xff] %v967_v18  }
  0xc5   :  { %v437_v19 = vpop.f32.mrf.mxu2  ;;  %v477_v20 = vpop.f32.mrf.mxu3 }
  0xc6   :  { %v359_v21 = vpop.f32.mrf.mxu0  ;;  %v399_v22 = vpop.f32.mrf.mxu1  ;;  %v438_v31 = vadd.f32 %v1198_v42, %v437_v19  ;;  %v478_v32 = vadd.f32 %v1198_v42, %v477_v20 }
  0xc7   :  { %v360_v25 = vadd.f32 %v1198_v42, %v359_v21  ;;  %v400_v26 = vadd.f32 %v1198_v42, %v399_v22 }
  0xc9   :  { %v852_v27 = vpack.c.bf16 %v360_v25, %v358_v23  ;;  %v892_v28 = vpack.c.bf16 %v400_v26, %v398_v24 }
  0xcb   :  { %1000 = vst [vmem:[%s1363_s3 + $0x10] sm:$0xff] %v852_v27  }
  0xcc   :  { %1008 = vst [vmem:[%s1363_s3 + $0x50] sm:$0xff] %v892_v28  }
  0xcd   :  { %v439_v29 = vpop.f32.mrf.mxu2  ;;  %v479_v30 = vpop.f32.mrf.mxu3 }
  0xce   :  { %v440_v33 = vadd.f32 %v1198_v42, %v439_v29  ;;  %v480_v34 = vadd.f32 %v1198_v42, %v479_v30  ;;  %v362_v35 = vpop.f32.mrf.mxu0  ;;  %v402_v36 = vpop.f32.mrf.mxu1 }
  0xcf   :  { %v363_v44 = vadd.f32 %v1198_v42, %v362_v35  ;;  %v403_v45 = vadd.f32 %v1198_v42, %v402_v36 }
  0xd0   :  { %v932_v37 = vpack.c.bf16 %v440_v33, %v438_v31  ;;  %v972_v38 = vpack.c.bf16 %v480_v34, %v478_v32 }
  0xd2   :  { %1016 = vst [vmem:[%s1363_s3 + $0x90] sm:$0xff] %v932_v37  }
  0xd3   :  { %1024 = vst [vmem:[%s1363_s3 + $0xd0] sm:$0xff] %v972_v38  }
  0xd5   :  { %v442_v39 = vpop.f32.mrf.mxu2  ;;  %v482_v40 = vpop.f32.mrf.mxu3 }
  0xd6   :  { %v364_v41 = vpop.f32.mrf.mxu0  ;;  %v404_v43 = vpop.f32.mrf.mxu1  ;;  %v443_v52 = vadd.f32 %v1198_v42, %v442_v39  ;;  %v483_v53 = vadd.f32 %v1198_v42, %v482_v40 }
  0xd7   :  { %v365_v46 = vadd.f32 %v1198_v42, %v364_v41  ;;  %v405_v47 = vadd.f32 %v1198_v42, %v404_v43 }
  0xd9   :  { %v857_v48 = vpack.c.bf16 %v365_v46, %v363_v44  ;;  %v897_v49 = vpack.c.bf16 %v405_v47, %v403_v45 }
  0xdb   :  { %1001 = vst [vmem:[%s1363_s3 + $0x18] sm:$0xff] %v857_v48  }
  0xdc   :  { %1009 = vst [vmem:[%s1363_s3 + $0x58] sm:$0xff] %v897_v49  }
  0xdd   :  { %v444_v50 = vpop.f32.mrf.mxu2  ;;  %v484_v51 = vpop.f32.mrf.mxu3 }
  0xde   :  { %v445_v54 = vadd.f32 %v1198_v42, %v444_v50  ;;  %v485_v55 = vadd.f32 %v1198_v42, %v484_v51  ;;  %v367_v56 = vpop.f32.mrf.mxu0  ;;  %v407_v57 = vpop.f32.mrf.mxu1 }
  0xdf   :  { %v368_v0 = vadd.f32 %v1198_v42, %v367_v56  ;;  %v408_v1 = vadd.f32 %v1198_v42, %v407_v57 }
  0xe0   :  { %v937_v58 = vpack.c.bf16 %v445_v54, %v443_v52  ;;  %v977_v59 = vpack.c.bf16 %v485_v55, %v483_v53 }
  0xe2   :  { %1017 = vst [vmem:[%s1363_s3 + $0x98] sm:$0xff] %v937_v58  }
  0xe3   :  { %1025 = vst [vmem:[%s1363_s3 + $0xd8] sm:$0xff] %v977_v59  }
  0xe5   :  { %v447_v60 = vpop.f32.mrf.mxu2  ;;  %v487_v61 = vpop.f32.mrf.mxu3 }
  0xe6   :  { %v369_v62 = vpop.f32.mrf.mxu0  ;;  %v409_v63 = vpop.f32.mrf.mxu1  ;;  %v448_v8 = vadd.f32 %v1198_v42, %v447_v60  ;;  %v488_v9 = vadd.f32 %v1198_v42, %v487_v61 }
  0xe7   :  { %v370_v2 = vadd.f32 %v1198_v42, %v369_v62  ;;  %v410_v3 = vadd.f32 %v1198_v42, %v409_v63 }
  0xe9   :  { %v862_v4 = vpack.c.bf16 %v370_v2, %v368_v0  ;;  %v902_v5 = vpack.c.bf16 %v410_v3, %v408_v1 }
  0xeb   :  { %1002 = vst [vmem:[%s1363_s3 + $0x20] sm:$0xff] %v862_v4  }
  0xec   :  { %1010 = vst [vmem:[%s1363_s3 + $0x60] sm:$0xff] %v902_v5  }
  0xed   :  { %v449_v6 = vpop.f32.mrf.mxu2  ;;  %v489_v7 = vpop.f32.mrf.mxu3 }
  0xee   :  { %v450_v10 = vadd.f32 %v1198_v42, %v449_v6  ;;  %v490_v11 = vadd.f32 %v1198_v42, %v489_v7  ;;  %v372_v12 = vpop.f32.mrf.mxu0  ;;  %v412_v13 = vpop.f32.mrf.mxu1 }
  0xef   :  { %v373_v20 = vadd.f32 %v1198_v42, %v372_v12  ;;  %v413_v21 = vadd.f32 %v1198_v42, %v412_v13 }
  0xf0   :  { %v942_v14 = vpack.c.bf16 %v450_v10, %v448_v8  ;;  %v982_v15 = vpack.c.bf16 %v490_v11, %v488_v9 }
  0xf2   :  { %1018 = vst [vmem:[%s1363_s3 + $0xa0] sm:$0xff] %v942_v14  }
  0xf3   :  { %1026 = vst [vmem:[%s1363_s3 + $0xe0] sm:$0xff] %v982_v15  }
  0xf5   :  { %v452_v16 = vpop.f32.mrf.mxu2  ;;  %v492_v17 = vpop.f32.mrf.mxu3 }
  0xf6   :  { %v374_v18 = vpop.f32.mrf.mxu0  ;;  %v414_v19 = vpop.f32.mrf.mxu1  ;;  %v453_v28 = vadd.f32 %v1198_v42, %v452_v16  ;;  %v493_v29 = vadd.f32 %v1198_v42, %v492_v17 }
  0xf7   :  { %v375_v22 = vadd.f32 %v1198_v42, %v374_v18  ;;  %v415_v23 = vadd.f32 %v1198_v42, %v414_v19 }
  0xf9   :  { %v867_v24 = vpack.c.bf16 %v375_v22, %v373_v20  ;;  %v907_v25 = vpack.c.bf16 %v415_v23, %v413_v21 }
  0xfb   :  { %1003 = vst [vmem:[%s1363_s3 + $0x28] sm:$0xff] %v867_v24  }
  0xfc   :  { %1011 = vst [vmem:[%s1363_s3 + $0x68] sm:$0xff] %v907_v25  }
  0xfd   :  { %v454_v26 = vpop.f32.mrf.mxu2  ;;  %v494_v27 = vpop.f32.mrf.mxu3 }
  0xfe   :  { %v455_v30 = vadd.f32 %v1198_v42, %v454_v26  ;;  %v495_v31 = vadd.f32 %v1198_v42, %v494_v27  ;;  %v377_v32 = vpop.f32.mrf.mxu0  ;;  %v417_v33 = vpop.f32.mrf.mxu1 }
  0xff   :  { %v378_v40 = vadd.f32 %v1198_v42, %v377_v32  ;;  %v418_v41 = vadd.f32 %v1198_v42, %v417_v33 }
 0x100   :  { %v947_v34 = vpack.c.bf16 %v455_v30, %v453_v28  ;;  %v987_v35 = vpack.c.bf16 %v495_v31, %v493_v29 }
 0x102   :  { %1019 = vst [vmem:[%s1363_s3 + $0xa8] sm:$0xff] %v947_v34  }
 0x103   :  { %1027 = vst [vmem:[%s1363_s3 + $0xe8] sm:$0xff] %v987_v35  }
 0x105   :  { %v457_v36 = vpop.f32.mrf.mxu2  ;;  %v497_v37 = vpop.f32.mrf.mxu3 }
 0x106   :  { %v379_v38 = vpop.f32.mrf.mxu0  ;;  %v419_v39 = vpop.f32.mrf.mxu1  ;;  %v458_v49 = vadd.f32 %v1198_v42, %v457_v36  ;;  %v498_v50 = vadd.f32 %v1198_v42, %v497_v37 }
 0x107   :  { %v380_v43 = vadd.f32 %v1198_v42, %v379_v38  ;;  %v420_v44 = vadd.f32 %v1198_v42, %v419_v39 }
 0x109   :  { %v872_v45 = vpack.c.bf16 %v380_v43, %v378_v40  ;;  %v912_v46 = vpack.c.bf16 %v420_v44, %v418_v41 }
 0x10b   :  { %1004 = vst [vmem:[%s1363_s3 + $0x30] sm:$0xff] %v872_v45  }
 0x10c   :  { %1012 = vst [vmem:[%s1363_s3 + $0x70] sm:$0xff] %v912_v46  }
 0x10d   :  { %v459_v47 = vpop.f32.mrf.mxu2  ;;  %v499_v48 = vpop.f32.mrf.mxu3 }
 0x10e   :  { %v460_v51 = vadd.f32 %v1198_v42, %v459_v47  ;;  %v500_v52 = vadd.f32 %v1198_v42, %v499_v48  ;;  %v382_v53 = vpop.f32.mrf.mxu0  ;;  %v422_v54 = vpop.f32.mrf.mxu1 }
 0x10f   :  { %v383_v61 = vadd.f32 %v1198_v42, %v382_v53  ;;  %v423_v62 = vadd.f32 %v1198_v42, %v422_v54 }
 0x110   :  { %v952_v55 = vpack.c.bf16 %v460_v51, %v458_v49  ;;  %v992_v56 = vpack.c.bf16 %v500_v52, %v498_v50 }
 0x112   :  { %1020 = vst [vmem:[%s1363_s3 + $0xb0] sm:$0xff] %v952_v55  }
 0x113   :  { %1028 = vst [vmem:[%s1363_s3 + $0xf0] sm:$0xff] %v992_v56  }
 0x115   :  { %v462_v57 = vpop.f32.mrf.mxu2  ;;  %v502_v58 = vpop.f32.mrf.mxu3 }
 0x116   :  { %v384_v59 = vpop.f32.mrf.mxu0  ;;  %v424_v60 = vpop.f32.mrf.mxu1  ;;  %v463_v5 = vadd.f32 %v1198_v42, %v462_v57  ;;  %v503_v6 = vadd.f32 %v1198_v42, %v502_v58 }
 0x117   :  { %v385_v63 = vadd.f32 %v1198_v42, %v384_v59  ;;  %v425_v0 = vadd.f32 %v1198_v42, %v424_v60 }
 0x119   :  { %v877_v1 = vpack.c.bf16 %v385_v63, %v383_v61  ;;  %v917_v2 = vpack.c.bf16 %v425_v0, %v423_v62 }
 0x11b   :  { %1005 = vst [vmem:[%s1363_s3 + $0x38] sm:$0xff] %v877_v1  }
 0x11c   :  { %1013 = vst [vmem:[%s1363_s3 + $0x78] sm:$0xff] %v917_v2  }
 0x11d   :  { %v464_v3 = vpop.f32.mrf.mxu2  ;;  %v504_v4 = vpop.f32.mrf.mxu3 }
 0x11e   :  { %v465_v7 = vadd.f32 %v1198_v42, %v464_v3  ;;  %v505_v8 = vadd.f32 %v1198_v42, %v504_v4 }
 0x120   :  { %v957_v9 = vpack.c.bf16 %v465_v7, %v463_v5  ;;  %v997_v10 = vpack.c.bf16 %v505_v8, %v503_v6 }
 0x122   :  { %1021 = vst [vmem:[%s1363_s3 + $0xb8] sm:$0xff] %v957_v9  }
 0x123   :  { %1029 = vst [vmem:[%s1363_s3 + $0xf8] sm:$0xff] %v997_v10  }

// kernel: _fwd.11
= control target key start
LH: loop header
LB: loop body
LE: loop exit
PB: predicated region body
PF: predicated region fallthrough
CT: control target
= control target key end

     0   :  { %s478_s1 = inlined_call_operand.vmem [shape: bf16[1,128,128], index: 1, kind: input, shape index: {}]   ;;  %s479_s2 = inlined_call_operand.vmem [shape: f32[1,128], index: 2, kind: input, shape index: {}]   ;;  %s480_s0 = inlined_call_operand.vmem [shape: bf16[1,128,128], index: 0, kind: input, shape index: {}]   ;;  %s481_s3 = inlined_call_operand.vmem [shape: bf16[1,128,128], index: 3, kind: output, shape index: {}]  }
   0x1   :  { %v310_v0 = vld [vmem:[%s478_s1 + $0x38] sm:$0xff]  ;;  %v309_v1 = vld [vmem:[%s478_s1 + $0x30] sm:$0xff]  ;;  %v308_v2 = vld [vmem:[%s478_s1 + $0x28] sm:$0xff] }
   0x2   :  { %146 = vmatpush.bf16.msra.mxu0 %v310_v0  ;;  %358 = vmatpush.bf16.msra.mxu1 %v310_v0  ;;  %v307_v3 = vld [vmem:[%s478_s1 + $0x20] sm:$0xff]  ;;  %v306_v4 = vld [vmem:[%s478_s1 + $0x18] sm:$0xff]  ;;  %v305_v5 = vld [vmem:[%s478_s1 + $0x10] sm:$0xff] }
   0x3   :  { %359 = vmatpush.bf16.msra.mxu2 %v310_v0  ;;  %360 = vmatpush.bf16.msra.mxu3 %v310_v0  ;;  %v304_v6 = vld [vmem:[%s478_s1 + $0x8] sm:$0xff]  ;;  %v303_v7 = vld [vmem:[%s478_s1] sm:$0xff]  ;;  %v297_v9 = vld [vmem:[%s480_s0 + $0x10] sm:$0xff] }
   0x4   :  { %v295_v8 = vld [vmem:[%s480_s0] sm:$0xff]  ;;  %v301_v11 = vld [vmem:[%s480_s0 + $0x30] sm:$0xff]  ;;  %v296_v12 = vld [vmem:[%s480_s0 + $0x8] sm:$0xff] }
   0x5   :  { %v299_v10 = vld [vmem:[%s480_s0 + $0x20] sm:$0xff]  ;;  %v298_v13 = vld [vmem:[%s480_s0 + $0x18] sm:$0xff]  ;;  %v300_v14 = vld [vmem:[%s480_s0 + $0x28] sm:$0xff] }
   0x6   :  { %147 = vmatpush.bf16.msra.mxu0 %v309_v1  ;;  %361 = vmatpush.bf16.msra.mxu1 %v309_v1  ;;  %v302_v15 = vld [vmem:[%s480_s0 + $0x38] sm:$0xff]  ;;  %v382_v18 = vld [vmem:[%s479_s2] ss:$0 sm:$0xff] }
   0x7   :  { %362 = vmatpush.bf16.msra.mxu2 %v309_v1  ;;  %363 = vmatpush.bf16.msra.mxu3 %v309_v1 }
   0xa   :  { %148 = vmatpush.bf16.msra.mxu0 %v308_v2  ;;  %364 = vmatpush.bf16.msra.mxu1 %v308_v2 }
   0xb   :  { %365 = vmatpush.bf16.msra.mxu2 %v308_v2  ;;  %366 = vmatpush.bf16.msra.mxu3 %v308_v2 }
   0xe   :  { %149 = vmatpush.bf16.msra.mxu0 %v307_v3  ;;  %367 = vmatpush.bf16.msra.mxu1 %v307_v3 }
   0xf   :  { %368 = vmatpush.bf16.msra.mxu2 %v307_v3  ;;  %369 = vmatpush.bf16.msra.mxu3 %v307_v3 }
  0x12   :  { %150 = vmatpush.bf16.msra.mxu0 %v306_v4  ;;  %370 = vmatpush.bf16.msra.mxu1 %v306_v4 }
  0x13   :  { %371 = vmatpush.bf16.msra.mxu2 %v306_v4  ;;  %372 = vmatpush.bf16.msra.mxu3 %v306_v4 }
  0x16   :  { %151 = vmatpush.bf16.msra.mxu0 %v305_v5  ;;  %373 = vmatpush.bf16.msra.mxu1 %v305_v5 }
  0x17   :  { %374 = vmatpush.bf16.msra.mxu2 %v305_v5  ;;  %375 = vmatpush.bf16.msra.mxu3 %v305_v5 }
  0x1a   :  { %152 = vmatpush.bf16.msra.mxu0 %v304_v6  ;;  %376 = vmatpush.bf16.msra.mxu1 %v304_v6 }
  0x1b   :  { %377 = vmatpush.bf16.msra.mxu2 %v304_v6  ;;  %378 = vmatpush.bf16.msra.mxu3 %v304_v6 }
  0x1e   :  { %153 = vmatpush.bf16.msra.mxu0 %v303_v7  ;;  %379 = vmatpush.bf16.msra.mxu1 %v303_v7 }
  0x1f   :  { %380 = vmatpush.bf16.msra.mxu2 %v303_v7  ;;  %381 = vmatpush.bf16.msra.mxu3 %v303_v7 }
  0x21   :  { %154 = vmatmul.bf16.vlgmr.msra.gmra.mxu0 %v295_v8  ;;  %164 = vmatmul.bf16.vlgmr.msra.gmra.mxu1 %v297_v9 }
  0x22   :  { %174 = vmatmul.bf16.vlgmr.msra.gmra.mxu2 %v299_v10  ;;  %184 = vmatmul.bf16.vlgmr.msra.gmra.mxu3 %v301_v11 }
  0x31   :  { %159 = vmatmul.bf16.gmra.mxu0 %v296_v12  ;;  %169 = vmatmul.bf16.gmra.mxu1 %v298_v13 }
  0x32   :  { %179 = vmatmul.bf16.gmra.mxu2 %v300_v14  ;;  %189 = vmatmul.bf16.gmra.mxu3 %v302_v15 }
  0x9e   :  { %v155_v16 = vpop.f32.mrf.mxu0  ;;  %v165_v17 = vpop.f32.mrf.mxu1 }
  0x9f   :  { %v156_v23 = vadd.f32 %v382_v18, %v155_v16  ;;  %v166_v24 = vadd.f32 %v382_v18, %v165_v17 }
  0xa5   :  { %v175_v19 = vpop.f32.mrf.mxu2  ;;  %v185_v20 = vpop.f32.mrf.mxu3 }
  0xa6   :  { %v157_v21 = vpop.f32.mrf.mxu0  ;;  %v167_v22 = vpop.f32.mrf.mxu1  ;;  %v176_v31 = vadd.f32 %v382_v18, %v175_v19  ;;  %v186_v32 = vadd.f32 %v382_v18, %v185_v20 }
  0xa7   :  { %v158_v25 = vadd.f32 %v382_v18, %v157_v21  ;;  %v168_v26 = vadd.f32 %v382_v18, %v167_v22 }
  0xa9   :  { %v314_v27 = vpack.c.bf16 %v158_v25, %v156_v23  ;;  %v324_v28 = vpack.c.bf16 %v168_v26, %v166_v24 }
  0xab   :  { %315 = vst [vmem:[%s481_s3] sm:$0xff] %v314_v27  }
  0xac   :  { %352 = vst [vmem:[%s481_s3 + $0x10] sm:$0xff] %v324_v28  }
  0xad   :  { %v177_v29 = vpop.f32.mrf.mxu2  ;;  %v187_v30 = vpop.f32.mrf.mxu3 }
  0xae   :  { %v178_v33 = vadd.f32 %v382_v18, %v177_v29  ;;  %v188_v34 = vadd.f32 %v382_v18, %v187_v30  ;;  %v160_v35 = vpop.f32.mrf.mxu0  ;;  %v170_v36 = vpop.f32.mrf.mxu1 }
  0xaf   :  { %v161_v43 = vadd.f32 %v382_v18, %v160_v35  ;;  %v171_v44 = vadd.f32 %v382_v18, %v170_v36 }
  0xb0   :  { %v334_v37 = vpack.c.bf16 %v178_v33, %v176_v31  ;;  %v344_v38 = vpack.c.bf16 %v188_v34, %v186_v32 }
  0xb2   :  { %354 = vst [vmem:[%s481_s3 + $0x20] sm:$0xff] %v334_v37  }
  0xb3   :  { %356 = vst [vmem:[%s481_s3 + $0x30] sm:$0xff] %v344_v38  }
  0xb5   :  { %v180_v39 = vpop.f32.mrf.mxu2  ;;  %v190_v40 = vpop.f32.mrf.mxu3 }
  0xb6   :  { %v162_v41 = vpop.f32.mrf.mxu0  ;;  %v172_v42 = vpop.f32.mrf.mxu1  ;;  %v181_v51 = vadd.f32 %v382_v18, %v180_v39  ;;  %v191_v52 = vadd.f32 %v382_v18, %v190_v40 }
  0xb7   :  { %v163_v45 = vadd.f32 %v382_v18, %v162_v41  ;;  %v173_v46 = vadd.f32 %v382_v18, %v172_v42 }
  0xb9   :  { %v319_v47 = vpack.c.bf16 %v163_v45, %v161_v43  ;;  %v329_v48 = vpack.c.bf16 %v173_v46, %v171_v44 }
  0xbb   :  { %351 = vst [vmem:[%s481_s3 + $0x8] sm:$0xff] %v319_v47  }
  0xbc   :  { %353 = vst [vmem:[%s481_s3 + $0x18] sm:$0xff] %v329_v48  }
  0xbd   :  { %v182_v49 = vpop.f32.mrf.mxu2  ;;  %v192_v50 = vpop.f32.mrf.mxu3 }
  0xbe   :  { %v183_v53 = vadd.f32 %v382_v18, %v182_v49  ;;  %v193_v54 = vadd.f32 %v382_v18, %v192_v50 }
  0xc0   :  { %v339_v55 = vpack.c.bf16 %v183_v53, %v181_v51  ;;  %v349_v56 = vpack.c.bf16 %v193_v54, %v191_v52 }
  0xc2   :  { %355 = vst [vmem:[%s481_s3 + $0x28] sm:$0xff] %v339_v55  }
  0xc3   :  { %357 = vst [vmem:[%s481_s3 + $0x38] sm:$0xff] %v349_v56  }

// kernel: _fwd.12
= control target key start
LH: loop header
LB: loop body
LE: loop exit
PB: predicated region body
PF: predicated region fallthrough
CT: control target
= control target key end

     0   :  { %s449_s1 = inlined_call_operand.vmem [shape: bf16[1,256,128], index: 1, kind: input, shape index: {}]   ;;  %s450_s2 = inlined_call_operand.vmem [shape: f32[1,128], index: 2, kind: input, shape index: {}]   ;;  %s451_s0 = inlined_call_operand.vmem [shape: bf16[1,32,256], index: 0, kind: input, shape index: {}]   ;;  %s452_s3 = inlined_call_operand.vmem [shape: bf16[1,32,128], index: 3, kind: output, shape index: {}]  }
   0x1   :  { %v311_v0 = vld [vmem:[%s449_s1 + $0x38] sm:$0xff]  ;;  %v310_v2 = vld [vmem:[%s449_s1 + $0x30] sm:$0xff]  ;;  %v309_v4 = vld [vmem:[%s449_s1 + $0x28] sm:$0xff] }
   0x2   :  { %v319_v1 = vld [vmem:[%s449_s1 + $0x78] sm:$0xff]  ;;  %170 = vmatpush.bf16.msra.mxu0 %v311_v0  ;;  %331 = vmatpush.bf16.msra.mxu2 %v311_v0  ;;  %v318_v3 = vld [vmem:[%s449_s1 + $0x70] sm:$0xff]  ;;  %v317_v5 = vld [vmem:[%s449_s1 + $0x68] sm:$0xff] }
   0x3   :  { %189 = vmatpush.bf16.msra.mxu1 %v319_v1  ;;  %339 = vmatpush.bf16.msra.mxu3 %v319_v1  ;;  %v308_v6 = vld [vmem:[%s449_s1 + $0x20] sm:$0xff]  ;;  %v307_v8 = vld [vmem:[%s449_s1 + $0x18] sm:$0xff]  ;;  %v306_v10 = vld [vmem:[%s449_s1 + $0x10] sm:$0xff] }
   0x4   :  { %v316_v7 = vld [vmem:[%s449_s1 + $0x60] sm:$0xff]  ;;  %v315_v9 = vld [vmem:[%s449_s1 + $0x58] sm:$0xff]  ;;  %v314_v11 = vld [vmem:[%s449_s1 + $0x50] sm:$0xff] }
   0x5   :  { %v305_v12 = vld [vmem:[%s449_s1 + $0x8] sm:$0xff]  ;;  %v304_v14 = vld [vmem:[%s449_s1] sm:$0xff]  ;;  %v230_v18 = vld [vmem:[%s451_s0 + $0x10] sm:$0xf] }
   0x6   :  { %171 = vmatpush.bf16.msra.mxu0 %v310_v2  ;;  %332 = vmatpush.bf16.msra.mxu2 %v310_v2  ;;  %v313_v13 = vld [vmem:[%s449_s1 + $0x48] sm:$0xff]  ;;  %v312_v15 = vld [vmem:[%s449_s1 + $0x40] sm:$0xff]  ;;  %v303_v19 = vld [vmem:[%s451_s0 + $0x14] sm:$0xf0] }
   0x7   :  { %190 = vmatpush.bf16.msra.mxu1 %v318_v3  ;;  %340 = vmatpush.bf16.msra.mxu3 %v318_v3  ;;  %v222_v16 = vld [vmem:[%s451_s0] sm:$0xf]  ;;  %v301_v17 = vld [vmem:[%s451_s0 + $0x4] sm:$0xf0]  ;;  %v300_v20 = vld [vmem:[%s451_s0 + $0x4] sm:$0xf]  ;;  %v231_v25 = vor.u32 %v303_v19, %v230_v18 }
   0x8   :  { %v224_v21 = vld [vmem:[%s451_s0 + $0x8] sm:$0xf0]  ;;  %v302_v22 = vld [vmem:[%s451_s0 + $0x14] sm:$0xf]  ;;  %v232_v23 = vld [vmem:[%s451_s0 + $0x18] sm:$0xf0]  ;;  %v223_v24 = vor.u32 %v301_v17, %v222_v16 }
   0x9   :  { %v227_v26 = vor.u32 %v300_v20, %v224_v21  ;;  %v235_v27 = vor.u32 %v302_v22, %v232_v23  ;;  %v347_v30 = vld [vmem:[%s450_s2] ss:$0 sm:$0xff] }
   0xa   :  { %172 = vmatpush.bf16.msra.mxu0 %v309_v4  ;;  %333 = vmatpush.bf16.msra.mxu2 %v309_v4 }
   0xb   :  { %191 = vmatpush.bf16.msra.mxu1 %v317_v5  ;;  %341 = vmatpush.bf16.msra.mxu3 %v317_v5 }
   0xe   :  { %173 = vmatpush.bf16.msra.mxu0 %v308_v6  ;;  %334 = vmatpush.bf16.msra.mxu2 %v308_v6 }
   0xf   :  { %192 = vmatpush.bf16.msra.mxu1 %v316_v7  ;;  %342 = vmatpush.bf16.msra.mxu3 %v316_v7 }
  0x12   :  { %174 = vmatpush.bf16.msra.mxu0 %v307_v8  ;;  %335 = vmatpush.bf16.msra.mxu2 %v307_v8 }
  0x13   :  { %193 = vmatpush.bf16.msra.mxu1 %v315_v9  ;;  %343 = vmatpush.bf16.msra.mxu3 %v315_v9 }
  0x16   :  { %175 = vmatpush.bf16.msra.mxu0 %v306_v10  ;;  %336 = vmatpush.bf16.msra.mxu2 %v306_v10 }
  0x17   :  { %194 = vmatpush.bf16.msra.mxu1 %v314_v11  ;;  %344 = vmatpush.bf16.msra.mxu3 %v314_v11 }
  0x1a   :  { %176 = vmatpush.bf16.msra.mxu0 %v305_v12  ;;  %337 = vmatpush.bf16.msra.mxu2 %v305_v12 }
  0x1b   :  { %195 = vmatpush.bf16.msra.mxu1 %v313_v13  ;;  %345 = vmatpush.bf16.msra.mxu3 %v313_v13 }
  0x1e   :  { %177 = vmatpush.bf16.msra.mxu0 %v304_v14  ;;  %338 = vmatpush.bf16.msra.mxu2 %v304_v14 }
  0x1f   :  { %196 = vmatpush.bf16.msra.mxu1 %v312_v15  ;;  %346 = vmatpush.bf16.msra.mxu3 %v312_v15 }
  0x21   :  { %178 = vmatmul.bf16.vlgmr.msra.gmra.mxu0 %v223_v24  ;;  %183 = vmatmul.bf16.vlgmr.msra.gmra.mxu2 %v231_v25 }
  0x22   :  { %197 = vmatmul.bf16.vlgmr.msra.gmra.mxu1 %v227_v26  ;;  %202 = vmatmul.bf16.vlgmr.msra.gmra.mxu3 %v235_v27 }
  0x9e   :  { %v179_v28 = vpop.f32.mrf.mxu0 }
  0x9f   :  { %v198_v29 = vpop.f32.mrf.mxu1  ;;  %v180_v32 = vadd.f32 %v347_v30, %v179_v28 }
  0xa1   :  { %v199_v37 = vadd.f32 %v198_v29, %v180_v32 }
  0xa4   :  { %v184_v31 = vpop.f32.mrf.mxu2 }
  0xa5   :  { %v203_v33 = vpop.f32.mrf.mxu3  ;;  %v185_v39 = vadd.f32 %v347_v30, %v184_v31 }
  0xa6   :  { %v181_v34 = vpop.f32.mrf.mxu0 }
  0xa7   :  { %v182_v35 = vadd.f32 %v347_v30, %v181_v34  ;;  %v200_v36 = vpop.f32.mrf.mxu1  ;;  %v204_v44 = vadd.f32 %v203_v33, %v185_v39 }
  0xa9   :  { %v201_v38 = vadd.f32 %v200_v36, %v182_v35 }
  0xab   :  { %v323_v40 = vpack.c.bf16 %v201_v38, %v199_v37 }
  0xac   :  { %v186_v41 = vpop.f32.mrf.mxu2 }
  0xad   :  { %324 = vst [vmem:[%s452_s3] sm:$0xff] %v323_v40   ;;  %v187_v42 = vadd.f32 %v347_v30, %v186_v41  ;;  %v205_v43 = vpop.f32.mrf.mxu3 }
  0xaf   :  { %v206_v45 = vadd.f32 %v205_v43, %v187_v42 }
  0xb1   :  { %v328_v46 = vpack.c.bf16 %v206_v45, %v204_v44 }
  0xb3   :  { %330 = vst [vmem:[%s452_s3 + $0x8] sm:$0xff] %v328_v46  }

// kernel: _fwd.13
= control target key start
LH: loop header
LB: loop body
LE: loop exit
PB: predicated region body
PF: predicated region fallthrough
CT: control target
= control target key end

     0   :  { %s694_s1 = inlined_call_operand.vmem [shape: bf16[1,512,128], index: 1, kind: input, shape index: {}]   ;;  %s695_s2 = inlined_call_operand.vmem [shape: f32[1,128], index: 2, kind: input, shape index: {}]   ;;  %s696_s0 = inlined_call_operand.vmem [shape: bf16[1,16,512], index: 0, kind: input, shape index: {}]   ;;  %s697_s3 = inlined_call_operand.vmem [shape: bf16[1,16,128], index: 3, kind: output, shape index: {}]  }
   0x1   :  { %v517_v0 = vld [vmem:[%s694_s1 + $0x38] sm:$0xff]  ;;  %v516_v4 = vld [vmem:[%s694_s1 + $0x30] sm:$0xff]  ;;  %v515_v8 = vld [vmem:[%s694_s1 + $0x28] sm:$0xff] }
   0x2   :  { %v525_v1 = vld [vmem:[%s694_s1 + $0x78] sm:$0xff]  ;;  %298 = vmatpush.bf16.msra.mxu0 %v517_v0  ;;  %v524_v5 = vld [vmem:[%s694_s1 + $0x70] sm:$0xff]  ;;  %v523_v9 = vld [vmem:[%s694_s1 + $0x68] sm:$0xff] }
   0x3   :  { %v533_v2 = vld [vmem:[%s694_s1 + $0xb8] sm:$0xff]  ;;  %312 = vmatpush.bf16.msra.mxu1 %v525_v1  ;;  %v532_v6 = vld [vmem:[%s694_s1 + $0xb0] sm:$0xff]  ;;  %v531_v10 = vld [vmem:[%s694_s1 + $0xa8] sm:$0xff] }
   0x4   :  { %v541_v3 = vld [vmem:[%s694_s1 + $0xf8] sm:$0xff]  ;;  %326 = vmatpush.bf16.msra.mxu2 %v533_v2  ;;  %v540_v7 = vld [vmem:[%s694_s1 + $0xf0] sm:$0xff]  ;;  %v539_v11 = vld [vmem:[%s694_s1 + $0xe8] sm:$0xff] }
   0x5   :  { %340 = vmatpush.bf16.msra.mxu3 %v541_v3  ;;  %v514_v12 = vld [vmem:[%s694_s1 + $0x20] sm:$0xff]  ;;  %v513_v16 = vld [vmem:[%s694_s1 + $0x18] sm:$0xff]  ;;  %v512_v20 = vld [vmem:[%s694_s1 + $0x10] sm:$0xff] }
   0x6   :  { %299 = vmatpush.bf16.msra.mxu0 %v516_v4  ;;  %v522_v13 = vld [vmem:[%s694_s1 + $0x60] sm:$0xff]  ;;  %v521_v17 = vld [vmem:[%s694_s1 + $0x58] sm:$0xff]  ;;  %v520_v21 = vld [vmem:[%s694_s1 + $0x50] sm:$0xff] }
   0x7   :  { %313 = vmatpush.bf16.msra.mxu1 %v524_v5  ;;  %v530_v14 = vld [vmem:[%s694_s1 + $0xa0] sm:$0xff]  ;;  %v529_v18 = vld [vmem:[%s694_s1 + $0x98] sm:$0xff]  ;;  %v528_v22 = vld [vmem:[%s694_s1 + $0x90] sm:$0xff] }
   0x8   :  { %327 = vmatpush.bf16.msra.mxu2 %v532_v6  ;;  %v538_v15 = vld [vmem:[%s694_s1 + $0xe0] sm:$0xff]  ;;  %v537_v19 = vld [vmem:[%s694_s1 + $0xd8] sm:$0xff]  ;;  %v536_v23 = vld [vmem:[%s694_s1 + $0xd0] sm:$0xff] }
   0x9   :  { %341 = vmatpush.bf16.msra.mxu3 %v540_v7  ;;  %v511_v24 = vld [vmem:[%s694_s1 + $0x8] sm:$0xff]  ;;  %v510_v28 = vld [vmem:[%s694_s1] sm:$0xff]  ;;  %v508_v33 = vld [vmem:[%s696_s0 + $0xc] sm:$0xf0] }
   0xa   :  { %300 = vmatpush.bf16.msra.mxu0 %v515_v8  ;;  %v519_v25 = vld [vmem:[%s694_s1 + $0x48] sm:$0xff]  ;;  %v518_v29 = vld [vmem:[%s694_s1 + $0x40] sm:$0xff]  ;;  %v366_v35 = vld [vmem:[%s696_s0 + $0x10] sm:$0xf0] }
   0xb   :  { %314 = vmatpush.bf16.msra.mxu1 %v523_v9  ;;  %v527_v26 = vld [vmem:[%s694_s1 + $0x88] sm:$0xff]  ;;  %v526_v30 = vld [vmem:[%s694_s1 + $0x80] sm:$0xff]  ;;  %v509_v37 = vld [vmem:[%s696_s0 + $0x14] sm:$0xf0] }
   0xc   :  { %328 = vmatpush.bf16.msra.mxu2 %v531_v10  ;;  %v535_v27 = vld [vmem:[%s694_s1 + $0xc8] sm:$0xff]  ;;  %v534_v31 = vld [vmem:[%s694_s1 + $0xc0] sm:$0xff]  ;;  %v374_v39 = vld [vmem:[%s696_s0 + $0x18] sm:$0xf0] }
   0xd   :  { %342 = vmatpush.bf16.msra.mxu3 %v539_v11  ;;  %v364_v32 = vld [vmem:[%s696_s0] sm:$0xf]  ;;  %v506_v34 = vld [vmem:[%s696_s0 + $0x4] sm:$0xf]  ;;  %v372_v36 = vld [vmem:[%s696_s0 + $0x8] sm:$0xf] }
   0xe   :  { %301 = vmatpush.bf16.msra.mxu0 %v514_v12  ;;  %v507_v38 = vld [vmem:[%s696_s0 + $0xc] sm:$0xf]  ;;  %v365_v40 = vor.u32 %v508_v33, %v364_v32  ;;  %v369_v41 = vor.u32 %v506_v34, %v366_v35  ;;  %v373_v42 = vor.u32 %v509_v37, %v372_v36  ;;  %v547_v45 = vld [vmem:[%s695_s2] ss:$0 sm:$0xff] }
   0xf   :  { %315 = vmatpush.bf16.msra.mxu1 %v522_v13  ;;  %v377_v43 = vor.u32 %v507_v38, %v374_v39 }
  0x10   :  { %329 = vmatpush.bf16.msra.mxu2 %v530_v14 }
  0x11   :  { %343 = vmatpush.bf16.msra.mxu3 %v538_v15 }
  0x12   :  { %302 = vmatpush.bf16.msra.mxu0 %v513_v16 }
  0x13   :  { %316 = vmatpush.bf16.msra.mxu1 %v521_v17 }
  0x14   :  { %330 = vmatpush.bf16.msra.mxu2 %v529_v18 }
  0x15   :  { %344 = vmatpush.bf16.msra.mxu3 %v537_v19 }
  0x16   :  { %303 = vmatpush.bf16.msra.mxu0 %v512_v20 }
  0x17   :  { %317 = vmatpush.bf16.msra.mxu1 %v520_v21 }
  0x18   :  { %331 = vmatpush.bf16.msra.mxu2 %v528_v22 }
  0x19   :  { %345 = vmatpush.bf16.msra.mxu3 %v536_v23 }
  0x1a   :  { %304 = vmatpush.bf16.msra.mxu0 %v511_v24 }
  0x1b   :  { %318 = vmatpush.bf16.msra.mxu1 %v519_v25 }
  0x1c   :  { %332 = vmatpush.bf16.msra.mxu2 %v527_v26 }
  0x1d   :  { %346 = vmatpush.bf16.msra.mxu3 %v535_v27 }
  0x1e   :  { %305 = vmatpush.bf16.msra.mxu0 %v510_v28 }
  0x1f   :  { %319 = vmatpush.bf16.msra.mxu1 %v518_v29 }
  0x20   :  { %333 = vmatpush.bf16.msra.mxu2 %v526_v30 }
  0x21   :  { %347 = vmatpush.bf16.msra.mxu3 %v534_v31  ;;  %306 = vmatmul.bf16.vlgmr.msra.gmra.mxu0 %v365_v40 }
  0x22   :  { %320 = vmatmul.bf16.vlgmr.msra.gmra.mxu1 %v369_v41 }
  0x23   :  { %334 = vmatmul.bf16.vlgmr.msra.gmra.mxu2 %v373_v42 }
  0x24   :  { %348 = vmatmul.bf16.vlgmr.msra.gmra.mxu3 %v377_v43 }
  0x9e   :  { %v307_v44 = vpop.f32.mrf.mxu0 }
  0x9f   :  { %v321_v46 = vpop.f32.mrf.mxu1  ;;  %v308_v47 = vadd.f32 %v547_v45, %v307_v44 }
  0xa1   :  { %v322_v51 = vadd.f32 %v321_v46, %v308_v47 }
  0xa6   :  { %v335_v48 = vpop.f32.mrf.mxu2  ;;  %v309_v50 = vpop.f32.mrf.mxu0 }
  0xa7   :  { %v349_v49 = vpop.f32.mrf.mxu3  ;;  %v310_v52 = vadd.f32 %v547_v45, %v309_v50  ;;  %v323_v53 = vpop.f32.mrf.mxu1  ;;  %v336_v54 = vadd.f32 %v335_v48, %v322_v51 }
  0xa9   :  { %v324_v55 = vadd.f32 %v323_v53, %v310_v52  ;;  %v350_v59 = vadd.f32 %v349_v49, %v336_v54 }
  0xae   :  { %v337_v56 = vpop.f32.mrf.mxu2 }
  0xaf   :  { %v338_v57 = vadd.f32 %v337_v56, %v324_v55  ;;  %v351_v58 = vpop.f32.mrf.mxu3 }
  0xb1   :  { %v352_v60 = vadd.f32 %v351_v58, %v338_v57 }
  0xb3   :  { %v545_v61 = vpack.c.bf16 %v352_v60, %v350_v59 }
  0xb5   :  { %546 = vst [vmem:[%s697_s3] sm:$0xff] %v545_v61  }

// kernel: _fwd.14
= control target key start
LH: loop header
LB: loop body
LE: loop exit
PB: predicated region body
PF: predicated region fallthrough
CT: control target
= control target key end

     0   :  { %s1330_s1 = inlined_call_operand.vmem [shape: bf16[1,1024,128], index: 1, kind: input, shape index: {}]   ;;  %s1331_s2 = inlined_call_operand.vmem [shape: f32[1,128], index: 2, kind: input, shape index: {}]   ;;  %s1332_s0 = inlined_call_operand.vmem [shape: bf16[1,16,1024], index: 0, kind: input, shape index: {}]   ;;  %s1333_s3 = inlined_call_operand.vmem [shape: bf16[1,16,128], index: 3, kind: output, shape index: {}]  }
   0x1   :  { %v1001_v0 = vld [vmem:[%s1330_s1 + $0x38] sm:$0xff]  ;;  %v1000_v4 = vld [vmem:[%s1330_s1 + $0x30] sm:$0xff]  ;;  %v999_v8 = vld [vmem:[%s1330_s1 + $0x28] sm:$0xff] }
   0x2   :  { %v1009_v1 = vld [vmem:[%s1330_s1 + $0x78] sm:$0xff]  ;;  %578 = vmatpush.bf16.msra.mxu0 %v1001_v0  ;;  %v1008_v5 = vld [vmem:[%s1330_s1 + $0x70] sm:$0xff]  ;;  %v1007_v9 = vld [vmem:[%s1330_s1 + $0x68] sm:$0xff] }
   0x3   :  { %v1017_v2 = vld [vmem:[%s1330_s1 + $0xb8] sm:$0xff]  ;;  %592 = vmatpush.bf16.msra.mxu1 %v1009_v1  ;;  %v1016_v6 = vld [vmem:[%s1330_s1 + $0xb0] sm:$0xff]  ;;  %v1015_v10 = vld [vmem:[%s1330_s1 + $0xa8] sm:$0xff] }
   0x4   :  { %v1025_v3 = vld [vmem:[%s1330_s1 + $0xf8] sm:$0xff]  ;;  %606 = vmatpush.bf16.msra.mxu2 %v1017_v2  ;;  %v1024_v7 = vld [vmem:[%s1330_s1 + $0xf0] sm:$0xff]  ;;  %v1023_v11 = vld [vmem:[%s1330_s1 + $0xe8] sm:$0xff] }
   0x5   :  { %620 = vmatpush.bf16.msra.mxu3 %v1025_v3  ;;  %v998_v12 = vld [vmem:[%s1330_s1 + $0x20] sm:$0xff]  ;;  %v997_v16 = vld [vmem:[%s1330_s1 + $0x18] sm:$0xff]  ;;  %v996_v20 = vld [vmem:[%s1330_s1 + $0x10] sm:$0xff] }
   0x6   :  { %579 = vmatpush.bf16.msra.mxu0 %v1000_v4  ;;  %v1006_v13 = vld [vmem:[%s1330_s1 + $0x60] sm:$0xff]  ;;  %v1005_v17 = vld [vmem:[%s1330_s1 + $0x58] sm:$0xff]  ;;  %v1004_v21 = vld [vmem:[%s1330_s1 + $0x50] sm:$0xff] }
   0x7   :  { %593 = vmatpush.bf16.msra.mxu1 %v1008_v5  ;;  %v1014_v14 = vld [vmem:[%s1330_s1 + $0xa0] sm:$0xff]  ;;  %v1013_v18 = vld [vmem:[%s1330_s1 + $0x98] sm:$0xff]  ;;  %v1012_v22 = vld [vmem:[%s1330_s1 + $0x90] sm:$0xff] }
   0x8   :  { %607 = vmatpush.bf16.msra.mxu2 %v1016_v6  ;;  %v1022_v15 = vld [vmem:[%s1330_s1 + $0xe0] sm:$0xff]  ;;  %v1021_v19 = vld [vmem:[%s1330_s1 + $0xd8] sm:$0xff]  ;;  %v1020_v23 = vld [vmem:[%s1330_s1 + $0xd0] sm:$0xff] }
   0x9   :  { %621 = vmatpush.bf16.msra.mxu3 %v1024_v7  ;;  %v995_v24 = vld [vmem:[%s1330_s1 + $0x8] sm:$0xff]  ;;  %v994_v28 = vld [vmem:[%s1330_s1] sm:$0xff]  ;;  %v1033_v32 = vld [vmem:[%s1330_s1 + $0x138] sm:$0xff] }
   0xa   :  { %580 = vmatpush.bf16.msra.mxu0 %v999_v8  ;;  %v1003_v25 = vld [vmem:[%s1330_s1 + $0x48] sm:$0xff]  ;;  %v1002_v29 = vld [vmem:[%s1330_s1 + $0x40] sm:$0xff]  ;;  %v1041_v33 = vld [vmem:[%s1330_s1 + $0x178] sm:$0xff] }
   0xb   :  { %594 = vmatpush.bf16.msra.mxu1 %v1007_v9  ;;  %v1011_v26 = vld [vmem:[%s1330_s1 + $0x88] sm:$0xff]  ;;  %v1010_v30 = vld [vmem:[%s1330_s1 + $0x80] sm:$0xff]  ;;  %v1049_v42 = vld [vmem:[%s1330_s1 + $0x1b8] sm:$0xff] }
   0xc   :  { %608 = vmatpush.bf16.msra.mxu2 %v1015_v10  ;;  %v1019_v27 = vld [vmem:[%s1330_s1 + $0xc8] sm:$0xff]  ;;  %v1018_v31 = vld [vmem:[%s1330_s1 + $0xc0] sm:$0xff]  ;;  %v1057_v43 = vld [vmem:[%s1330_s1 + $0x1f8] sm:$0xff] }
   0xd   :  { %622 = vmatpush.bf16.msra.mxu3 %v1023_v11  ;;  %v708_v34 = vld [vmem:[%s1332_s0 + $0x8] sm:$0xf]  ;;  %v700_v36 = vld [vmem:[%s1332_s0] sm:$0xf]  ;;  %v987_v38 = vld [vmem:[%s1332_s0 + $0xc] sm:$0xf] }
   0xe   :  { %581 = vmatpush.bf16.msra.mxu0 %v998_v12  ;;  %v991_v35 = vld [vmem:[%s1332_s0 + $0x24] sm:$0xf0]  ;;  %v990_v37 = vld [vmem:[%s1332_s0 + $0x1c] sm:$0xf0]  ;;  %v710_v39 = vld [vmem:[%s1332_s0 + $0x28] sm:$0xf0] }
   0xf   :  { %595 = vmatpush.bf16.msra.mxu1 %v1006_v13  ;;  %v986_v40 = vld [vmem:[%s1332_s0 + $0x4] sm:$0xf]  ;;  %v709_v44 = vor.u32 %v991_v35, %v708_v34  ;;  %v701_v45 = vor.u32 %v990_v37, %v700_v36  ;;  %v713_v46 = vor.u32 %v987_v38, %v710_v39  ;;  %v1032_v48 = vld [vmem:[%s1330_s1 + $0x130] sm:$0xff]  ;;  %v1031_v52 = vld [vmem:[%s1330_s1 + $0x128] sm:$0xff] }
  0x10   :  { %609 = vmatpush.bf16.msra.mxu2 %v1014_v14  ;;  %v702_v41 = vld [vmem:[%s1332_s0 + $0x20] sm:$0xf0]  ;;  %v1040_v49 = vld [vmem:[%s1330_s1 + $0x170] sm:$0xff]  ;;  %v1039_v53 = vld [vmem:[%s1330_s1 + $0x168] sm:$0xff] }
  0x11   :  { %623 = vmatpush.bf16.msra.mxu3 %v1022_v15  ;;  %v705_v47 = vor.u32 %v986_v40, %v702_v41  ;;  %v1048_v50 = vld [vmem:[%s1330_s1 + $0x1b0] sm:$0xff]  ;;  %v1047_v54 = vld [vmem:[%s1330_s1 + $0x1a8] sm:$0xff]  ;;  %v1030_v56 = vld [vmem:[%s1330_s1 + $0x120] sm:$0xff] }
  0x12   :  { %582 = vmatpush.bf16.msra.mxu0 %v997_v16  ;;  %v1056_v51 = vld [vmem:[%s1330_s1 + $0x1f0] sm:$0xff]  ;;  %v1055_v55 = vld [vmem:[%s1330_s1 + $0x1e8] sm:$0xff]  ;;  %v1038_v57 = vld [vmem:[%s1330_s1 + $0x160] sm:$0xff] }
  0x13   :  { %596 = vmatpush.bf16.msra.mxu1 %v1005_v17  ;;  %v1046_v58 = vld [vmem:[%s1330_s1 + $0x1a0] sm:$0xff]  ;;  %v1029_v60 = vld [vmem:[%s1330_s1 + $0x118] sm:$0xff]  ;;  %v1028_v0 = vld [vmem:[%s1330_s1 + $0x110] sm:$0xff] }
  0x14   :  { %610 = vmatpush.bf16.msra.mxu2 %v1013_v18  ;;  %v1054_v59 = vld [vmem:[%s1330_s1 + $0x1e0] sm:$0xff]  ;;  %v1037_v61 = vld [vmem:[%s1330_s1 + $0x158] sm:$0xff]  ;;  %v1036_v1 = vld [vmem:[%s1330_s1 + $0x150] sm:$0xff] }
  0x15   :  { %624 = vmatpush.bf16.msra.mxu3 %v1021_v19  ;;  %v1045_v62 = vld [vmem:[%s1330_s1 + $0x198] sm:$0xff]  ;;  %v1044_v2 = vld [vmem:[%s1330_s1 + $0x190] sm:$0xff]  ;;  %v1027_v4 = vld [vmem:[%s1330_s1 + $0x108] sm:$0xff] }
  0x16   :  { %583 = vmatpush.bf16.msra.mxu0 %v996_v20  ;;  %v1053_v63 = vld [vmem:[%s1330_s1 + $0x1d8] sm:$0xff]  ;;  %v1052_v3 = vld [vmem:[%s1330_s1 + $0x1d0] sm:$0xff]  ;;  %v1035_v5 = vld [vmem:[%s1330_s1 + $0x148] sm:$0xff] }
  0x17   :  { %597 = vmatpush.bf16.msra.mxu1 %v1004_v21  ;;  %v1043_v6 = vld [vmem:[%s1330_s1 + $0x188] sm:$0xff]  ;;  %v1026_v8 = vld [vmem:[%s1330_s1 + $0x100] sm:$0xff]  ;;  %v716_v12 = vld [vmem:[%s1332_s0 + $0x10] sm:$0xf] }
  0x18   :  { %611 = vmatpush.bf16.msra.mxu2 %v1012_v22  ;;  %v1051_v7 = vld [vmem:[%s1330_s1 + $0x1c8] sm:$0xff]  ;;  %v1034_v9 = vld [vmem:[%s1330_s1 + $0x140] sm:$0xff]  ;;  %v992_v13 = vld [vmem:[%s1332_s0 + $0x2c] sm:$0xf0] }
  0x19   :  { %625 = vmatpush.bf16.msra.mxu3 %v1020_v23  ;;  %v1042_v10 = vld [vmem:[%s1330_s1 + $0x180] sm:$0xff]  ;;  %v988_v14 = vld [vmem:[%s1332_s0 + $0x14] sm:$0xf]  ;;  %v724_v16 = vld [vmem:[%s1332_s0 + $0x18] sm:$0xf]  ;;  %v717_v20 = vor.u32 %v992_v13, %v716_v12 }
  0x1a   :  { %584 = vmatpush.bf16.msra.mxu0 %v995_v24  ;;  %v1050_v11 = vld [vmem:[%s1330_s1 + $0x1c0] sm:$0xff]  ;;  %v718_v15 = vld [vmem:[%s1332_s0 + $0x30] sm:$0xf0]  ;;  %v993_v17 = vld [vmem:[%s1332_s0 + $0x34] sm:$0xf0] }
  0x1b   :  { %598 = vmatpush.bf16.msra.mxu1 %v1003_v25  ;;  %v989_v18 = vld [vmem:[%s1332_s0 + $0x1c] sm:$0xf]  ;;  %v721_v21 = vor.u32 %v988_v14, %v718_v15  ;;  %v725_v22 = vor.u32 %v993_v17, %v724_v16 }
  0x1c   :  { %612 = vmatpush.bf16.msra.mxu2 %v1011_v26  ;;  %v726_v19 = vld [vmem:[%s1332_s0 + $0x38] sm:$0xf0] }
  0x1d   :  { %626 = vmatpush.bf16.msra.mxu3 %v1019_v27  ;;  %v729_v23 = vor.u32 %v989_v18, %v726_v19 }
  0x1e   :  { %585 = vmatpush.bf16.msra.mxu0 %v994_v28  ;;  %v1063_v28 = vld [vmem:[%s1331_s2] ss:$0 sm:$0xff] }
  0x1f   :  { %599 = vmatpush.bf16.msra.mxu1 %v1002_v29 }
  0x20   :  { %613 = vmatpush.bf16.msra.mxu2 %v1010_v30 }
  0x21   :  { %627 = vmatpush.bf16.msra.mxu3 %v1018_v31  ;;  %586 = vmatmul.bf16.vlgmr.msra.gmra.mxu0 %v701_v45 }
  0x22   :  { %634 = vmatpush.bf16.msrb.mxu0 %v1033_v32  ;;  %600 = vmatmul.bf16.vlgmr.msra.gmra.mxu1 %v705_v47 }
  0x23   :  { %648 = vmatpush.bf16.msrb.mxu1 %v1041_v33  ;;  %614 = vmatmul.bf16.vlgmr.msra.gmra.mxu2 %v709_v44 }
  0x24   :  { %662 = vmatpush.bf16.msrb.mxu2 %v1049_v42  ;;  %628 = vmatmul.bf16.vlgmr.msra.gmra.mxu3 %v713_v46 }
  0x25   :  { %676 = vmatpush.bf16.msrb.mxu3 %v1057_v43 }
  0x26   :  { %635 = vmatpush.bf16.msrb.mxu0 %v1032_v48 }
  0x27   :  { %649 = vmatpush.bf16.msrb.mxu1 %v1040_v49 }
  0x28   :  { %663 = vmatpush.bf16.msrb.mxu2 %v1048_v50 }
  0x29   :  { %677 = vmatpush.bf16.msrb.mxu3 %v1056_v51 }
  0x2a   :  { %636 = vmatpush.bf16.msrb.mxu0 %v1031_v52 }
  0x2b   :  { %650 = vmatpush.bf16.msrb.mxu1 %v1039_v53 }
  0x2c   :  { %664 = vmatpush.bf16.msrb.mxu2 %v1047_v54 }
  0x2d   :  { %678 = vmatpush.bf16.msrb.mxu3 %v1055_v55 }
  0x2e   :  { %637 = vmatpush.bf16.msrb.mxu0 %v1030_v56 }
  0x2f   :  { %651 = vmatpush.bf16.msrb.mxu1 %v1038_v57 }
  0x30   :  { %665 = vmatpush.bf16.msrb.mxu2 %v1046_v58 }
  0x31   :  { %679 = vmatpush.bf16.msrb.mxu3 %v1054_v59 }
  0x32   :  { %638 = vmatpush.bf16.msrb.mxu0 %v1029_v60 }
  0x33   :  { %652 = vmatpush.bf16.msrb.mxu1 %v1037_v61 }
  0x34   :  { %666 = vmatpush.bf16.msrb.mxu2 %v1045_v62 }
  0x35   :  { %680 = vmatpush.bf16.msrb.mxu3 %v1053_v63 }
  0x36   :  { %639 = vmatpush.bf16.msrb.mxu0 %v1028_v0 }
  0x37   :  { %653 = vmatpush.bf16.msrb.mxu1 %v1036_v1 }
  0x38   :  { %667 = vmatpush.bf16.msrb.mxu2 %v1044_v2 }
  0x39   :  { %681 = vmatpush.bf16.msrb.mxu3 %v1052_v3 }
  0x3a   :  { %640 = vmatpush.bf16.msrb.mxu0 %v1027_v4 }
  0x3b   :  { %654 = vmatpush.bf16.msrb.mxu1 %v1035_v5 }
  0x3c   :  { %668 = vmatpush.bf16.msrb.mxu2 %v1043_v6 }
  0x3d   :  { %682 = vmatpush.bf16.msrb.mxu3 %v1051_v7 }
  0x3e   :  { %641 = vmatpush.bf16.msrb.mxu0 %v1026_v8 }
  0x3f   :  { %655 = vmatpush.bf16.msrb.mxu1 %v1034_v9 }
  0x40   :  { %669 = vmatpush.bf16.msrb.mxu2 %v1042_v10 }
  0x41   :  { %683 = vmatpush.bf16.msrb.mxu3 %v1050_v11  ;;  %642 = vmatmul.bf16.vlgmr.msrb.gmra.mxu0 %v717_v20 }
  0x42   :  { %656 = vmatmul.bf16.vlgmr.msrb.gmra.mxu1 %v721_v21 }
  0x43   :  { %670 = vmatmul.bf16.vlgmr.msrb.gmra.mxu2 %v725_v22 }
  0x44   :  { %684 = vmatmul.bf16.vlgmr.msrb.gmra.mxu3 %v729_v23 }
  0x9e   :  { %v587_v24 = vpop.f32.mrf.mxu0 }
  0x9f   :  { %v601_v25 = vpop.f32.mrf.mxu1  ;;  %v588_v30 = vadd.f32 %v1063_v28, %v587_v24 }
  0xa1   :  { %v602_v33 = vadd.f32 %v601_v25, %v588_v30 }
  0xa6   :  { %v615_v26 = vpop.f32.mrf.mxu2  ;;  %v589_v29 = vpop.f32.mrf.mxu0 }
  0xa7   :  { %v629_v27 = vpop.f32.mrf.mxu3  ;;  %v603_v31 = vpop.f32.mrf.mxu1  ;;  %v590_v32 = vadd.f32 %v1063_v28, %v589_v29  ;;  %v616_v38 = vadd.f32 %v615_v26, %v602_v33 }
  0xa9   :  { %v604_v36 = vadd.f32 %v603_v31, %v590_v32  ;;  %v630_v41 = vadd.f32 %v629_v27, %v616_v38 }
  0xae   :  { %v617_v34 = vpop.f32.mrf.mxu2 }
  0xaf   :  { %v631_v35 = vpop.f32.mrf.mxu3  ;;  %v618_v40 = vadd.f32 %v617_v34, %v604_v36 }
  0xb1   :  { %v632_v44 = vadd.f32 %v631_v35, %v618_v40 }
  0xbe   :  { %v643_v37 = vpop.f32.mrf.mxu0 }
  0xbf   :  { %v657_v39 = vpop.f32.mrf.mxu1  ;;  %v644_v45 = vadd.f32 %v643_v37, %v630_v41 }
  0xc1   :  { %v658_v48 = vadd.f32 %v657_v39, %v644_v45 }
  0xc6   :  { %v671_v42 = vpop.f32.mrf.mxu2  ;;  %v645_v46 = vpop.f32.mrf.mxu0 }
  0xc7   :  { %v685_v43 = vpop.f32.mrf.mxu3  ;;  %v646_v47 = vadd.f32 %v645_v46, %v632_v44  ;;  %v659_v49 = vpop.f32.mrf.mxu1  ;;  %v672_v50 = vadd.f32 %v671_v42, %v658_v48 }
  0xc9   :  { %v660_v51 = vadd.f32 %v659_v49, %v646_v47  ;;  %v686_v55 = vadd.f32 %v685_v43, %v672_v50 }
  0xce   :  { %v673_v52 = vpop.f32.mrf.mxu2 }
  0xcf   :  { %v674_v53 = vadd.f32 %v673_v52, %v660_v51  ;;  %v687_v54 = vpop.f32.mrf.mxu3 }
  0xd1   :  { %v688_v56 = vadd.f32 %v687_v54, %v674_v53 }
  0xd3   :  { %v1061_v57 = vpack.c.bf16 %v688_v56, %v686_v55 }
  0xd5   :  { %1062 = vst [vmem:[%s1333_s3] sm:$0xff] %v1061_v57  }

// kernel: _fwd.15
= control target key start
LH: loop header
LB: loop body
LE: loop exit
PB: predicated region body
PF: predicated region fallthrough
CT: control target
= control target key end

     0   :  { %s763_s12 = smov 0   ;;  %s765_s13 = smov 0   ;;  %s825_s0 = inlined_call_operand.vmem [shape: bf16[4,16,256], index: 0, kind: input, shape index: {}]   ;;  %s826_s1 = inlined_call_operand.vmem [shape: bf16[4,256,128], index: 1, kind: input, shape index: {}]   ;;  %s827_s2 = inlined_call_operand.vmem [shape: f32[1,128], index: 2, kind: input, shape index: {}]   ;;  %s828_s3 = inlined_call_operand.vmem [shape: bf16[4,16,128], index: 3, kind: output, shape index: {}]  }
   0x1   :  { %s767_s14 = smov 0  }
   0x2 LB: > { %s32_s15 = sadd.s32 1, %s737_s13  ;;  %p587_p0 = scmp.ge.s32.totalorder %s741_s14, 1  ;;  %s741_s14 = sphi %s767_s14, %s13_s14   ;;  %s737_s13 = sphi %s765_s13, %s830_s13   ;;  %s733_s12 = sphi %s763_s12, %s829_s12  }
   0x3   : > { %p34_p1 = scmp.ge.s32.totalorder %s32_s15, 4  ;;  %p191_p2 = scmp.lt.s32.totalorder %s741_s14, 5 }
   0x5   : > { %s832_s15 = smov (%p34_p1, %s32_s15), 0  ;;  %p192_p3 = pnand %p587_p0, %p191_p2 }
   0x6   : > { %p239_p4 = scmp.lt.s32.totalorder (!%p192_p3), %s733_s12, 3 }
   0x7   : > { %195 = sbr.rel (%p192_p3) target bundleno = 188 (0xbc), region = 32 }
   0xc   : > { %s834_s12 = smov (!%p239_p4, %s733_s12), 3  ;;  %v718_v24 = vld [vmem:[%s827_s2] ss:$0 sm:$0xff] }
   0xd   : > { %s669_s16 = sshll.u32 %s834_s12, 7  ;;  %s668_s20 = sshll.u32 %s834_s12, 4 }
   0xe   : > { %s787_s19 = scalar_lea.vmem %s826_s1, %s669_s16  ;;  %s247_s23 = scalar_lea.vmem %s825_s0, %s668_s20 }
   0xf   : > { %v680_v0 = vld [vmem:[%s787_s19 + $0x38] sm:$0xff]  ;;  %v679_v2 = vld [vmem:[%s787_s19 + $0x30] sm:$0xff]  ;;  %v678_v4 = vld [vmem:[%s787_s19 + $0x28] sm:$0xff]  ;;  %s670_s26 = sshll.u32 %s834_s12, 3 }
  0x10   : > { %v688_v1 = vld [vmem:[%s787_s19 + $0x78] sm:$0xff]  ;;  %417 = vmatpush.bf16.msra.mxu0 %v680_v0  ;;  %v687_v3 = vld [vmem:[%s787_s19 + $0x70] sm:$0xff]  ;;  %v686_v5 = vld [vmem:[%s787_s19 + $0x68] sm:$0xff]  ;;  %s271_s29 = scalar_lea.vmem %s828_s3, %s670_s26 }
  0x11   : > { %431 = vmatpush.bf16.msra.mxu1 %v688_v1  ;;  %v677_v6 = vld [vmem:[%s787_s19 + $0x20] sm:$0xff]  ;;  %v676_v8 = vld [vmem:[%s787_s19 + $0x18] sm:$0xff]  ;;  %v675_v10 = vld [vmem:[%s787_s19 + $0x10] sm:$0xff] }
  0x12   : > { %v685_v7 = vld [vmem:[%s787_s19 + $0x60] sm:$0xff]  ;;  %v684_v9 = vld [vmem:[%s787_s19 + $0x58] sm:$0xff]  ;;  %v683_v11 = vld [vmem:[%s787_s19 + $0x50] sm:$0xff] }
  0x13   : > { %v674_v12 = vld [vmem:[%s787_s19 + $0x8] sm:$0xff]  ;;  %v673_v14 = vld [vmem:[%s787_s19] sm:$0xff] }
  0x14   : > { %418 = vmatpush.bf16.msra.mxu0 %v679_v2  ;;  %v682_v13 = vld [vmem:[%s787_s19 + $0x48] sm:$0xff]  ;;  %v681_v15 = vld [vmem:[%s787_s19 + $0x40] sm:$0xff] }
  0x15   : > { %432 = vmatpush.bf16.msra.mxu1 %v687_v3  ;;  %v596_v16 = vld [vmem:[%s247_s23] sm:$0xf]  ;;  %v672_v17 = vld [vmem:[%s247_s23 + $0x4] sm:$0xf0]  ;;  %v671_v18 = vld [vmem:[%s247_s23 + $0x4] sm:$0xf] }
  0x16   : > { %v598_v19 = vld [vmem:[%s247_s23 + $0x8] sm:$0xf0]  ;;  %v597_v20 = vor.u32 %v672_v17, %v596_v16 }
  0x17   : > { %v601_v21 = vor.u32 %v671_v18, %v598_v19 }
  0x18   : > { %419 = vmatpush.bf16.msra.mxu0 %v678_v4 }
  0x19   : > { %433 = vmatpush.bf16.msra.mxu1 %v686_v5 }
  0x1c   : > { %420 = vmatpush.bf16.msra.mxu0 %v677_v6 }
  0x1d   : > { %434 = vmatpush.bf16.msra.mxu1 %v685_v7 }
  0x20   : > { %421 = vmatpush.bf16.msra.mxu0 %v676_v8 }
  0x21   : > { %435 = vmatpush.bf16.msra.mxu1 %v684_v9 }
  0x24   : > { %422 = vmatpush.bf16.msra.mxu0 %v675_v10 }
  0x25   : > { %436 = vmatpush.bf16.msra.mxu1 %v683_v11 }
  0x28   : > { %423 = vmatpush.bf16.msra.mxu0 %v674_v12 }
  0x29   : > { %437 = vmatpush.bf16.msra.mxu1 %v682_v13 }
  0x2c   : > { %424 = vmatpush.bf16.msra.mxu0 %v673_v14 }
  0x2d   : > { %438 = vmatpush.bf16.msra.mxu1 %v681_v15 }
  0x2f   : > { %425 = vmatmul.bf16.vlgmr.msra.gmra.mxu0 %v597_v20 }
  0x30   : > { %439 = vmatmul.bf16.vlgmr.msra.gmra.mxu1 %v601_v21 }
  0xac   : > { %v426_v22 = vpop.f32.mrf.mxu0 }
  0xad   : > { %v440_v23 = vpop.f32.mrf.mxu1  ;;  %v427_v25 = vadd.f32 %v718_v24, %v426_v22 }
  0xaf   : > { %v441_v29 = vadd.f32 %v440_v23, %v427_v25 }
  0xb4   : > { %v428_v26 = vpop.f32.mrf.mxu0 }
  0xb5   : > { %v429_v27 = vadd.f32 %v718_v24, %v428_v26  ;;  %v442_v28 = vpop.f32.mrf.mxu1 }
  0xb7   : > { %v443_v30 = vadd.f32 %v442_v28, %v429_v27 }
  0xb9   : > { %v692_v31 = vpack.c.bf16 %v443_v30, %v441_v29 }
  0xbb   : > { %693 = vst [vmem:[%s271_s29] sm:$0xff] %v692_v31  }
  0xbc PF: > { %s13_s14 = sadd.s32 1, %s741_s14   ;;  %s829_s12 = smov %s737_s13 }
  0xbd   : > { %p10_p5 = scmp.ge.s32.totalorder %s13_s14, 6   ;;  %s830_s13 = smov %s832_s15 }
  0xbf   :  { %12 = sbr.rel (!%p10_p5) target bundleno = 2 (0x2), region = 68 }

// kernel: _fwd.16
= control target key start
LH: loop header
LB: loop body
LE: loop exit
PB: predicated region body
PF: predicated region fallthrough
CT: control target
= control target key end

     0   :  { %s1021_s12 = smov 0   ;;  %s1023_s13 = smov 0   ;;  %s1099_s0 = inlined_call_operand.vmem [shape: bf16[4,16,512], index: 0, kind: input, shape index: {}]   ;;  %s1100_s1 = inlined_call_operand.vmem [shape: bf16[4,512,128], index: 1, kind: input, shape index: {}]   ;;  %s1101_s2 = inlined_call_operand.vmem [shape: f32[1,128], index: 2, kind: input, shape index: {}]   ;;  %s1102_s3 = inlined_call_operand.vmem [shape: bf16[4,16,128], index: 3, kind: output, shape index: {}]  }
   0x1   :  { %s1025_s14 = smov 0  }
   0x2 LB: > { %s32_s15 = sadd.s32 1, %s995_s13  ;;  %p755_p0 = scmp.ge.s32.totalorder %s999_s14, 1  ;;  %s999_s14 = sphi %s1025_s14, %s13_s14   ;;  %s995_s13 = sphi %s1023_s13, %s1104_s13   ;;  %s991_s12 = sphi %s1021_s12, %s1103_s12  }
   0x3   : > { %p34_p1 = scmp.ge.s32.totalorder %s32_s15, 4  ;;  %p191_p2 = scmp.lt.s32.totalorder %s999_s14, 5 }
   0x5   : > { %s1106_s15 = smov (%p34_p1, %s32_s15), 0  ;;  %p192_p3 = pnand %p755_p0, %p191_p2 }
   0x6   : > { %p239_p4 = scmp.lt.s32.totalorder (!%p192_p3), %s991_s12, 3 }
   0x7   : > { %195 = sbr.rel (%p192_p3) target bundleno = 196 (0xc4), region = 32 }
   0xc   : > { %s1108_s12 = smov (!%p239_p4, %s991_s12), 3  ;;  %v976_v45 = vld [vmem:[%s1101_s2] ss:$0 sm:$0xff] }
   0xd   : > { %s909_s16 = sshll.u32 %s1108_s12, 8  ;;  %s908_s20 = sshll.u32 %s1108_s12, 5 }
   0xe   : > { %s1045_s19 = scalar_lea.vmem %s1100_s1, %s909_s16  ;;  %s247_s23 = scalar_lea.vmem %s1099_s0, %s908_s20 }
   0xf   : > { %v922_v0 = vld [vmem:[%s1045_s19 + $0x38] sm:$0xff]  ;;  %v921_v4 = vld [vmem:[%s1045_s19 + $0x30] sm:$0xff]  ;;  %v920_v8 = vld [vmem:[%s1045_s19 + $0x28] sm:$0xff]  ;;  %s910_s26 = sshll.u32 %s1108_s12, 3 }
  0x10   : > { %v930_v1 = vld [vmem:[%s1045_s19 + $0x78] sm:$0xff]  ;;  %557 = vmatpush.bf16.msra.mxu0 %v922_v0  ;;  %v929_v5 = vld [vmem:[%s1045_s19 + $0x70] sm:$0xff]  ;;  %v928_v9 = vld [vmem:[%s1045_s19 + $0x68] sm:$0xff]  ;;  %s271_s29 = scalar_lea.vmem %s1102_s3, %s910_s26 }
  0x11   : > { %v938_v2 = vld [vmem:[%s1045_s19 + $0xb8] sm:$0xff]  ;;  %571 = vmatpush.bf16.msra.mxu1 %v930_v1  ;;  %v937_v6 = vld [vmem:[%s1045_s19 + $0xb0] sm:$0xff]  ;;  %v936_v10 = vld [vmem:[%s1045_s19 + $0xa8] sm:$0xff] }
  0x12   : > { %v946_v3 = vld [vmem:[%s1045_s19 + $0xf8] sm:$0xff]  ;;  %585 = vmatpush.bf16.msra.mxu2 %v938_v2  ;;  %v945_v7 = vld [vmem:[%s1045_s19 + $0xf0] sm:$0xff]  ;;  %v944_v11 = vld [vmem:[%s1045_s19 + $0xe8] sm:$0xff] }
  0x13   : > { %599 = vmatpush.bf16.msra.mxu3 %v946_v3  ;;  %v919_v12 = vld [vmem:[%s1045_s19 + $0x20] sm:$0xff]  ;;  %v918_v16 = vld [vmem:[%s1045_s19 + $0x18] sm:$0xff]  ;;  %v917_v20 = vld [vmem:[%s1045_s19 + $0x10] sm:$0xff] }
  0x14   : > { %558 = vmatpush.bf16.msra.mxu0 %v921_v4  ;;  %v927_v13 = vld [vmem:[%s1045_s19 + $0x60] sm:$0xff]  ;;  %v926_v17 = vld [vmem:[%s1045_s19 + $0x58] sm:$0xff]  ;;  %v925_v21 = vld [vmem:[%s1045_s19 + $0x50] sm:$0xff] }
  0x15   : > { %572 = vmatpush.bf16.msra.mxu1 %v929_v5  ;;  %v935_v14 = vld [vmem:[%s1045_s19 + $0xa0] sm:$0xff]  ;;  %v934_v18 = vld [vmem:[%s1045_s19 + $0x98] sm:$0xff]  ;;  %v933_v22 = vld [vmem:[%s1045_s19 + $0x90] sm:$0xff] }
  0x16   : > { %586 = vmatpush.bf16.msra.mxu2 %v937_v6  ;;  %v943_v15 = vld [vmem:[%s1045_s19 + $0xe0] sm:$0xff]  ;;  %v942_v19 = vld [vmem:[%s1045_s19 + $0xd8] sm:$0xff]  ;;  %v941_v23 = vld [vmem:[%s1045_s19 + $0xd0] sm:$0xff] }
  0x17   : > { %600 = vmatpush.bf16.msra.mxu3 %v945_v7  ;;  %v916_v24 = vld [vmem:[%s1045_s19 + $0x8] sm:$0xff]  ;;  %v915_v28 = vld [vmem:[%s1045_s19] sm:$0xff]  ;;  %v913_v33 = vld [vmem:[%s247_s23 + $0xc] sm:$0xf0] }
  0x18   : > { %559 = vmatpush.bf16.msra.mxu0 %v920_v8  ;;  %v924_v25 = vld [vmem:[%s1045_s19 + $0x48] sm:$0xff]  ;;  %v923_v29 = vld [vmem:[%s1045_s19 + $0x40] sm:$0xff]  ;;  %v766_v35 = vld [vmem:[%s247_s23 + $0x10] sm:$0xf0] }
  0x19   : > { %573 = vmatpush.bf16.msra.mxu1 %v928_v9  ;;  %v932_v26 = vld [vmem:[%s1045_s19 + $0x88] sm:$0xff]  ;;  %v931_v30 = vld [vmem:[%s1045_s19 + $0x80] sm:$0xff]  ;;  %v914_v37 = vld [vmem:[%s247_s23 + $0x14] sm:$0xf0] }
  0x1a   : > { %587 = vmatpush.bf16.msra.mxu2 %v936_v10  ;;  %v940_v27 = vld [vmem:[%s1045_s19 + $0xc8] sm:$0xff]  ;;  %v939_v31 = vld [vmem:[%s1045_s19 + $0xc0] sm:$0xff]  ;;  %v774_v39 = vld [vmem:[%s247_s23 + $0x18] sm:$0xf0] }
  0x1b   : > { %601 = vmatpush.bf16.msra.mxu3 %v944_v11  ;;  %v764_v32 = vld [vmem:[%s247_s23] sm:$0xf]  ;;  %v911_v34 = vld [vmem:[%s247_s23 + $0x4] sm:$0xf]  ;;  %v772_v36 = vld [vmem:[%s247_s23 + $0x8] sm:$0xf] }
  0x1c   : > { %560 = vmatpush.bf16.msra.mxu0 %v919_v12  ;;  %v912_v38 = vld [vmem:[%s247_s23 + $0xc] sm:$0xf]  ;;  %v765_v40 = vor.u32 %v913_v33, %v764_v32  ;;  %v769_v41 = vor.u32 %v911_v34, %v766_v35  ;;  %v773_v42 = vor.u32 %v914_v37, %v772_v36 }
  0x1d   : > { %574 = vmatpush.bf16.msra.mxu1 %v927_v13  ;;  %v777_v43 = vor.u32 %v912_v38, %v774_v39 }
  0x1e   : > { %588 = vmatpush.bf16.msra.mxu2 %v935_v14 }
  0x1f   : > { %602 = vmatpush.bf16.msra.mxu3 %v943_v15 }
  0x20   : > { %561 = vmatpush.bf16.msra.mxu0 %v918_v16 }
  0x21   : > { %575 = vmatpush.bf16.msra.mxu1 %v926_v17 }
  0x22   : > { %589 = vmatpush.bf16.msra.mxu2 %v934_v18 }
  0x23   : > { %603 = vmatpush.bf16.msra.mxu3 %v942_v19 }
  0x24   : > { %562 = vmatpush.bf16.msra.mxu0 %v917_v20 }
  0x25   : > { %576 = vmatpush.bf16.msra.mxu1 %v925_v21 }
  0x26   : > { %590 = vmatpush.bf16.msra.mxu2 %v933_v22 }
  0x27   : > { %604 = vmatpush.bf16.msra.mxu3 %v941_v23 }
  0x28   : > { %563 = vmatpush.bf16.msra.mxu0 %v916_v24 }
  0x29   : > { %577 = vmatpush.bf16.msra.mxu1 %v924_v25 }
  0x2a   : > { %591 = vmatpush.bf16.msra.mxu2 %v932_v26 }
  0x2b   : > { %605 = vmatpush.bf16.msra.mxu3 %v940_v27 }
  0x2c   : > { %564 = vmatpush.bf16.msra.mxu0 %v915_v28 }
  0x2d   : > { %578 = vmatpush.bf16.msra.mxu1 %v923_v29 }
  0x2e   : > { %592 = vmatpush.bf16.msra.mxu2 %v931_v30 }
  0x2f   : > { %606 = vmatpush.bf16.msra.mxu3 %v939_v31  ;;  %565 = vmatmul.bf16.vlgmr.msra.gmra.mxu0 %v765_v40 }
  0x30   : > { %579 = vmatmul.bf16.vlgmr.msra.gmra.mxu1 %v769_v41 }
  0x31   : > { %593 = vmatmul.bf16.vlgmr.msra.gmra.mxu2 %v773_v42 }
  0x32   : > { %607 = vmatmul.bf16.vlgmr.msra.gmra.mxu3 %v777_v43 }
  0xac   : > { %v566_v44 = vpop.f32.mrf.mxu0 }
  0xad   : > { %v580_v46 = vpop.f32.mrf.mxu1  ;;  %v567_v47 = vadd.f32 %v976_v45, %v566_v44 }
  0xaf   : > { %v581_v51 = vadd.f32 %v580_v46, %v567_v47 }
  0xb4   : > { %v594_v48 = vpop.f32.mrf.mxu2  ;;  %v568_v50 = vpop.f32.mrf.mxu0 }
  0xb5   : > { %v608_v49 = vpop.f32.mrf.mxu3  ;;  %v569_v52 = vadd.f32 %v976_v45, %v568_v50  ;;  %v582_v53 = vpop.f32.mrf.mxu1  ;;  %v595_v54 = vadd.f32 %v594_v48, %v581_v51 }
  0xb7   : > { %v583_v55 = vadd.f32 %v582_v53, %v569_v52  ;;  %v609_v59 = vadd.f32 %v608_v49, %v595_v54 }
  0xbc   : > { %v596_v56 = vpop.f32.mrf.mxu2 }
  0xbd   : > { %v597_v57 = vadd.f32 %v596_v56, %v583_v55  ;;  %v610_v58 = vpop.f32.mrf.mxu3 }
  0xbf   : > { %v611_v60 = vadd.f32 %v610_v58, %v597_v57 }
  0xc1   : > { %v950_v61 = vpack.c.bf16 %v611_v60, %v609_v59 }
  0xc3   : > { %951 = vst [vmem:[%s271_s29] sm:$0xff] %v950_v61  }
  0xc4 PF: > { %s13_s14 = sadd.s32 1, %s999_s14   ;;  %s1103_s12 = smov %s995_s13 }
  0xc5   : > { %p10_p5 = scmp.ge.s32.totalorder %s13_s14, 6   ;;  %s1104_s13 = smov %s1106_s15 }
  0xc7   :  { %12 = sbr.rel (!%p10_p5) target bundleno = 2 (0x2), region = 68 }

// kernel: _fwd.17
= control target key start
LH: loop header
LB: loop body
LE: loop exit
PB: predicated region body
PF: predicated region fallthrough
CT: control target
= control target key end

     0   :  { %s821_s12 = smov 0   ;;  %s823_s13 = smov 0   ;;  %s883_s0 = inlined_call_operand.vmem [shape: bf16[4,32,256], index: 0, kind: input, shape index: {}]   ;;  %s884_s1 = inlined_call_operand.vmem [shape: bf16[4,256,128], index: 1, kind: input, shape index: {}]   ;;  %s885_s2 = inlined_call_operand.vmem [shape: f32[1,128], index: 2, kind: input, shape index: {}]   ;;  %s886_s3 = inlined_call_operand.vmem [shape: bf16[4,32,128], index: 3, kind: output, shape index: {}]  }
   0x1   :  { %s825_s14 = smov 0  }
   0x2 LB: > { %s32_s15 = sadd.s32 1, %s795_s13  ;;  %p613_p0 = scmp.ge.s32.totalorder %s799_s14, 1  ;;  %s799_s14 = sphi %s825_s14, %s13_s14   ;;  %s795_s13 = sphi %s823_s13, %s888_s13   ;;  %s791_s12 = sphi %s821_s12, %s887_s12  }
   0x3   : > { %p34_p1 = scmp.ge.s32.totalorder %s32_s15, 4  ;;  %p191_p2 = scmp.lt.s32.totalorder %s799_s14, 5 }
   0x5   : > { %s890_s15 = smov (%p34_p1, %s32_s15), 0  ;;  %p192_p3 = pnand %p613_p0, %p191_p2 }
   0x6   : > { %p239_p4 = scmp.lt.s32.totalorder (!%p192_p3), %s791_s12, 3 }
   0x7   : > { %195 = sbr.rel (%p192_p3) target bundleno = 194 (0xc2), region = 32 }
   0xc   : > { %s892_s12 = smov (!%p239_p4, %s791_s12), 3  ;;  %v776_v30 = vld [vmem:[%s885_s2] ss:$0 sm:$0xff] }
   0xd   : > { %s703_s16 = sshll.u32 %s892_s12, 7  ;;  %s702_s20 = sshll.u32 %s892_s12, 5 }
   0xe   : > { %s845_s19 = scalar_lea.vmem %s884_s1, %s703_s16  ;;  %s247_s23 = scalar_lea.vmem %s883_s0, %s702_s20 }
   0xf   : > { %v716_v0 = vld [vmem:[%s845_s19 + $0x38] sm:$0xff]  ;;  %v715_v2 = vld [vmem:[%s845_s19 + $0x30] sm:$0xff]  ;;  %v714_v4 = vld [vmem:[%s845_s19 + $0x28] sm:$0xff]  ;;  %s704_s26 = sshll.u32 %s892_s12, 4 }
  0x10   : > { %v724_v1 = vld [vmem:[%s845_s19 + $0x78] sm:$0xff]  ;;  %429 = vmatpush.bf16.msra.mxu0 %v716_v0  ;;  %736 = vmatpush.bf16.msra.mxu2 %v716_v0  ;;  %v723_v3 = vld [vmem:[%s845_s19 + $0x70] sm:$0xff]  ;;  %v722_v5 = vld [vmem:[%s845_s19 + $0x68] sm:$0xff]  ;;  %s271_s29 = scalar_lea.vmem %s886_s3, %s704_s26 }
  0x11   : > { %448 = vmatpush.bf16.msra.mxu1 %v724_v1  ;;  %744 = vmatpush.bf16.msra.mxu3 %v724_v1  ;;  %v713_v6 = vld [vmem:[%s845_s19 + $0x20] sm:$0xff]  ;;  %v712_v8 = vld [vmem:[%s845_s19 + $0x18] sm:$0xff]  ;;  %v711_v10 = vld [vmem:[%s845_s19 + $0x10] sm:$0xff] }
  0x12   : > { %v721_v7 = vld [vmem:[%s845_s19 + $0x60] sm:$0xff]  ;;  %v720_v9 = vld [vmem:[%s845_s19 + $0x58] sm:$0xff]  ;;  %v719_v11 = vld [vmem:[%s845_s19 + $0x50] sm:$0xff] }
  0x13   : > { %v710_v12 = vld [vmem:[%s845_s19 + $0x8] sm:$0xff]  ;;  %v709_v14 = vld [vmem:[%s845_s19] sm:$0xff]  ;;  %v630_v18 = vld [vmem:[%s247_s23 + $0x10] sm:$0xf] }
  0x14   : > { %430 = vmatpush.bf16.msra.mxu0 %v715_v2  ;;  %737 = vmatpush.bf16.msra.mxu2 %v715_v2  ;;  %v718_v13 = vld [vmem:[%s845_s19 + $0x48] sm:$0xff]  ;;  %v717_v15 = vld [vmem:[%s845_s19 + $0x40] sm:$0xff]  ;;  %v708_v19 = vld [vmem:[%s247_s23 + $0x14] sm:$0xf0] }
  0x15   : > { %449 = vmatpush.bf16.msra.mxu1 %v723_v3  ;;  %745 = vmatpush.bf16.msra.mxu3 %v723_v3  ;;  %v622_v16 = vld [vmem:[%s247_s23] sm:$0xf]  ;;  %v706_v17 = vld [vmem:[%s247_s23 + $0x4] sm:$0xf0]  ;;  %v705_v20 = vld [vmem:[%s247_s23 + $0x4] sm:$0xf]  ;;  %v631_v25 = vor.u32 %v708_v19, %v630_v18 }
  0x16   : > { %v624_v21 = vld [vmem:[%s247_s23 + $0x8] sm:$0xf0]  ;;  %v707_v22 = vld [vmem:[%s247_s23 + $0x14] sm:$0xf]  ;;  %v632_v23 = vld [vmem:[%s247_s23 + $0x18] sm:$0xf0]  ;;  %v623_v24 = vor.u32 %v706_v17, %v622_v16 }
  0x17   : > { %v627_v26 = vor.u32 %v705_v20, %v624_v21  ;;  %v635_v27 = vor.u32 %v707_v22, %v632_v23 }
  0x18   : > { %431 = vmatpush.bf16.msra.mxu0 %v714_v4  ;;  %738 = vmatpush.bf16.msra.mxu2 %v714_v4 }
  0x19   : > { %450 = vmatpush.bf16.msra.mxu1 %v722_v5  ;;  %746 = vmatpush.bf16.msra.mxu3 %v722_v5 }
  0x1c   : > { %432 = vmatpush.bf16.msra.mxu0 %v713_v6  ;;  %739 = vmatpush.bf16.msra.mxu2 %v713_v6 }
  0x1d   : > { %451 = vmatpush.bf16.msra.mxu1 %v721_v7  ;;  %747 = vmatpush.bf16.msra.mxu3 %v721_v7 }
  0x20   : > { %433 = vmatpush.bf16.msra.mxu0 %v712_v8  ;;  %740 = vmatpush.bf16.msra.mxu2 %v712_v8 }
  0x21   : > { %452 = vmatpush.bf16.msra.mxu1 %v720_v9  ;;  %748 = vmatpush.bf16.msra.mxu3 %v720_v9 }
  0x24   : > { %434 = vmatpush.bf16.msra.mxu0 %v711_v10  ;;  %741 = vmatpush.bf16.msra.mxu2 %v711_v10 }
  0x25   : > { %453 = vmatpush.bf16.msra.mxu1 %v719_v11  ;;  %749 = vmatpush.bf16.msra.mxu3 %v719_v11 }
  0x28   : > { %435 = vmatpush.bf16.msra.mxu0 %v710_v12  ;;  %742 = vmatpush.bf16.msra.mxu2 %v710_v12 }
  0x29   : > { %454 = vmatpush.bf16.msra.mxu1 %v718_v13  ;;  %750 = vmatpush.bf16.msra.mxu3 %v718_v13 }
  0x2c   : > { %436 = vmatpush.bf16.msra.mxu0 %v709_v14  ;;  %743 = vmatpush.bf16.msra.mxu2 %v709_v14 }
  0x2d   : > { %455 = vmatpush.bf16.msra.mxu1 %v717_v15  ;;  %751 = vmatpush.bf16.msra.mxu3 %v717_v15 }
  0x2f   : > { %437 = vmatmul.bf16.vlgmr.msra.gmra.mxu0 %v623_v24  ;;  %442 = vmatmul.bf16.vlgmr.msra.gmra.mxu2 %v631_v25 }
  0x30   : > { %456 = vmatmul.bf16.vlgmr.msra.gmra.mxu1 %v627_v26  ;;  %461 = vmatmul.bf16.vlgmr.msra.gmra.mxu3 %v635_v27 }
  0xac   : > { %v438_v28 = vpop.f32.mrf.mxu0 }
  0xad   : > { %v457_v29 = vpop.f32.mrf.mxu1  ;;  %v439_v32 = vadd.f32 %v776_v30, %v438_v28 }
  0xaf   : > { %v458_v37 = vadd.f32 %v457_v29, %v439_v32 }
  0xb2   : > { %v443_v31 = vpop.f32.mrf.mxu2 }
  0xb3   : > { %v462_v33 = vpop.f32.mrf.mxu3  ;;  %v444_v39 = vadd.f32 %v776_v30, %v443_v31 }
  0xb4   : > { %v440_v34 = vpop.f32.mrf.mxu0 }
  0xb5   : > { %v441_v35 = vadd.f32 %v776_v30, %v440_v34  ;;  %v459_v36 = vpop.f32.mrf.mxu1  ;;  %v463_v44 = vadd.f32 %v462_v33, %v444_v39 }
  0xb7   : > { %v460_v38 = vadd.f32 %v459_v36, %v441_v35 }
  0xb9   : > { %v728_v40 = vpack.c.bf16 %v460_v38, %v458_v37 }
  0xba   : > { %v445_v41 = vpop.f32.mrf.mxu2 }
  0xbb   : > { %729 = vst [vmem:[%s271_s29] sm:$0xff] %v728_v40   ;;  %v446_v42 = vadd.f32 %v776_v30, %v445_v41  ;;  %v464_v43 = vpop.f32.mrf.mxu3 }
  0xbd   : > { %v465_v45 = vadd.f32 %v464_v43, %v446_v42 }
  0xbf   : > { %v733_v46 = vpack.c.bf16 %v465_v45, %v463_v44 }
  0xc1   : > { %735 = vst [vmem:[%s271_s29 + $0x8] sm:$0xff] %v733_v46  }
  0xc2 PF: > { %s13_s14 = sadd.s32 1, %s799_s14   ;;  %s887_s12 = smov %s795_s13 }
  0xc3   : > { %p10_p5 = scmp.ge.s32.totalorder %s13_s14, 6   ;;  %s888_s13 = smov %s890_s15 }
  0xc5   :  { %12 = sbr.rel (!%p10_p5) target bundleno = 2 (0x2), region = 68 }

// kernel: _fwd.18
= control target key start
LH: loop header
LB: loop body
LE: loop exit
PB: predicated region body
PF: predicated region fallthrough
CT: control target
= control target key end

     0   :  { %s850_s12 = smov 0   ;;  %s852_s13 = smov 0   ;;  %s914_s0 = inlined_call_operand.vmem [shape: bf16[4,128,128], index: 0, kind: input, shape index: {}]   ;;  %s915_s1 = inlined_call_operand.vmem [shape: bf16[4,128,128], index: 1, kind: input, shape index: {}]   ;;  %s916_s2 = inlined_call_operand.vmem [shape: f32[1,128], index: 2, kind: input, shape index: {}]   ;;  %s917_s3 = inlined_call_operand.vmem [shape: bf16[4,128,128], index: 3, kind: output, shape index: {}]  }
   0x1   :  { %s854_s14 = smov 0  }
   0x2 LB: > { %s32_s15 = sadd.s32 1, %s824_s13  ;;  %p618_p0 = scmp.ge.s32.totalorder %s828_s14, 1  ;;  %s828_s14 = sphi %s854_s14, %s13_s14   ;;  %s824_s13 = sphi %s852_s13, %s919_s13   ;;  %s820_s12 = sphi %s850_s12, %s918_s12  }
   0x3   : > { %p34_p1 = scmp.ge.s32.totalorder %s32_s15, 4  ;;  %p190_p2 = scmp.lt.s32.totalorder %s828_s14, 5 }
   0x5   : > { %s921_s15 = smov (%p34_p1, %s32_s15), 0  ;;  %p191_p3 = pnand %p618_p0, %p190_p2 }
   0x6   : > { %p237_p4 = scmp.lt.s32.totalorder (!%p191_p3), %s820_s12, 3 }
   0x7   : > { %194 = sbr.rel (%p191_p3) target bundleno = 210 (0xd2), region = 32 }
   0xc   : > { %s923_s12 = smov (!%p237_p4, %s820_s12), 3  ;;  %v805_v18 = vld [vmem:[%s916_s2] ss:$0 sm:$0xff] }
   0xd   : > { %s868_s16 = sshll.u32 %s923_s12, 6 }
   0xe   : > { %s874_s19 = scalar_lea.vmem %s915_s1, %s868_s16  ;;  %s244_s22 = scalar_lea.vmem %s914_s0, %s868_s16 }
   0xf   : > { %v709_v0 = vld [vmem:[%s874_s19 + $0x38] sm:$0xff]  ;;  %v708_v1 = vld [vmem:[%s874_s19 + $0x30] sm:$0xff]  ;;  %v707_v2 = vld [vmem:[%s874_s19 + $0x28] sm:$0xff]  ;;  %s895_s27 = scalar_lea.vmem %s917_s3, %s868_s16 }
  0x10   : > { %402 = vmatpush.bf16.msra.mxu0 %v709_v0  ;;  %757 = vmatpush.bf16.msra.mxu1 %v709_v0  ;;  %v706_v3 = vld [vmem:[%s874_s19 + $0x20] sm:$0xff]  ;;  %v705_v4 = vld [vmem:[%s874_s19 + $0x18] sm:$0xff]  ;;  %v704_v5 = vld [vmem:[%s874_s19 + $0x10] sm:$0xff] }
  0x11   : > { %758 = vmatpush.bf16.msra.mxu2 %v709_v0  ;;  %759 = vmatpush.bf16.msra.mxu3 %v709_v0  ;;  %v703_v6 = vld [vmem:[%s874_s19 + $0x8] sm:$0xff]  ;;  %v702_v7 = vld [vmem:[%s874_s19] sm:$0xff]  ;;  %v696_v9 = vld [vmem:[%s244_s22 + $0x10] sm:$0xff] }
  0x12   : > { %v694_v8 = vld [vmem:[%s244_s22] sm:$0xff]  ;;  %v700_v11 = vld [vmem:[%s244_s22 + $0x30] sm:$0xff]  ;;  %v695_v12 = vld [vmem:[%s244_s22 + $0x8] sm:$0xff] }
  0x13   : > { %v698_v10 = vld [vmem:[%s244_s22 + $0x20] sm:$0xff]  ;;  %v697_v13 = vld [vmem:[%s244_s22 + $0x18] sm:$0xff]  ;;  %v699_v14 = vld [vmem:[%s244_s22 + $0x28] sm:$0xff] }
  0x14   : > { %403 = vmatpush.bf16.msra.mxu0 %v708_v1  ;;  %760 = vmatpush.bf16.msra.mxu1 %v708_v1  ;;  %v701_v15 = vld [vmem:[%s244_s22 + $0x38] sm:$0xff] }
  0x15   : > { %761 = vmatpush.bf16.msra.mxu2 %v708_v1  ;;  %762 = vmatpush.bf16.msra.mxu3 %v708_v1 }
  0x18   : > { %404 = vmatpush.bf16.msra.mxu0 %v707_v2  ;;  %763 = vmatpush.bf16.msra.mxu1 %v707_v2 }
  0x19   : > { %764 = vmatpush.bf16.msra.mxu2 %v707_v2  ;;  %765 = vmatpush.bf16.msra.mxu3 %v707_v2 }
  0x1c   : > { %405 = vmatpush.bf16.msra.mxu0 %v706_v3  ;;  %766 = vmatpush.bf16.msra.mxu1 %v706_v3 }
  0x1d   : > { %767 = vmatpush.bf16.msra.mxu2 %v706_v3  ;;  %768 = vmatpush.bf16.msra.mxu3 %v706_v3 }
  0x20   : > { %406 = vmatpush.bf16.msra.mxu0 %v705_v4  ;;  %769 = vmatpush.bf16.msra.mxu1 %v705_v4 }
  0x21   : > { %770 = vmatpush.bf16.msra.mxu2 %v705_v4  ;;  %771 = vmatpush.bf16.msra.mxu3 %v705_v4 }
  0x24   : > { %407 = vmatpush.bf16.msra.mxu0 %v704_v5  ;;  %772 = vmatpush.bf16.msra.mxu1 %v704_v5 }
  0x25   : > { %773 = vmatpush.bf16.msra.mxu2 %v704_v5  ;;  %774 = vmatpush.bf16.msra.mxu3 %v704_v5 }
  0x28   : > { %408 = vmatpush.bf16.msra.mxu0 %v703_v6  ;;  %775 = vmatpush.bf16.msra.mxu1 %v703_v6 }
  0x29   : > { %776 = vmatpush.bf16.msra.mxu2 %v703_v6  ;;  %777 = vmatpush.bf16.msra.mxu3 %v703_v6 }
  0x2c   : > { %409 = vmatpush.bf16.msra.mxu0 %v702_v7  ;;  %778 = vmatpush.bf16.msra.mxu1 %v702_v7 }
  0x2d   : > { %779 = vmatpush.bf16.msra.mxu2 %v702_v7  ;;  %780 = vmatpush.bf16.msra.mxu3 %v702_v7 }
  0x2f   : > { %410 = vmatmul.bf16.vlgmr.msra.gmra.mxu0 %v694_v8  ;;  %420 = vmatmul.bf16.vlgmr.msra.gmra.mxu1 %v696_v9 }
  0x30   : > { %430 = vmatmul.bf16.vlgmr.msra.gmra.mxu2 %v698_v10  ;;  %440 = vmatmul.bf16.vlgmr.msra.gmra.mxu3 %v700_v11 }
  0x3f   : > { %415 = vmatmul.bf16.gmra.mxu0 %v695_v12  ;;  %425 = vmatmul.bf16.gmra.mxu1 %v697_v13 }
  0x40   : > { %435 = vmatmul.bf16.gmra.mxu2 %v699_v14  ;;  %445 = vmatmul.bf16.gmra.mxu3 %v701_v15 }
  0xac   : > { %v411_v16 = vpop.f32.mrf.mxu0  ;;  %v421_v17 = vpop.f32.mrf.mxu1 }
  0xad   : > { %v412_v23 = vadd.f32 %v805_v18, %v411_v16  ;;  %v422_v24 = vadd.f32 %v805_v18, %v421_v17 }
  0xb3   : > { %v431_v19 = vpop.f32.mrf.mxu2  ;;  %v441_v20 = vpop.f32.mrf.mxu3 }
  0xb4   : > { %v413_v21 = vpop.f32.mrf.mxu0  ;;  %v423_v22 = vpop.f32.mrf.mxu1  ;;  %v432_v31 = vadd.f32 %v805_v18, %v431_v19  ;;  %v442_v32 = vadd.f32 %v805_v18, %v441_v20 }
  0xb5   : > { %v414_v25 = vadd.f32 %v805_v18, %v413_v21  ;;  %v424_v26 = vadd.f32 %v805_v18, %v423_v22 }
  0xb7   : > { %v713_v27 = vpack.c.bf16 %v414_v25, %v412_v23  ;;  %v723_v28 = vpack.c.bf16 %v424_v26, %v422_v24 }
  0xb9   : > { %714 = vst [vmem:[%s895_s27] sm:$0xff] %v713_v27  }
  0xba   : > { %751 = vst [vmem:[%s895_s27 + $0x10] sm:$0xff] %v723_v28  }
  0xbb   : > { %v433_v29 = vpop.f32.mrf.mxu2  ;;  %v443_v30 = vpop.f32.mrf.mxu3 }
  0xbc   : > { %v434_v33 = vadd.f32 %v805_v18, %v433_v29  ;;  %v444_v34 = vadd.f32 %v805_v18, %v443_v30  ;;  %v416_v35 = vpop.f32.mrf.mxu0  ;;  %v426_v36 = vpop.f32.mrf.mxu1 }
  0xbd   : > { %v417_v43 = vadd.f32 %v805_v18, %v416_v35  ;;  %v427_v44 = vadd.f32 %v805_v18, %v426_v36 }
  0xbe   : > { %v733_v37 = vpack.c.bf16 %v434_v33, %v432_v31  ;;  %v743_v38 = vpack.c.bf16 %v444_v34, %v442_v32 }
  0xc0   : > { %753 = vst [vmem:[%s895_s27 + $0x20] sm:$0xff] %v733_v37  }
  0xc1   : > { %755 = vst [vmem:[%s895_s27 + $0x30] sm:$0xff] %v743_v38  }
  0xc3   : > { %v436_v39 = vpop.f32.mrf.mxu2  ;;  %v446_v40 = vpop.f32.mrf.mxu3 }
  0xc4   : > { %v418_v41 = vpop.f32.mrf.mxu0  ;;  %v428_v42 = vpop.f32.mrf.mxu1  ;;  %v437_v51 = vadd.f32 %v805_v18, %v436_v39  ;;  %v447_v52 = vadd.f32 %v805_v18, %v446_v40 }
  0xc5   : > { %v419_v45 = vadd.f32 %v805_v18, %v418_v41  ;;  %v429_v46 = vadd.f32 %v805_v18, %v428_v42 }
  0xc7   : > { %v718_v47 = vpack.c.bf16 %v419_v45, %v417_v43  ;;  %v728_v48 = vpack.c.bf16 %v429_v46, %v427_v44 }
  0xc9   : > { %750 = vst [vmem:[%s895_s27 + $0x8] sm:$0xff] %v718_v47  }
  0xca   : > { %752 = vst [vmem:[%s895_s27 + $0x18] sm:$0xff] %v728_v48  }
  0xcb   : > { %v438_v49 = vpop.f32.mrf.mxu2  ;;  %v448_v50 = vpop.f32.mrf.mxu3 }
  0xcc   : > { %v439_v53 = vadd.f32 %v805_v18, %v438_v49  ;;  %v449_v54 = vadd.f32 %v805_v18, %v448_v50 }
  0xce   : > { %v738_v55 = vpack.c.bf16 %v439_v53, %v437_v51  ;;  %v748_v56 = vpack.c.bf16 %v449_v54, %v447_v52 }
  0xd0   : > { %754 = vst [vmem:[%s895_s27 + $0x28] sm:$0xff] %v738_v55  }
  0xd1   : > { %756 = vst [vmem:[%s895_s27 + $0x38] sm:$0xff] %v748_v56  }
  0xd2 PF: > { %s13_s14 = sadd.s32 1, %s828_s14   ;;  %s918_s12 = smov %s824_s13 }
  0xd3   : > { %p10_p5 = scmp.ge.s32.totalorder %s13_s14, 6   ;;  %s919_s13 = smov %s921_s15 }
  0xd5   :  { %12 = sbr.rel (!%p10_p5) target bundleno = 2 (0x2), region = 68 }

// kernel: _fwd.19
= control target key start
LH: loop header
LB: loop body
LE: loop exit
PB: predicated region body
PF: predicated region fallthrough
CT: control target
= control target key end

     0   :  { %s1714_s12 = smov 0   ;;  %s1716_s13 = smov 0   ;;  %s1905_s0 = inlined_call_operand.vmem [shape: bf16[4,512,128], index: 0, kind: input, shape index: {}]   ;;  %s1906_s1 = inlined_call_operand.vmem [shape: bf16[4,128,128], index: 1, kind: input, shape index: {}]   ;;  %s1907_s2 = inlined_call_operand.vmem [shape: f32[1,128], index: 2, kind: input, shape index: {}]   ;;  %s1908_s3 = inlined_call_operand.vmem [shape: bf16[4,512,128], index: 3, kind: output, shape index: {}]  }
   0x1   :  { %s1718_s14 = smov 0  }
   0x2 LB: > { %s32_s15 = sadd.s32 1, %s1688_s13  ;;  %p1090_p0 = scmp.ge.s32.totalorder %s1692_s14, 1  ;;  %s1692_s14 = sphi %s1718_s14, %s13_s14   ;;  %s1688_s13 = sphi %s1716_s13, %s1910_s13   ;;  %s1684_s12 = sphi %s1714_s12, %s1909_s12  }
   0x3   : > { %p34_p1 = scmp.ge.s32.totalorder %s32_s15, 4  ;;  %p190_p2 = scmp.lt.s32.totalorder %s1692_s14, 5 }
   0x5   : > { %s1912_s15 = smov (%p34_p1, %s32_s15), 0  ;;  %p191_p3 = pnand %p1090_p0, %p190_p2 }
   0x6   : > { %p237_p4 = scmp.lt.s32.totalorder (!%p191_p3), %s1684_s12, 3 }
   0x7   : > { %194 = sbr.rel (%p191_p3) target bundleno = 313 (0x139), region = 32 }
   0xc   : > { %s1914_s12 = smov (!%p237_p4, %s1684_s12), 3  ;;  %v1791_v42 = vld [vmem:[%s1907_s2] ss:$0 sm:$0xff] }
   0xd   : > { %s1260_s16 = sshll.u32 %s1914_s12, 6  ;;  %s1259_s20 = sshll.u32 %s1914_s12, 8 }
   0xe   : > { %s1738_s19 = scalar_lea.vmem %s1906_s1, %s1260_s16  ;;  %s1753_s23 = scalar_lea.vmem %s1905_s0, %s1259_s20 }
   0xf   : > { %v1301_v0 = vld [vmem:[%s1738_s19 + $0x38] sm:$0xff]  ;;  %v1300_v1 = vld [vmem:[%s1738_s19 + $0x30] sm:$0xff]  ;;  %v1299_v2 = vld [vmem:[%s1738_s19 + $0x28] sm:$0xff]  ;;  %s1806_s28 = scalar_lea.vmem %s1908_s3, %s1259_s20 }
  0x10   : > { %594 = vmatpush.bf16.msra.mxu0 %v1301_v0  ;;  %1493 = vmatpush.bf16.msra.mxu1 %v1301_v0  ;;  %v1298_v3 = vld [vmem:[%s1738_s19 + $0x20] sm:$0xff]  ;;  %v1297_v4 = vld [vmem:[%s1738_s19 + $0x18] sm:$0xff]  ;;  %v1296_v5 = vld [vmem:[%s1738_s19 + $0x10] sm:$0xff] }
  0x11   : > { %1494 = vmatpush.bf16.msra.mxu2 %v1301_v0  ;;  %1495 = vmatpush.bf16.msra.mxu3 %v1301_v0  ;;  %v1295_v6 = vld [vmem:[%s1738_s19 + $0x8] sm:$0xff]  ;;  %v1294_v7 = vld [vmem:[%s1738_s19] sm:$0xff]  ;;  %v1264_v16 = vld [vmem:[%s1753_s23 + $0x10] sm:$0xff] }
  0x12   : > { %v1262_v8 = vld [vmem:[%s1753_s23] sm:$0xff]  ;;  %v1263_v12 = vld [vmem:[%s1753_s23 + $0x8] sm:$0xff]  ;;  %v1272_v17 = vld [vmem:[%s1753_s23 + $0x50] sm:$0xff] }
  0x13   : > { %v1270_v9 = vld [vmem:[%s1753_s23 + $0x40] sm:$0xff]  ;;  %v1271_v13 = vld [vmem:[%s1753_s23 + $0x48] sm:$0xff]  ;;  %v1280_v18 = vld [vmem:[%s1753_s23 + $0x90] sm:$0xff] }
  0x14   : > { %595 = vmatpush.bf16.msra.mxu0 %v1300_v1  ;;  %1496 = vmatpush.bf16.msra.mxu1 %v1300_v1  ;;  %v1278_v10 = vld [vmem:[%s1753_s23 + $0x80] sm:$0xff]  ;;  %v1279_v14 = vld [vmem:[%s1753_s23 + $0x88] sm:$0xff]  ;;  %v1288_v19 = vld [vmem:[%s1753_s23 + $0xd0] sm:$0xff] }
  0x15   : > { %1497 = vmatpush.bf16.msra.mxu2 %v1300_v1  ;;  %1498 = vmatpush.bf16.msra.mxu3 %v1300_v1  ;;  %v1286_v11 = vld [vmem:[%s1753_s23 + $0xc0] sm:$0xff]  ;;  %v1287_v15 = vld [vmem:[%s1753_s23 + $0xc8] sm:$0xff]  ;;  %v1265_v20 = vld [vmem:[%s1753_s23 + $0x18] sm:$0xff] }
  0x16   : > { %v1273_v21 = vld [vmem:[%s1753_s23 + $0x58] sm:$0xff]  ;;  %v1266_v24 = vld [vmem:[%s1753_s23 + $0x20] sm:$0xff]  ;;  %v1267_v28 = vld [vmem:[%s1753_s23 + $0x28] sm:$0xff] }
  0x17   : > { %v1281_v22 = vld [vmem:[%s1753_s23 + $0x98] sm:$0xff]  ;;  %v1274_v25 = vld [vmem:[%s1753_s23 + $0x60] sm:$0xff]  ;;  %v1275_v29 = vld [vmem:[%s1753_s23 + $0x68] sm:$0xff] }
  0x18   : > { %596 = vmatpush.bf16.msra.mxu0 %v1299_v2  ;;  %1499 = vmatpush.bf16.msra.mxu1 %v1299_v2  ;;  %v1289_v23 = vld [vmem:[%s1753_s23 + $0xd8] sm:$0xff]  ;;  %v1282_v26 = vld [vmem:[%s1753_s23 + $0xa0] sm:$0xff]  ;;  %v1283_v30 = vld [vmem:[%s1753_s23 + $0xa8] sm:$0xff] }
  0x19   : > { %1500 = vmatpush.bf16.msra.mxu2 %v1299_v2  ;;  %1501 = vmatpush.bf16.msra.mxu3 %v1299_v2  ;;  %v1290_v27 = vld [vmem:[%s1753_s23 + $0xe0] sm:$0xff]  ;;  %v1291_v31 = vld [vmem:[%s1753_s23 + $0xe8] sm:$0xff]  ;;  %v1268_v32 = vld [vmem:[%s1753_s23 + $0x30] sm:$0xff] }
  0x1a   : > { %v1276_v33 = vld [vmem:[%s1753_s23 + $0x70] sm:$0xff]  ;;  %v1269_v36 = vld [vmem:[%s1753_s23 + $0x38] sm:$0xff] }
  0x1b   : > { %v1284_v34 = vld [vmem:[%s1753_s23 + $0xb0] sm:$0xff]  ;;  %v1277_v37 = vld [vmem:[%s1753_s23 + $0x78] sm:$0xff] }
  0x1c   : > { %597 = vmatpush.bf16.msra.mxu0 %v1298_v3  ;;  %1502 = vmatpush.bf16.msra.mxu1 %v1298_v3  ;;  %v1292_v35 = vld [vmem:[%s1753_s23 + $0xf0] sm:$0xff]  ;;  %v1285_v38 = vld [vmem:[%s1753_s23 + $0xb8] sm:$0xff] }
  0x1d   : > { %1503 = vmatpush.bf16.msra.mxu2 %v1298_v3  ;;  %1504 = vmatpush.bf16.msra.mxu3 %v1298_v3  ;;  %v1293_v39 = vld [vmem:[%s1753_s23 + $0xf8] sm:$0xff] }
  0x20   : > { %598 = vmatpush.bf16.msra.mxu0 %v1297_v4  ;;  %1505 = vmatpush.bf16.msra.mxu1 %v1297_v4 }
  0x21   : > { %1506 = vmatpush.bf16.msra.mxu2 %v1297_v4  ;;  %1507 = vmatpush.bf16.msra.mxu3 %v1297_v4 }
  0x24   : > { %599 = vmatpush.bf16.msra.mxu0 %v1296_v5  ;;  %1508 = vmatpush.bf16.msra.mxu1 %v1296_v5 }
  0x25   : > { %1509 = vmatpush.bf16.msra.mxu2 %v1296_v5  ;;  %1510 = vmatpush.bf16.msra.mxu3 %v1296_v5 }
  0x28   : > { %600 = vmatpush.bf16.msra.mxu0 %v1295_v6  ;;  %1511 = vmatpush.bf16.msra.mxu1 %v1295_v6 }
  0x29   : > { %1512 = vmatpush.bf16.msra.mxu2 %v1295_v6  ;;  %1513 = vmatpush.bf16.msra.mxu3 %v1295_v6 }
  0x2c   : > { %601 = vmatpush.bf16.msra.mxu0 %v1294_v7  ;;  %1514 = vmatpush.bf16.msra.mxu1 %v1294_v7 }
  0x2d   : > { %1515 = vmatpush.bf16.msra.mxu2 %v1294_v7  ;;  %1516 = vmatpush.bf16.msra.mxu3 %v1294_v7 }
  0x2f   : > { %602 = vmatmul.bf16.vlgmr.msra.gmra.mxu0 %v1262_v8  ;;  %642 = vmatmul.bf16.vlgmr.msra.gmra.mxu1 %v1270_v9 }
  0x30   : > { %682 = vmatmul.bf16.vlgmr.msra.gmra.mxu2 %v1278_v10  ;;  %722 = vmatmul.bf16.vlgmr.msra.gmra.mxu3 %v1286_v11 }
  0x3f   : > { %607 = vmatmul.bf16.gmra.mxu0 %v1263_v12  ;;  %647 = vmatmul.bf16.gmra.mxu1 %v1271_v13 }
  0x40   : > { %687 = vmatmul.bf16.gmra.mxu2 %v1279_v14  ;;  %727 = vmatmul.bf16.gmra.mxu3 %v1287_v15 }
  0x4f   : > { %612 = vmatmul.bf16.gmra.mxu0 %v1264_v16  ;;  %652 = vmatmul.bf16.gmra.mxu1 %v1272_v17 }
  0x50   : > { %692 = vmatmul.bf16.gmra.mxu2 %v1280_v18  ;;  %732 = vmatmul.bf16.gmra.mxu3 %v1288_v19 }
  0x5f   : > { %617 = vmatmul.bf16.gmra.mxu0 %v1265_v20  ;;  %657 = vmatmul.bf16.gmra.mxu1 %v1273_v21 }
  0x60   : > { %697 = vmatmul.bf16.gmra.mxu2 %v1281_v22  ;;  %737 = vmatmul.bf16.gmra.mxu3 %v1289_v23 }
  0x6f   : > { %622 = vmatmul.bf16.gmra.mxu0 %v1266_v24  ;;  %662 = vmatmul.bf16.gmra.mxu1 %v1274_v25 }
  0x70   : > { %702 = vmatmul.bf16.gmra.mxu2 %v1282_v26  ;;  %742 = vmatmul.bf16.gmra.mxu3 %v1290_v27 }
  0x7f   : > { %627 = vmatmul.bf16.gmra.mxu0 %v1267_v28  ;;  %667 = vmatmul.bf16.gmra.mxu1 %v1275_v29 }
  0x80   : > { %707 = vmatmul.bf16.gmra.mxu2 %v1283_v30  ;;  %747 = vmatmul.bf16.gmra.mxu3 %v1291_v31 }
  0x8f   : > { %632 = vmatmul.bf16.gmra.mxu0 %v1268_v32  ;;  %672 = vmatmul.bf16.gmra.mxu1 %v1276_v33 }
  0x90   : > { %712 = vmatmul.bf16.gmra.mxu2 %v1284_v34  ;;  %752 = vmatmul.bf16.gmra.mxu3 %v1292_v35 }
  0x9f   : > { %637 = vmatmul.bf16.gmra.mxu0 %v1269_v36  ;;  %677 = vmatmul.bf16.gmra.mxu1 %v1277_v37 }
  0xa0   : > { %717 = vmatmul.bf16.gmra.mxu2 %v1285_v38  ;;  %757 = vmatmul.bf16.gmra.mxu3 %v1293_v39 }
  0xac   : > { %v603_v40 = vpop.f32.mrf.mxu0  ;;  %v643_v41 = vpop.f32.mrf.mxu1 }
  0xad   : > { %v604_v43 = vadd.f32 %v1791_v42, %v603_v40  ;;  %v644_v44 = vadd.f32 %v1791_v42, %v643_v41 }
  0xaf   : > { %1542 = vtanh.f32 %v604_v43 }
  0xb0   : > { %1544 = vtanh.f32 %v644_v44 }
  0xb3   : > { %v683_v45 = vpop.f32.mrf.mxu2  ;;  %v723_v46 = vpop.f32.mrf.mxu3 }
  0xb4   : > { %v605_v47 = vpop.f32.mrf.mxu0  ;;  %v645_v48 = vpop.f32.mrf.mxu1  ;;  %v684_v51 = vadd.f32 %v1791_v42, %v683_v45  ;;  %v724_v52 = vadd.f32 %v1791_v42, %v723_v46 }
  0xb5   : > { %v606_v49 = vadd.f32 %v1791_v42, %v605_v47  ;;  %v646_v50 = vadd.f32 %v1791_v42, %v645_v48  ;;  %v1543_v55 = vpop.eup %1542 }
  0xb6   : > { %v1545_v60 = vpop.eup %1544 }
  0xb7   : > { %1546 = vtanh.f32 %v606_v49 }
  0xb8   : > { %1548 = vtanh.f32 %v646_v50 }
  0xb9   : > { %1550 = vtanh.f32 %v684_v51 }
  0xba   : > { %1552 = vtanh.f32 %v724_v52 }
  0xbb   : > { %v685_v53 = vpop.f32.mrf.mxu2  ;;  %v725_v54 = vpop.f32.mrf.mxu3 }
  0xbc   : > { %v686_v56 = vadd.f32 %v1791_v42, %v685_v53  ;;  %v726_v57 = vadd.f32 %v1791_v42, %v725_v54  ;;  %v608_v58 = vpop.f32.mrf.mxu0  ;;  %v648_v59 = vpop.f32.mrf.mxu1 }
  0xbd   : > { %v1547_v61 = vpop.eup %1546  ;;  %v609_v2 = vadd.f32 %v1791_v42, %v608_v58  ;;  %v649_v4 = vadd.f32 %v1791_v42, %v648_v59 }
  0xbe   : > { %1554 = vtanh.f32 %v686_v56  ;;  %v1549_v62 = vpop.eup %1548  ;;  %v1305_v63 = vpack.c.bf16 %v1547_v61, %v1543_v55 }
  0xbf   : > { %1556 = vtanh.f32 %v726_v57  ;;  %v1345_v0 = vpack.c.bf16 %v1549_v62, %v1545_v60  ;;  %v1551_v1 = vpop.eup %1550 }
  0xc0   : > { %1306 = vst [vmem:[%s1806_s28] sm:$0xff] %v1305_v63   ;;  %v1553_v3 = vpop.eup %1552  ;;  %1558 = vtanh.f32 %v609_v2 }
  0xc1   : > { %1469 = vst [vmem:[%s1806_s28 + $0x40] sm:$0xff] %v1345_v0   ;;  %1560 = vtanh.f32 %v649_v4 }
  0xc3   : > { %v688_v5 = vpop.f32.mrf.mxu2  ;;  %v728_v6 = vpop.f32.mrf.mxu3 }
  0xc4   : > { %v1555_v7 = vpop.eup %1554  ;;  %v610_v8 = vpop.f32.mrf.mxu0  ;;  %v689_v15 = vadd.f32 %v1791_v42, %v688_v5  ;;  %v729_v16 = vadd.f32 %v1791_v42, %v728_v6 }
  0xc5   : > { %v650_v9 = vpop.f32.mrf.mxu1  ;;  %v1557_v10 = vpop.eup %1556  ;;  %v1385_v11 = vpack.c.bf16 %v1555_v7, %v1551_v1  ;;  %v611_v12 = vadd.f32 %v1791_v42, %v610_v8 }
  0xc6   : > { %v651_v13 = vadd.f32 %v1791_v42, %v650_v9  ;;  %v1425_v14 = vpack.c.bf16 %v1557_v10, %v1553_v3  ;;  %v1559_v19 = vpop.eup %1558 }
  0xc7   : > { %1477 = vst [vmem:[%s1806_s28 + $0x80] sm:$0xff] %v1385_v11   ;;  %1562 = vtanh.f32 %v611_v12  ;;  %v1561_v24 = vpop.eup %1560 }
  0xc8   : > { %1485 = vst [vmem:[%s1806_s28 + $0xc0] sm:$0xff] %v1425_v14   ;;  %1564 = vtanh.f32 %v651_v13 }
  0xc9   : > { %1566 = vtanh.f32 %v689_v15 }
  0xca   : > { %1568 = vtanh.f32 %v729_v16 }
  0xcb   : > { %v690_v17 = vpop.f32.mrf.mxu2  ;;  %v730_v18 = vpop.f32.mrf.mxu3 }
  0xcc   : > { %v691_v20 = vadd.f32 %v1791_v42, %v690_v17  ;;  %v731_v21 = vadd.f32 %v1791_v42, %v730_v18  ;;  %v613_v22 = vpop.f32.mrf.mxu0 }
  0xcd   : > { %v653_v23 = vpop.f32.mrf.mxu1  ;;  %v1563_v25 = vpop.eup %1562  ;;  %v614_v30 = vadd.f32 %v1791_v42, %v613_v22 }
  0xce   : > { %1570 = vtanh.f32 %v691_v20  ;;  %v1565_v26 = vpop.eup %1564  ;;  %v1310_v27 = vpack.c.bf16 %v1563_v25, %v1559_v19  ;;  %v654_v32 = vadd.f32 %v1791_v42, %v653_v23 }
  0xcf   : > { %1572 = vtanh.f32 %v731_v21  ;;  %v1350_v28 = vpack.c.bf16 %v1565_v26, %v1561_v24  ;;  %v1567_v29 = vpop.eup %1566 }
  0xd0   : > { %1462 = vst [vmem:[%s1806_s28 + $0x8] sm:$0xff] %v1310_v27   ;;  %v1569_v31 = vpop.eup %1568  ;;  %1574 = vtanh.f32 %v614_v30 }
  0xd1   : > { %1470 = vst [vmem:[%s1806_s28 + $0x48] sm:$0xff] %v1350_v28   ;;  %1576 = vtanh.f32 %v654_v32 }
  0xd3   : > { %v693_v33 = vpop.f32.mrf.mxu2  ;;  %v733_v34 = vpop.f32.mrf.mxu3 }
  0xd4   : > { %v1571_v35 = vpop.eup %1570  ;;  %v615_v36 = vpop.f32.mrf.mxu0  ;;  %v694_v44 = vadd.f32 %v1791_v42, %v693_v33  ;;  %v734_v45 = vadd.f32 %v1791_v42, %v733_v34 }
  0xd5   : > { %v655_v37 = vpop.f32.mrf.mxu1  ;;  %v1573_v38 = vpop.eup %1572  ;;  %v1390_v39 = vpack.c.bf16 %v1571_v35, %v1567_v29  ;;  %v616_v40 = vadd.f32 %v1791_v42, %v615_v36 }
  0xd6   : > { %v656_v41 = vadd.f32 %v1791_v42, %v655_v37  ;;  %v1430_v43 = vpack.c.bf16 %v1573_v38, %v1569_v31  ;;  %v1575_v48 = vpop.eup %1574 }
  0xd7   : > { %1478 = vst [vmem:[%s1806_s28 + $0x88] sm:$0xff] %v1390_v39   ;;  %1578 = vtanh.f32 %v616_v40  ;;  %v1577_v53 = vpop.eup %1576 }
  0xd8   : > { %1486 = vst [vmem:[%s1806_s28 + $0xc8] sm:$0xff] %v1430_v43   ;;  %1580 = vtanh.f32 %v656_v41 }
  0xd9   : > { %1582 = vtanh.f32 %v694_v44 }
  0xda   : > { %1584 = vtanh.f32 %v734_v45 }
  0xdb   : > { %v695_v46 = vpop.f32.mrf.mxu2  ;;  %v735_v47 = vpop.f32.mrf.mxu3 }
  0xdc   : > { %v696_v49 = vadd.f32 %v1791_v42, %v695_v46  ;;  %v736_v50 = vadd.f32 %v1791_v42, %v735_v47  ;;  %v618_v51 = vpop.f32.mrf.mxu0 }
  0xdd   : > { %v658_v52 = vpop.f32.mrf.mxu1  ;;  %v1579_v54 = vpop.eup %1578  ;;  %v619_v59 = vadd.f32 %v1791_v42, %v618_v51 }
  0xde   : > { %1586 = vtanh.f32 %v696_v49  ;;  %v1581_v55 = vpop.eup %1580  ;;  %v1315_v56 = vpack.c.bf16 %v1579_v54, %v1575_v48  ;;  %v659_v61 = vadd.f32 %v1791_v42, %v658_v52 }
  0xdf   : > { %1588 = vtanh.f32 %v736_v50  ;;  %v1355_v57 = vpack.c.bf16 %v1581_v55, %v1577_v53  ;;  %v1583_v58 = vpop.eup %1582 }
  0xe0   : > { %1463 = vst [vmem:[%s1806_s28 + $0x10] sm:$0xff] %v1315_v56   ;;  %v1585_v60 = vpop.eup %1584  ;;  %1590 = vtanh.f32 %v619_v59 }
  0xe1   : > { %1471 = vst [vmem:[%s1806_s28 + $0x50] sm:$0xff] %v1355_v57   ;;  %1592 = vtanh.f32 %v659_v61 }
  0xe3   : > { %v698_v62 = vpop.f32.mrf.mxu2  ;;  %v738_v63 = vpop.f32.mrf.mxu3 }
  0xe4   : > { %v1587_v0 = vpop.eup %1586  ;;  %v620_v1 = vpop.f32.mrf.mxu0  ;;  %v699_v8 = vadd.f32 %v1791_v42, %v698_v62  ;;  %v739_v9 = vadd.f32 %v1791_v42, %v738_v63 }
  0xe5   : > { %v660_v2 = vpop.f32.mrf.mxu1  ;;  %v1589_v3 = vpop.eup %1588  ;;  %v1395_v4 = vpack.c.bf16 %v1587_v0, %v1583_v58  ;;  %v621_v5 = vadd.f32 %v1791_v42, %v620_v1 }
  0xe6   : > { %v661_v6 = vadd.f32 %v1791_v42, %v660_v2  ;;  %v1435_v7 = vpack.c.bf16 %v1589_v3, %v1585_v60  ;;  %v1591_v12 = vpop.eup %1590 }
  0xe7   : > { %1479 = vst [vmem:[%s1806_s28 + $0x90] sm:$0xff] %v1395_v4   ;;  %1594 = vtanh.f32 %v621_v5  ;;  %v1593_v17 = vpop.eup %1592 }
  0xe8   : > { %1487 = vst [vmem:[%s1806_s28 + $0xd0] sm:$0xff] %v1435_v7   ;;  %1596 = vtanh.f32 %v661_v6 }
  0xe9   : > { %1598 = vtanh.f32 %v699_v8 }
  0xea   : > { %1600 = vtanh.f32 %v739_v9 }
  0xeb   : > { %v700_v10 = vpop.f32.mrf.mxu2  ;;  %v740_v11 = vpop.f32.mrf.mxu3 }
  0xec   : > { %v701_v13 = vadd.f32 %v1791_v42, %v700_v10  ;;  %v741_v14 = vadd.f32 %v1791_v42, %v740_v11  ;;  %v623_v15 = vpop.f32.mrf.mxu0 }
  0xed   : > { %v663_v16 = vpop.f32.mrf.mxu1  ;;  %v1595_v18 = vpop.eup %1594  ;;  %v624_v23 = vadd.f32 %v1791_v42, %v623_v15 }
  0xee   : > { %1602 = vtanh.f32 %v701_v13  ;;  %v1597_v19 = vpop.eup %1596  ;;  %v1320_v20 = vpack.c.bf16 %v1595_v18, %v1591_v12  ;;  %v664_v25 = vadd.f32 %v1791_v42, %v663_v16 }
  0xef   : > { %1604 = vtanh.f32 %v741_v14  ;;  %v1360_v21 = vpack.c.bf16 %v1597_v19, %v1593_v17  ;;  %v1599_v22 = vpop.eup %1598 }
  0xf0   : > { %1464 = vst [vmem:[%s1806_s28 + $0x18] sm:$0xff] %v1320_v20   ;;  %v1601_v24 = vpop.eup %1600  ;;  %1606 = vtanh.f32 %v624_v23 }
  0xf1   : > { %1472 = vst [vmem:[%s1806_s28 + $0x58] sm:$0xff] %v1360_v21   ;;  %1608 = vtanh.f32 %v664_v25 }
  0xf3   : > { %v703_v26 = vpop.f32.mrf.mxu2  ;;  %v743_v27 = vpop.f32.mrf.mxu3 }
  0xf4   : > { %v1603_v28 = vpop.eup %1602  ;;  %v625_v29 = vpop.f32.mrf.mxu0  ;;  %v704_v36 = vadd.f32 %v1791_v42, %v703_v26  ;;  %v744_v37 = vadd.f32 %v1791_v42, %v743_v27 }
  0xf5   : > { %v665_v30 = vpop.f32.mrf.mxu1  ;;  %v1605_v31 = vpop.eup %1604  ;;  %v1400_v32 = vpack.c.bf16 %v1603_v28, %v1599_v22  ;;  %v626_v33 = vadd.f32 %v1791_v42, %v625_v29 }
  0xf6   : > { %v666_v34 = vadd.f32 %v1791_v42, %v665_v30  ;;  %v1440_v35 = vpack.c.bf16 %v1605_v31, %v1601_v24  ;;  %v1607_v40 = vpop.eup %1606 }
  0xf7   : > { %1480 = vst [vmem:[%s1806_s28 + $0x98] sm:$0xff] %v1400_v32   ;;  %1610 = vtanh.f32 %v626_v33  ;;  %v1609_v46 = vpop.eup %1608 }
  0xf8   : > { %1488 = vst [vmem:[%s1806_s28 + $0xd8] sm:$0xff] %v1440_v35   ;;  %1612 = vtanh.f32 %v666_v34 }
  0xf9   : > { %1614 = vtanh.f32 %v704_v36 }
  0xfa   : > { %1616 = vtanh.f32 %v744_v37 }
  0xfb   : > { %v705_v38 = vpop.f32.mrf.mxu2  ;;  %v745_v39 = vpop.f32.mrf.mxu3 }
  0xfc   : > { %v706_v41 = vadd.f32 %v1791_v42, %v705_v38  ;;  %v746_v43 = vadd.f32 %v1791_v42, %v745_v39  ;;  %v628_v44 = vpop.f32.mrf.mxu0 }
  0xfd   : > { %v668_v45 = vpop.f32.mrf.mxu1  ;;  %v1611_v47 = vpop.eup %1610  ;;  %v629_v52 = vadd.f32 %v1791_v42, %v628_v44 }
  0xfe   : > { %1618 = vtanh.f32 %v706_v41  ;;  %v1613_v48 = vpop.eup %1612  ;;  %v1325_v49 = vpack.c.bf16 %v1611_v47, %v1607_v40  ;;  %v669_v54 = vadd.f32 %v1791_v42, %v668_v45 }
  0xff   : > { %1620 = vtanh.f32 %v746_v43  ;;  %v1365_v50 = vpack.c.bf16 %v1613_v48, %v1609_v46  ;;  %v1615_v51 = vpop.eup %1614 }
 0x100   : > { %1465 = vst [vmem:[%s1806_s28 + $0x20] sm:$0xff] %v1325_v49   ;;  %v1617_v53 = vpop.eup %1616  ;;  %1622 = vtanh.f32 %v629_v52 }
 0x101   : > { %1473 = vst [vmem:[%s1806_s28 + $0x60] sm:$0xff] %v1365_v50   ;;  %1624 = vtanh.f32 %v669_v54 }
 0x103   : > { %v708_v55 = vpop.f32.mrf.mxu2  ;;  %v748_v56 = vpop.f32.mrf.mxu3 }
 0x104   : > { %v1619_v57 = vpop.eup %1618  ;;  %v630_v58 = vpop.f32.mrf.mxu0  ;;  %v709_v1 = vadd.f32 %v1791_v42, %v708_v55  ;;  %v749_v2 = vadd.f32 %v1791_v42, %v748_v56 }
 0x105   : > { %v670_v59 = vpop.f32.mrf.mxu1  ;;  %v1621_v60 = vpop.eup %1620  ;;  %v1405_v61 = vpack.c.bf16 %v1619_v57, %v1615_v51  ;;  %v631_v62 = vadd.f32 %v1791_v42, %v630_v58 }
 0x106   : > { %v671_v63 = vadd.f32 %v1791_v42, %v670_v59  ;;  %v1445_v0 = vpack.c.bf16 %v1621_v60, %v1617_v53  ;;  %v1623_v5 = vpop.eup %1622 }
 0x107   : > { %1481 = vst [vmem:[%s1806_s28 + $0xa0] sm:$0xff] %v1405_v61   ;;  %1626 = vtanh.f32 %v631_v62  ;;  %v1625_v10 = vpop.eup %1624 }
 0x108   : > { %1489 = vst [vmem:[%s1806_s28 + $0xe0] sm:$0xff] %v1445_v0   ;;  %1628 = vtanh.f32 %v671_v63 }
 0x109   : > { %1630 = vtanh.f32 %v709_v1 }
 0x10a   : > { %1632 = vtanh.f32 %v749_v2 }
 0x10b   : > { %v710_v3 = vpop.f32.mrf.mxu2  ;;  %v750_v4 = vpop.f32.mrf.mxu3 }
 0x10c   : > { %v711_v6 = vadd.f32 %v1791_v42, %v710_v3  ;;  %v751_v7 = vadd.f32 %v1791_v42, %v750_v4  ;;  %v633_v8 = vpop.f32.mrf.mxu0 }
 0x10d   : > { %v673_v9 = vpop.f32.mrf.mxu1  ;;  %v1627_v11 = vpop.eup %1626  ;;  %v634_v16 = vadd.f32 %v1791_v42, %v633_v8 }
 0x10e   : > { %1634 = vtanh.f32 %v711_v6  ;;  %v1629_v12 = vpop.eup %1628  ;;  %v1330_v13 = vpack.c.bf16 %v1627_v11, %v1623_v5  ;;  %v674_v18 = vadd.f32 %v1791_v42, %v673_v9 }
 0x10f   : > { %1636 = vtanh.f32 %v751_v7  ;;  %v1370_v14 = vpack.c.bf16 %v1629_v12, %v1625_v10  ;;  %v1631_v15 = vpop.eup %1630 }
 0x110   : > { %1466 = vst [vmem:[%s1806_s28 + $0x28] sm:$0xff] %v1330_v13   ;;  %v1633_v17 = vpop.eup %1632  ;;  %1638 = vtanh.f32 %v634_v16 }
 0x111   : > { %1474 = vst [vmem:[%s1806_s28 + $0x68] sm:$0xff] %v1370_v14   ;;  %1640 = vtanh.f32 %v674_v18 }
 0x113   : > { %v713_v19 = vpop.f32.mrf.mxu2  ;;  %v753_v20 = vpop.f32.mrf.mxu3 }
 0x114   : > { %v1635_v21 = vpop.eup %1634  ;;  %v635_v22 = vpop.f32.mrf.mxu0  ;;  %v714_v29 = vadd.f32 %v1791_v42, %v713_v19  ;;  %v754_v30 = vadd.f32 %v1791_v42, %v753_v20 }
 0x115   : > { %v675_v23 = vpop.f32.mrf.mxu1  ;;  %v1637_v24 = vpop.eup %1636  ;;  %v1410_v25 = vpack.c.bf16 %v1635_v21, %v1631_v15  ;;  %v636_v26 = vadd.f32 %v1791_v42, %v635_v22 }
 0x116   : > { %v676_v27 = vadd.f32 %v1791_v42, %v675_v23  ;;  %v1450_v28 = vpack.c.bf16 %v1637_v24, %v1633_v17  ;;  %v1639_v33 = vpop.eup %1638 }
 0x117   : > { %1482 = vst [vmem:[%s1806_s28 + $0xa8] sm:$0xff] %v1410_v25   ;;  %1642 = vtanh.f32 %v636_v26  ;;  %v1641_v38 = vpop.eup %1640 }
 0x118   : > { %1490 = vst [vmem:[%s1806_s28 + $0xe8] sm:$0xff] %v1450_v28   ;;  %1644 = vtanh.f32 %v676_v27 }
 0x119   : > { %1646 = vtanh.f32 %v714_v29 }
 0x11a   : > { %1648 = vtanh.f32 %v754_v30 }
 0x11b   : > { %v715_v31 = vpop.f32.mrf.mxu2  ;;  %v755_v32 = vpop.f32.mrf.mxu3 }
 0x11c   : > { %v716_v34 = vadd.f32 %v1791_v42, %v715_v31  ;;  %v756_v35 = vadd.f32 %v1791_v42, %v755_v32  ;;  %v638_v36 = vpop.f32.mrf.mxu0 }
 0x11d   : > { %v678_v37 = vpop.f32.mrf.mxu1  ;;  %v1643_v39 = vpop.eup %1642  ;;  %v639_v45 = vadd.f32 %v1791_v42, %v638_v36 }
 0x11e   : > { %1650 = vtanh.f32 %v716_v34  ;;  %v1645_v40 = vpop.eup %1644  ;;  %v1335_v41 = vpack.c.bf16 %v1643_v39, %v1639_v33  ;;  %v679_v47 = vadd.f32 %v1791_v42, %v678_v37 }
 0x11f   : > { %1652 = vtanh.f32 %v756_v35  ;;  %v1375_v43 = vpack.c.bf16 %v1645_v40, %v1641_v38  ;;  %v1647_v44 = vpop.eup %1646 }
 0x120   : > { %1467 = vst [vmem:[%s1806_s28 + $0x30] sm:$0xff] %v1335_v41   ;;  %v1649_v46 = vpop.eup %1648  ;;  %1654 = vtanh.f32 %v639_v45 }
 0x121   : > { %1475 = vst [vmem:[%s1806_s28 + $0x70] sm:$0xff] %v1375_v43   ;;  %1656 = vtanh.f32 %v679_v47 }
 0x123   : > { %v718_v48 = vpop.f32.mrf.mxu2  ;;  %v758_v49 = vpop.f32.mrf.mxu3 }
 0x124   : > { %v1651_v50 = vpop.eup %1650  ;;  %v640_v51 = vpop.f32.mrf.mxu0  ;;  %v719_v58 = vadd.f32 %v1791_v42, %v718_v48  ;;  %v759_v59 = vadd.f32 %v1791_v42, %v758_v49 }
 0x125   : > { %v680_v52 = vpop.f32.mrf.mxu1  ;;  %v1653_v53 = vpop.eup %1652  ;;  %v1415_v54 = vpack.c.bf16 %v1651_v50, %v1647_v44  ;;  %v641_v55 = vadd.f32 %v1791_v42, %v640_v51 }
 0x126   : > { %v681_v56 = vadd.f32 %v1791_v42, %v680_v52  ;;  %v1455_v57 = vpack.c.bf16 %v1653_v53, %v1649_v46  ;;  %v1655_v62 = vpop.eup %1654 }
 0x127   : > { %1483 = vst [vmem:[%s1806_s28 + $0xb0] sm:$0xff] %v1415_v54   ;;  %1658 = vtanh.f32 %v641_v55  ;;  %v1657_v1 = vpop.eup %1656 }
 0x128   : > { %1491 = vst [vmem:[%s1806_s28 + $0xf0] sm:$0xff] %v1455_v57   ;;  %1660 = vtanh.f32 %v681_v56 }
 0x129   : > { %1662 = vtanh.f32 %v719_v58 }
 0x12a   : > { %1664 = vtanh.f32 %v759_v59 }
 0x12b   : > { %v720_v60 = vpop.f32.mrf.mxu2  ;;  %v760_v61 = vpop.f32.mrf.mxu3 }
 0x12c   : > { %v721_v63 = vadd.f32 %v1791_v42, %v720_v60  ;;  %v761_v0 = vadd.f32 %v1791_v42, %v760_v61 }
 0x12d   : > { %v1659_v2 = vpop.eup %1658 }
 0x12e   : > { %1666 = vtanh.f32 %v721_v63  ;;  %v1661_v3 = vpop.eup %1660  ;;  %v1340_v4 = vpack.c.bf16 %v1659_v2, %v1655_v62 }
 0x12f   : > { %1668 = vtanh.f32 %v761_v0  ;;  %v1380_v5 = vpack.c.bf16 %v1661_v3, %v1657_v1  ;;  %v1663_v6 = vpop.eup %1662 }
 0x130   : > { %1468 = vst [vmem:[%s1806_s28 + $0x38] sm:$0xff] %v1340_v4   ;;  %v1665_v7 = vpop.eup %1664 }
 0x131   : > { %1476 = vst [vmem:[%s1806_s28 + $0x78] sm:$0xff] %v1380_v5  }
 0x134   : > { %v1667_v8 = vpop.eup %1666 }
 0x135   : > { %v1669_v9 = vpop.eup %1668  ;;  %v1420_v10 = vpack.c.bf16 %v1667_v8, %v1663_v6 }
 0x136   : > { %v1460_v11 = vpack.c.bf16 %v1669_v9, %v1665_v7 }
 0x137   : > { %1484 = vst [vmem:[%s1806_s28 + $0xb8] sm:$0xff] %v1420_v10  }
 0x138   : > { %1492 = vst [vmem:[%s1806_s28 + $0xf8] sm:$0xff] %v1460_v11  }
 0x139 PF: > { %s13_s14 = sadd.s32 1, %s1692_s14   ;;  %s1909_s12 = smov %s1688_s13 }
 0x13a   : > { %p10_p5 = scmp.ge.s32.totalorder %s13_s14, 6   ;;  %s1910_s13 = smov %s1912_s15 }
 0x13c   :  { %12 = sbr.rel (!%p10_p5) target bundleno = 2 (0x2), region = 68 }

</bundles_post_ra>
